<compile_context>
chip_gen: v6e
topology: v6e:2x2x1
jax: 0.10.0
libtpu: 0.0.40
codegen_flags: <defaults>
</compile_context>

<pallas_src>
import functools

import jax
import jax.numpy as jnp
from jax import lax
from jax.experimental import pallas as pl
from jax.experimental.pallas import tpu as pltpu

EPS = 1e-5  # PyTorch BatchNorm3d default


# ----------------------------- Pallas kernels ------------------------------ #

def _gemm_bias_relu_kernel(p_ref, w_ref, sh_ref, o_ref, acc_ref):
    # out = relu(P @ W + shift), K tiled as a reduction axis (grid axis 1).
    @pl.when(pl.program_id(1) == 0)
    def _init():
        acc_ref[...] = jnp.zeros_like(acc_ref)

    acc_ref[...] += jnp.dot(p_ref[...], w_ref[...],
                            preferred_element_type=jnp.float32)

    @pl.when(pl.program_id(1) == pl.num_programs(1) - 1)
    def _done():
        o_ref[...] = jnp.maximum(acc_ref[...] + sh_ref[...], 0.0).astype(o_ref.dtype)


def _gemm_bias_skip_relu_kernel(p_ref, w_ref, sh_ref, s_ref, o_ref, acc_ref):
    # Identity-skip variant: out = relu(P @ W + shift + skip)  (skip add on VPU).
    @pl.when(pl.program_id(1) == 0)
    def _init():
        acc_ref[...] = jnp.zeros_like(acc_ref)

    acc_ref[...] += jnp.dot(p_ref[...], w_ref[...],
                            preferred_element_type=jnp.float32)

    @pl.when(pl.program_id(1) == pl.num_programs(1) - 1)
    def _done():
        o_ref[...] = jnp.maximum(acc_ref[...] + sh_ref[...] + s_ref[...],
                                 0.0).astype(o_ref.dtype)


# ----------------------------- Pallas wrapper ------------------------------ #

def _choose_tk(k, cap=2048):
    """Largest lane-aligned divisor of k that is <= cap (else k itself)."""
    if k <= cap:
        return k
    for tk in (2048, 1536, 1024, 768, 512, 384, 256, 128):
        if k % tk == 0:
            return tk
    return k


def _pad_rows(a, tm):
    m = a.shape[0]
    mp = ((m + tm - 1) // tm) * tm
    if mp != m:
        a = jnp.pad(a, ((0, mp - m), (0, 0)))
    return a


def fused_gemm_bias_relu(patches, wmat, shift, skip=None, tm=512):
    """relu(patches @ wmat + shift [+ skip]) tiled over rows and (optionally) K."""
    m, k = patches.shape
    cout = wmat.shape[1]
    shift2d = shift.reshape(1, cout).astype(jnp.float32)

    if m <= tm:
        tm_eff = m                       # single row tile == full dim
        patches_p = patches
        skip_p = skip
    else:
        tm_eff = tm
        patches_p = _pad_rows(patches, tm)       # no-op when tm | m
        skip_p = None if skip is None else _pad_rows(skip, tm)
    mp = patches_p.shape[0]

    tk = _choose_tk(k)
    nk = k // tk
    grid = (mp // tm_eff, nk)

    in_specs = [
        pl.BlockSpec((tm_eff, tk), lambda i, kk: (i, kk)),
        pl.BlockSpec((tk, cout), lambda i, kk: (kk, 0)),
        pl.BlockSpec((1, cout), lambda i, kk: (0, 0)),
    ]
    args = [patches_p.astype(jnp.float32), wmat.astype(jnp.float32), shift2d]
    if skip is None:
        kernel = _gemm_bias_relu_kernel
    else:
        kernel = _gemm_bias_skip_relu_kernel
        in_specs.append(pl.BlockSpec((tm_eff, cout), lambda i, kk: (i, 0)))
        args.append(skip_p.astype(jnp.float32))

    # VMEM budget: double-buffered operand tiles + output + accumulator (+ skip).
    f32b = 4
    tile_bytes = (2 * tm_eff * tk + 2 * tk * cout + 2 * tm_eff * cout
                  + tm_eff * cout + 2 * 8 * 128) * f32b
    if skip is not None:
        tile_bytes += 2 * tm_eff * cout * f32b
    vmem_limit = int(min(56 * 1024 * 1024, max(32 * 1024 * 1024, 2 * tile_bytes)))

    flops = 2 * mp * k * cout
    bytes_accessed = f32b * (mp * k + k * cout + mp * cout
                             + (mp * cout if skip is not None else 0))

    out = pl.pallas_call(
        kernel,
        out_shape=jax.ShapeDtypeStruct((mp, cout), jnp.float32),
        grid=grid,
        in_specs=in_specs,
        out_specs=pl.BlockSpec((tm_eff, cout), lambda i, kk: (i, 0)),
        scratch_shapes=[pltpu.VMEM((tm_eff, cout), jnp.float32)],
        compiler_params=pltpu.CompilerParams(
            dimension_semantics=("parallel", "arbitrary"),
            vmem_limit_bytes=vmem_limit),
        cost_estimate=pl.CostEstimate(flops=flops, transcendentals=0,
                                      bytes_accessed=bytes_accessed),
    )(*args)
    return out if mp == m else out[:m]


# ------------------------------ JAX glue ----------------------------------- #

def _im2col_3d(xp, stride, do, ho, wo):
    """xp: padded channels-last (N, Dp, Hp, Wp, C) -> (N*do*ho*wo, 27*C)."""
    n, _, _, _, c = xp.shape
    taps = []
    for kd in range(3):
        for kh in range(3):
            for kw in range(3):
                taps.append(xp[:,
                               kd:kd + stride * (do - 1) + 1:stride,
                               kh:kh + stride * (ho - 1) + 1:stride,
                               kw:kw + stride * (wo - 1) + 1:stride, :])
    cols = jnp.stack(taps, axis=4)                   # (N, do, ho, wo, 27, C)
    return cols.reshape(n * do * ho * wo, 27 * c)


def _weight_to_gemm(w):
    """PyTorch OIDHW (Cout, Cin, 3, 3, 3) -> (27*Cin, Cout), tap-major order."""
    cout, cin = w.shape[0], w.shape[1]
    return jnp.transpose(w, (2, 3, 4, 1, 0)).reshape(27 * cin, cout)


def _fold_bn(bias, gamma, beta, mean, var):
    scale = gamma / jnp.sqrt(var + EPS)
    shift = beta + scale * (bias - mean)
    return scale, shift


def resblk3d_pallas(x_ncdhw, p, stride=1, tm=512):
    x = jnp.transpose(x_ncdhw, (0, 2, 3, 4, 1)).astype(jnp.float32)   # NDHWC
    n, d, h, w, cin = x.shape
    cout = p["w1"].shape[0]
    do = (d - 1) // stride + 1
    ho = (h - 1) // stride + 1
    wo = (w - 1) // stride + 1

    # conv1 + bn1 + relu  (BN scale folded into weight columns; bias folded into shift)
    sc1, sh1 = _fold_bn(p["b1"], p["g1"], p["bt1"], p["m1"], p["v1"])
    w1 = _weight_to_gemm(p["w1"]) * sc1[None, :]
    xp = jnp.pad(x, ((0, 0), (1, 1), (1, 1), (1, 1), (0, 0)))
    patches1 = _im2col_3d(xp, stride, do, ho, wo)
    out1_rows = fused_gemm_bias_relu(patches1, w1, sh1, tm=tm)
    out1 = out1_rows.reshape(n, do, ho, wo, cout)

    # conv2 + bn2 + skip + relu
    sc2, sh2 = _fold_bn(p["b2"], p["g2"], p["bt2"], p["m2"], p["v2"])
    w2 = _weight_to_gemm(p["w2"]) * sc2[None, :]
    out1p = jnp.pad(out1, ((0, 0), (1, 1), (1, 1), (1, 1), (0, 0)))
    patches2 = _im2col_3d(out1p, 1, do, ho, wo)
    skip_rows = x[:, ::stride, ::stride, ::stride, :].reshape(n * do * ho * wo, cin)

    if cin != cout:
        # 1x1 conv + BN skip merged into the same GEMM (extra K columns), so the
        # whole second stage is one dot + add + relu per tile.
        sce, she = _fold_bn(p["be"], p["ge"], p["bte"], p["me"], p["ve"])
        we = p["we"].reshape(cout, cin).T * sce[None, :]
        pat = jnp.concatenate([patches2, skip_rows], axis=1)
        wcat = jnp.concatenate([w2, we], axis=0)
        out_rows = fused_gemm_bias_relu(pat, wcat, sh2 + she, tm=tm)
    else:
        # Identity skip: pure VPU add inside the kernel (no identity matmul).
        out_rows = fused_gemm_bias_relu(patches2, w2, sh2, skip=skip_rows, tm=tm)

    out = out_rows.reshape(n, do, ho, wo, cout)
    return jnp.transpose(out, (0, 4, 1, 2, 3))        # back to NCDHW


# ------------------------------ reference ---------------------------------- #

def resblk3d_ref(x, p, stride=1):
    def conv(x, w, b, s, pad):
        y = lax.conv_general_dilated(x, w, (s, s, s), [(pad, pad)] * 3,
                                     dimension_numbers=("NCDHW", "OIDHW", "NCDHW"))
        return y + b.reshape(1, -1, 1, 1, 1)

    def bn(y, g, b, m, v):
        r = lambda a: a.reshape(1, -1, 1, 1, 1)
        return (y - r(m)) / jnp.sqrt(r(v) + EPS) * r(g) + r(b)

    out = jax.nn.relu(bn(conv(x, p["w1"], p["b1"], stride, 1),
                         p["g1"], p["bt1"], p["m1"], p["v1"]))
    out = bn(conv(out, p["w2"], p["b2"], 1, 1), p["g2"], p["bt2"], p["m2"], p["v2"])
    if p["w1"].shape[0] != p["w1"].shape[1]:
        skip = bn(conv(x, p["we"], p["be"], stride, 0),
                  p["ge"], p["bte"], p["me"], p["ve"])
    else:
        skip = x
    return jax.nn.relu(skip + out)


# --------------------------------- main ------------------------------------ #

def init_params(key, ch_in, ch_out):
    ks = jax.random.split(key, 16)
    f32 = jnp.float32

    def nrm(k, shape, s=0.1):
        return (s * jax.random.normal(k, shape)).astype(f32)

    p = {
        "w1": nrm(ks[0], (ch_out, ch_in, 3, 3, 3)),
        "b1": nrm(ks[1], (ch_out,)),
        "g1": 1.0 + nrm(ks[2], (ch_out,)),
        "bt1": nrm(ks[3], (ch_out,)),
        "m1": nrm(ks[4], (ch_out,)),
        "v1": 1.0 + jnp.abs(nrm(ks[5], (ch_out,))),
        "w2": nrm(ks[6], (ch_out, ch_out, 3, 3, 3)),
        "b2": nrm(ks[7], (ch_out,)),
        "g2": 1.0 + nrm(ks[8], (ch_out,)),
        "bt2": nrm(ks[9], (ch_out,)),
        "m2": nrm(ks[10], (ch_out,)),
        "v2": 1.0 + jnp.abs(nrm(ks[11], (ch_out,))),
    }
    if ch_in != ch_out:
        p.update({
            "we": nrm(ks[12], (ch_out, ch_in, 1, 1, 1)),
            "be": nrm(ks[13], (ch_out,)),
            "ge": 1.0 + nrm(ks[14], (ch_out,)),
            "bte": nrm(ks[15], (ch_out,)),
            "me": nrm(ks[14], (ch_out,)) * 0.5,
            "ve": 1.0 + jnp.abs(nrm(ks[15], (ch_out,))) * 0.5,
        })
    return p


if __name__ == "__main__":
    ch_in, ch_out, stride = 4, 8, 1
    N, D, H, W = 2, 8, 8, 8

    key = jax.random.PRNGKey(0)
    kx, kp = jax.random.split(key)
    x = jax.random.normal(kx, (N, ch_in, D, H, W), dtype=jnp.float32)   # NCDHW (PyTorch)
    params = init_params(kp, ch_in, ch_out)

    fwd = jax.jit(functools.partial(resblk3d_pallas, stride=stride))
    out = fwd(x, params)
    out = jax.block_until_ready(out)

    ref = resblk3d_ref(x, params, stride=stride)
    assert out.shape == ref.shape, (out.shape, ref.shape)
    max_err = float(jnp.max(jnp.abs(out - ref)))
    assert max_err < 1e-4, f"mismatch vs reference: {max_err}"

    print("KERNEL_OK")
</pallas_src>

<mosaic_0001>
module attributes {stable_mosaic.version = 11 : i64} {
  func.func @_gemm_bias_relu_kernel(%arg0: i32, %arg1: i32, %arg2: memref<512x108xf32, #tpu.memory_space<vmem>>, %arg3: memref<108x8xf32, #tpu.memory_space<vmem>>, %arg4: memref<1x8xf32, #tpu.memory_space<vmem>>, %arg5: memref<512x8xf32, #tpu.memory_space<vmem>>, %arg6: memref<512x8xf32, #tpu.memory_space<vmem>>) attributes {dimension_semantics = [#tpu.dimension_semantics<parallel>, #tpu.dimension_semantics<arbitrary>], iteration_bounds = array<i64: 2, 1>, scalar_prefetch = 0 : i64, scratch_operands = 1 : i64, tpu.core_type = #tpu.core_type<tc>, window_params = [{transform_indices = @transform_0, window_bounds = array<i64: 512, 108>}, {transform_indices = @transform_1, window_bounds = array<i64: 108, 8>}, {pipeline_mode = #tpu.pipeline_mode<synchronous>, transform_indices = @transform_2, window_bounds = array<i64: 1, 8>}, {transform_indices = @transform_3, window_bounds = array<i64: 512, 8>}]} {
    %c0_i32 = arith.constant 0 : i32
    %0 = arith.cmpi eq, %arg1, %c0_i32 : i32
    %1 = arith.extui %0 : i1 to i32
    %c0_i32_0 = arith.constant 0 : i32
    %2 = arith.cmpi ne, %1, %c0_i32_0 : i32
    scf.if %2 {
      %cst_10 = arith.constant 0.000000e+00 : f32
      %12 = vector.broadcast %cst_10 : f32 to vector<512x8xf32>
      %c0_11 = arith.constant 0 : index
      %c0_12 = arith.constant 0 : index
      %13 = vector.load %arg6[%c0_11, %c0_12] : memref<512x8xf32, #tpu.memory_space<vmem>>, vector<512x8xf32>
      tpu.vector_store %arg6[%c0_11, %c0_12], %12 {strides = array<i32>} : memref<512x8xf32, #tpu.memory_space<vmem>>, vector<512x8xf32>,
    } else {
    }
    %c0 = arith.constant 0 : index
    %c0_1 = arith.constant 0 : index
    %3 = vector.load %arg6[%c0, %c0_1] : memref<512x8xf32, #tpu.memory_space<vmem>>, vector<512x8xf32>
    %c0_2 = arith.constant 0 : index
    %c0_3 = arith.constant 0 : index
    %4 = vector.load %arg2[%c0_2, %c0_3] : memref<512x108xf32, #tpu.memory_space<vmem>>, vector<512x108xf32>
    %c0_4 = arith.constant 0 : index
    %c0_5 = arith.constant 0 : index
    %5 = vector.load %arg3[%c0_4, %c0_5] : memref<108x8xf32, #tpu.memory_space<vmem>>, vector<108x8xf32>
    %cst = arith.constant dense<0.000000e+00> : vector<512x8xf32>
    %6 = tpu.matmul %4, %5, %cst {dimension_numbers = #tpu.dot_dimension_numbers<[1], [0], [0], [1], [0, 0, 1, 1], [], []>} : vector<512x108xf32>, vector<108x8xf32>, vector<512x8xf32> -> vector<512x8xf32>
    %7 = arith.addf %3, %6 : vector<512x8xf32>
    %c0_6 = arith.constant 0 : index
    %c0_7 = arith.constant 0 : index
    %8 = vector.load %arg6[%c0_6, %c0_7] : memref<512x8xf32, #tpu.memory_space<vmem>>, vector<512x8xf32>
    tpu.vector_store %arg6[%c0_6, %c0_7], %7 {strides = array<i32>} : memref<512x8xf32, #tpu.memory_space<vmem>>, vector<512x8xf32>,
    %c0_i32_8 = arith.constant 0 : i32
    %9 = arith.cmpi eq, %arg1, %c0_i32_8 : i32
    %10 = arith.extui %9 : i1 to i32
    %c0_i32_9 = arith.constant 0 : i32
    %11 = arith.cmpi ne, %10, %c0_i32_9 : i32
    scf.if %11 {
      %c0_10 = arith.constant 0 : index
      %c0_11 = arith.constant 0 : index
      %12 = vector.load %arg6[%c0_10, %c0_11] : memref<512x8xf32, #tpu.memory_space<vmem>>, vector<512x8xf32>
      %c0_12 = arith.constant 0 : index
      %c0_13 = arith.constant 0 : index
      %13 = vector.load %arg4[%c0_12, %c0_13] : memref<1x8xf32, #tpu.memory_space<vmem>>, vector<1x8xf32>
      %14 = vector.broadcast %13 : vector<1x8xf32> to vector<512x8xf32>
      %15 = arith.addf %12, %14 : vector<512x8xf32>
      %cst_14 = arith.constant 0.000000e+00 : f32
      %16 = vector.broadcast %cst_14 : f32 to vector<512x8xf32>
      %17 = arith.maximumf %15, %16 : vector<512x8xf32>
      %c0_15 = arith.constant 0 : index
      %c0_16 = arith.constant 0 : index
      %18 = vector.load %arg5[%c0_15, %c0_16] : memref<512x8xf32, #tpu.memory_space<vmem>>, vector<512x8xf32>
      tpu.vector_store %arg5[%c0_15, %c0_16], %17 {strides = array<i32>} : memref<512x8xf32, #tpu.memory_space<vmem>>, vector<512x8xf32>,
    } else {
    }
    return
  }
  func.func @transform_0(%arg0: i32, %arg1: i32) -> (i32, i32) {
    %c0_i32 = arith.constant 0 : i32
    return %arg0, %arg1 : i32, i32
  }
  func.func @transform_1(%arg0: i32, %arg1: i32) -> (i32, i32) {
    %c0_i32 = arith.constant 0 : i32
    %c0_i32_0 = arith.constant 0 : i32
    return %arg1, %c0_i32 : i32, i32
  }
  func.func @transform_2(%arg0: i32, %arg1: i32) -> (i32, i32) {
    %c0_i32 = arith.constant 0 : i32
    %c0_i32_0 = arith.constant 0 : i32
    %c0_i32_1 = arith.constant 0 : i32
    return %c0_i32, %c0_i32_0 : i32, i32
  }
  func.func @transform_3(%arg0: i32, %arg1: i32) -> (i32, i32) {
    %c0_i32 = arith.constant 0 : i32
    %c0_i32_0 = arith.constant 0 : i32
    return %arg0, %c0_i32 : i32, i32
  }
}

module attributes {stable_mosaic.version = 11 : i64} {
  func.func @_gemm_bias_relu_kernel(%arg0: i32, %arg1: i32, %arg2: memref<512x220xf32, #tpu.memory_space<vmem>>, %arg3: memref<220x8xf32, #tpu.memory_space<vmem>>, %arg4: memref<1x8xf32, #tpu.memory_space<vmem>>, %arg5: memref<512x8xf32, #tpu.memory_space<vmem>>, %arg6: memref<512x8xf32, #tpu.memory_space<vmem>>) attributes {dimension_semantics = [#tpu.dimension_semantics<parallel>, #tpu.dimension_semantics<arbitrary>], iteration_bounds = array<i64: 2, 1>, scalar_prefetch = 0 : i64, scratch_operands = 1 : i64, tpu.core_type = #tpu.core_type<tc>, window_params = [{transform_indices = @transform_0, window_bounds = array<i64: 512, 220>}, {transform_indices = @transform_1, window_bounds = array<i64: 220, 8>}, {pipeline_mode = #tpu.pipeline_mode<synchronous>, transform_indices = @transform_2, window_bounds = array<i64: 1, 8>}, {transform_indices = @transform_3, window_bounds = array<i64: 512, 8>}]} {
    %c0_i32 = arith.constant 0 : i32
    %0 = arith.cmpi eq, %arg1, %c0_i32 : i32
    %1 = arith.extui %0 : i1 to i32
    %c0_i32_0 = arith.constant 0 : i32
    %2 = arith.cmpi ne, %1, %c0_i32_0 : i32
    scf.if %2 {
      %cst_10 = arith.constant 0.000000e+00 : f32
      %12 = vector.broadcast %cst_10 : f32 to vector<512x8xf32>
      %c0_11 = arith.constant 0 : index
      %c0_12 = arith.constant 0 : index
      %13 = vector.load %arg6[%c0_11, %c0_12] : memref<512x8xf32, #tpu.memory_space<vmem>>, vector<512x8xf32>
      tpu.vector_store %arg6[%c0_11, %c0_12], %12 {strides = array<i32>} : memref<512x8xf32, #tpu.memory_space<vmem>>, vector<512x8xf32>,
    } else {
    }
    %c0 = arith.constant 0 : index
    %c0_1 = arith.constant 0 : index
    %3 = vector.load %arg6[%c0, %c0_1] : memref<512x8xf32, #tpu.memory_space<vmem>>, vector<512x8xf32>
    %c0_2 = arith.constant 0 : index
    %c0_3 = arith.constant 0 : index
    %4 = vector.load %arg2[%c0_2, %c0_3] : memref<512x220xf32, #tpu.memory_space<vmem>>, vector<512x220xf32>
    %c0_4 = arith.constant 0 : index
    %c0_5 = arith.constant 0 : index
    %5 = vector.load %arg3[%c0_4, %c0_5] : memref<220x8xf32, #tpu.memory_space<vmem>>, vector<220x8xf32>
    %cst = arith.constant dense<0.000000e+00> : vector<512x8xf32>
    %6 = tpu.matmul %4, %5, %cst {dimension_numbers = #tpu.dot_dimension_numbers<[1], [0], [0], [1], [0, 0, 1, 1], [], []>} : vector<512x220xf32>, vector<220x8xf32>, vector<512x8xf32> -> vector<512x8xf32>
    %7 = arith.addf %3, %6 : vector<512x8xf32>
    %c0_6 = arith.constant 0 : index
    %c0_7 = arith.constant 0 : index
    %8 = vector.load %arg6[%c0_6, %c0_7] : memref<512x8xf32, #tpu.memory_space<vmem>>, vector<512x8xf32>
    tpu.vector_store %arg6[%c0_6, %c0_7], %7 {strides = array<i32>} : memref<512x8xf32, #tpu.memory_space<vmem>>, vector<512x8xf32>,
    %c0_i32_8 = arith.constant 0 : i32
    %9 = arith.cmpi eq, %arg1, %c0_i32_8 : i32
    %10 = arith.extui %9 : i1 to i32
    %c0_i32_9 = arith.constant 0 : i32
    %11 = arith.cmpi ne, %10, %c0_i32_9 : i32
    scf.if %11 {
      %c0_10 = arith.constant 0 : index
      %c0_11 = arith.constant 0 : index
      %12 = vector.load %arg6[%c0_10, %c0_11] : memref<512x8xf32, #tpu.memory_space<vmem>>, vector<512x8xf32>
      %c0_12 = arith.constant 0 : index
      %c0_13 = arith.constant 0 : index
      %13 = vector.load %arg4[%c0_12, %c0_13] : memref<1x8xf32, #tpu.memory_space<vmem>>, vector<1x8xf32>
      %14 = vector.broadcast %13 : vector<1x8xf32> to vector<512x8xf32>
      %15 = arith.addf %12, %14 : vector<512x8xf32>
      %cst_14 = arith.constant 0.000000e+00 : f32
      %16 = vector.broadcast %cst_14 : f32 to vector<512x8xf32>
      %17 = arith.maximumf %15, %16 : vector<512x8xf32>
      %c0_15 = arith.constant 0 : index
      %c0_16 = arith.constant 0 : index
      %18 = vector.load %arg5[%c0_15, %c0_16] : memref<512x8xf32, #tpu.memory_space<vmem>>, vector<512x8xf32>
      tpu.vector_store %arg5[%c0_15, %c0_16], %17 {strides = array<i32>} : memref<512x8xf32, #tpu.memory_space<vmem>>, vector<512x8xf32>,
    } else {
    }
    return
  }
  func.func @transform_0(%arg0: i32, %arg1: i32) -> (i32, i32) {
    %c0_i32 = arith.constant 0 : i32
    return %arg0, %arg1 : i32, i32
  }
  func.func @transform_1(%arg0: i32, %arg1: i32) -> (i32, i32) {
    %c0_i32 = arith.constant 0 : i32
    %c0_i32_0 = arith.constant 0 : i32
    return %arg1, %c0_i32 : i32, i32
  }
  func.func @transform_2(%arg0: i32, %arg1: i32) -> (i32, i32) {
    %c0_i32 = arith.constant 0 : i32
    %c0_i32_0 = arith.constant 0 : i32
    %c0_i32_1 = arith.constant 0 : i32
    return %c0_i32, %c0_i32_0 : i32, i32
  }
  func.func @transform_3(%arg0: i32, %arg1: i32) -> (i32, i32) {
    %c0_i32 = arith.constant 0 : i32
    %c0_i32_0 = arith.constant 0 : i32
    return %arg0, %c0_i32 : i32, i32
  }
}

</mosaic_0001>

<bundles_post_ra>
// kernel: resblk3d_pallas.2
= control target key start
LH: loop header
LB: loop body
LE: loop exit
PB: predicated region body
PF: predicated region fallthrough
CT: control target
= control target key end

     0   :  { %s1868_s12 = smov 0   ;;  %s1870_s13 = smov 0   ;;  %s2486_s0 = inlined_call_operand.vmem [shape: f32[1024,108], index: 0, kind: input, shape index: {}]   ;;  %s2487_s1 = inlined_call_operand.vmem [shape: f32[108,8], index: 1, kind: input, shape index: {}]   ;;  %s2488_s2 = inlined_call_operand.vmem [shape: f32[1,8], index: 2, kind: input, shape index: {}]   ;;  %s2489_s3 = inlined_call_operand.vmem [shape: f32[1024,8], index: 3, kind: output, shape index: {}]  }
   0x1   :  { %s1872_s14 = smov 0  }
   0x2 LB: > { %s25_s15 = sadd.s32 1, %s1841_s13  ;;  %p1495_p0 = scmp.ge.s32.totalorder %s1845_s14, 1  ;;  %s1845_s14 = sphi %s1872_s14, %s13_s14   ;;  %s1841_s13 = sphi %s1870_s13, %s2491_s13   ;;  %s1837_s12 = sphi %s1868_s12, %s2490_s12  }
   0x3   : > { %p27_p1 = scmp.ge.s32.totalorder %s25_s15, 2  ;;  %p166_p2 = scmp.lt.s32.totalorder %s1845_s14, 3 }
   0x5   : > { %s2493_s15 = smov (%p27_p1, %s25_s15), 0  ;;  %p167_p3 = pnand %p1495_p0, %p166_p2 }
   0x6   : > { %s1496_s28 = sshll.u32 (!%p167_p3), %s1837_s12, 6 }
   0x7   : > { %170 = sbr.rel (%p167_p3) target bundleno = 313 (0x139), region = 32  ;;  %p199_p4 = scmp.lt.s32.totalorder (!%p167_p3), %s1496_s28, 127 }
   0xc   : > { %v429_v0 = vld [vmem:[%s2487_s1 + $0x68] sm:$0xf]  ;;  %vm623_vm0 = vcmask 1043456   ;;  %v1894_v1 = vld [vmem:[%s2487_s1 + $0x60] sm:$0xff]  ;;  %vm223_vm1 = vcmask 64512   ;;  %v1899_v2 = vld [vmem:[%s2487_s1 + $0x58] sm:$0xff] }
   0xd   : > { %1646 = vmatprep.subr.msk.mxu0 %vm623_vm0, %v429_v0  ;;  %1770 = vmatprep.subr.msk.mxu1 %vm623_vm0, %v429_v0  ;;  %v1847_v3 = vmov 0.0   ;;  %v426_v4 = vld [vmem:[%s2487_s1 + $0x50] sm:$0xff]  ;;  %v425_v5 = vld [vmem:[%s2487_s1 + $0x48] sm:$0xff]  ;;  %v424_v6 = vld [vmem:[%s2487_s1 + $0x40] sm:$0xff]  ;;  %s2495_s28 = smov (!%p199_p4, %s1496_s28), 127  ;;  %vm430_vm2 = vcmask 883712  }
   0xe   : > { %1647 = vmatpush3.msk.msra.mxu0 %vm623_vm0, %v429_v0  ;;  %1784 = vmatpush3.msk.msra.mxu1 %vm623_vm0, %v429_v0  ;;  %225 = vst.msk [vmem:[#allocation2 + $0x8] sm:$0xff] %vm223_vm1, %v1847_v3  ;;  %224 = vst.msk [vmem:[#allocation2] sm:$0xff] %vm223_vm1, %v1847_v3  ;;  %v423_v7 = vld [vmem:[%s2487_s1 + $0x38] sm:$0xff]  ;;  %v422_v8 = vld [vmem:[%s2487_s1 + $0x30] sm:$0xff]  ;;  %s1497_s17 = sshll.u32 %s2495_s28, 3 }
   0xf   : > { %1648 = vmatprep.subr.mxu0 %v1894_v1  ;;  %1771 = vmatprep.subr.mxu1 %v1894_v1  ;;  %226 = vst.msk [vmem:[#allocation2 + $0x10] sm:$0xff] %vm223_vm1, %v1847_v3  ;;  %227 = vst.msk [vmem:[#allocation2 + $0x18] sm:$0xff] %vm223_vm1, %v1847_v3  ;;  %v421_v9 = vld [vmem:[%s2487_s1 + $0x28] sm:$0xff]  ;;  %v420_v10 = vld [vmem:[%s2487_s1 + $0x20] sm:$0xff]  ;;  %s2076_s22 = scalar_lea.vmem %s2486_s0, %s1497_s17  ;;  %s2231_s30 = scalar_lea.vmem %s2489_s3, %s1497_s17 }
  0x10   : > { %228 = vst.msk [vmem:[#allocation2 + $0x20] sm:$0xff] %vm223_vm1, %v1847_v3  ;;  %229 = vst.msk [vmem:[#allocation2 + $0x28] sm:$0xff] %vm223_vm1, %v1847_v3  ;;  %1649 = vmatpush3.msra.mxu0 %v1894_v1  ;;  %1785 = vmatpush3.msra.mxu1 %v1894_v1  ;;  %v419_v11 = vld [vmem:[%s2487_s1 + $0x18] sm:$0xff]  ;;  %v418_v12 = vld [vmem:[%s2487_s1 + $0x10] sm:$0xff] }
  0x11   : > { %230 = vst.msk [vmem:[#allocation2 + $0x30] sm:$0xff] %vm223_vm1, %v1847_v3  ;;  %231 = vst.msk [vmem:[#allocation2 + $0x38] sm:$0xff] %vm223_vm1, %v1847_v3  ;;  %1650 = vmatprep.subr.mxu0 %v1899_v2  ;;  %1772 = vmatprep.subr.mxu1 %v1899_v2  ;;  %v417_v13 = vld [vmem:[%s2487_s1 + $0x8] sm:$0xff]  ;;  %v416_v14 = vld [vmem:[%s2487_s1] sm:$0xff] }
  0x12   : > { %232 = vst.msk [vmem:[#allocation2 + $0x40] sm:$0xff] %vm223_vm1, %v1847_v3  ;;  %233 = vst.msk [vmem:[#allocation2 + $0x48] sm:$0xff] %vm223_vm1, %v1847_v3  ;;  %1651 = vmatpush3.msra.mxu0 %v1899_v2  ;;  %1786 = vmatpush3.msra.mxu1 %v1899_v2  ;;  %v352_v15 = vld [vmem:[%s2076_s22] sm:$0xff]  ;;  %v353_v17 = vld [vmem:[%s2076_s22 + $0x8] sm:$0xff] }
  0x13   : > { %234 = vst.msk [vmem:[#allocation2 + $0x50] sm:$0xff] %vm223_vm1, %v1847_v3  ;;  %235 = vst.msk [vmem:[#allocation2 + $0x58] sm:$0xff] %vm223_vm1, %v1847_v3  ;;  %1652 = vmatprep.subr.mxu0 %v426_v4  ;;  %1773 = vmatprep.subr.mxu1 %v426_v4  ;;  %v384_v16 = vld [vmem:[%s2076_s22 + $0x100] sm:$0xff]  ;;  %v385_v18 = vld [vmem:[%s2076_s22 + $0x108] sm:$0xff] }
  0x14   : > { %236 = vst.msk [vmem:[#allocation2 + $0x60] sm:$0xff] %vm223_vm1, %v1847_v3  ;;  %237 = vst.msk [vmem:[#allocation2 + $0x68] sm:$0xff] %vm223_vm1, %v1847_v3  ;;  %1653 = vmatpush3.msra.mxu0 %v426_v4  ;;  %1787 = vmatpush3.msra.mxu1 %v426_v4  ;;  %v354_v19 = vld [vmem:[%s2076_s22 + $0x10] sm:$0xff]  ;;  %v355_v21 = vld [vmem:[%s2076_s22 + $0x18] sm:$0xff] }
  0x15   : > { %238 = vst.msk [vmem:[#allocation2 + $0x70] sm:$0xff] %vm223_vm1, %v1847_v3  ;;  %239 = vst.msk [vmem:[#allocation2 + $0x78] sm:$0xff] %vm223_vm1, %v1847_v3  ;;  %1654 = vmatprep.subr.mxu0 %v425_v5  ;;  %1774 = vmatprep.subr.mxu1 %v425_v5  ;;  %v386_v20 = vld [vmem:[%s2076_s22 + $0x110] sm:$0xff]  ;;  %v387_v22 = vld [vmem:[%s2076_s22 + $0x118] sm:$0xff] }
  0x16   : > { %240 = vst.msk [vmem:[#allocation2 + $0x80] sm:$0xff] %vm223_vm1, %v1847_v3  ;;  %241 = vst.msk [vmem:[#allocation2 + $0x88] sm:$0xff] %vm223_vm1, %v1847_v3  ;;  %1655 = vmatpush3.msra.mxu0 %v425_v5  ;;  %1788 = vmatpush3.msra.mxu1 %v425_v5  ;;  %v356_v23 = vld [vmem:[%s2076_s22 + $0x20] sm:$0xff]  ;;  %v357_v25 = vld [vmem:[%s2076_s22 + $0x28] sm:$0xff] }
  0x17   : > { %242 = vst.msk [vmem:[#allocation2 + $0x90] sm:$0xff] %vm223_vm1, %v1847_v3  ;;  %243 = vst.msk [vmem:[#allocation2 + $0x98] sm:$0xff] %vm223_vm1, %v1847_v3  ;;  %1656 = vmatprep.subr.mxu0 %v424_v6  ;;  %1775 = vmatprep.subr.mxu1 %v424_v6  ;;  %v388_v24 = vld [vmem:[%s2076_s22 + $0x120] sm:$0xff]  ;;  %v389_v26 = vld [vmem:[%s2076_s22 + $0x128] sm:$0xff] }
  0x18   : > { %244 = vst.msk [vmem:[#allocation2 + $0xa0] sm:$0xff] %vm223_vm1, %v1847_v3  ;;  %245 = vst.msk [vmem:[#allocation2 + $0xa8] sm:$0xff] %vm223_vm1, %v1847_v3  ;;  %1657 = vmatpush3.msra.mxu0 %v424_v6  ;;  %1789 = vmatpush3.msra.mxu1 %v424_v6  ;;  %v358_v27 = vld [vmem:[%s2076_s22 + $0x30] sm:$0xff]  ;;  %v359_v29 = vld [vmem:[%s2076_s22 + $0x38] sm:$0xff] }
  0x19   : > { %246 = vst.msk [vmem:[#allocation2 + $0xb0] sm:$0xff] %vm223_vm1, %v1847_v3  ;;  %247 = vst.msk [vmem:[#allocation2 + $0xb8] sm:$0xff] %vm223_vm1, %v1847_v3  ;;  %1658 = vmatprep.subr.mxu0 %v423_v7  ;;  %1776 = vmatprep.subr.mxu1 %v423_v7  ;;  %v390_v28 = vld [vmem:[%s2076_s22 + $0x130] sm:$0xff]  ;;  %v391_v30 = vld [vmem:[%s2076_s22 + $0x138] sm:$0xff] }
  0x1a   : > { %248 = vst.msk [vmem:[#allocation2 + $0xc0] sm:$0xff] %vm223_vm1, %v1847_v3  ;;  %249 = vst.msk [vmem:[#allocation2 + $0xc8] sm:$0xff] %vm223_vm1, %v1847_v3  ;;  %1659 = vmatpush3.msra.mxu0 %v423_v7  ;;  %1790 = vmatpush3.msra.mxu1 %v423_v7  ;;  %v360_v31 = vld [vmem:[%s2076_s22 + $0x40] sm:$0xff]  ;;  %v361_v33 = vld [vmem:[%s2076_s22 + $0x48] sm:$0xff] }
  0x1b   : > { %250 = vst.msk [vmem:[#allocation2 + $0xd0] sm:$0xff] %vm223_vm1, %v1847_v3  ;;  %251 = vst.msk [vmem:[#allocation2 + $0xd8] sm:$0xff] %vm223_vm1, %v1847_v3  ;;  %1660 = vmatprep.subr.mxu0 %v422_v8  ;;  %1777 = vmatprep.subr.mxu1 %v422_v8  ;;  %v392_v32 = vld [vmem:[%s2076_s22 + $0x140] sm:$0xff]  ;;  %v393_v34 = vld [vmem:[%s2076_s22 + $0x148] sm:$0xff] }
  0x1c   : > { %252 = vst.msk [vmem:[#allocation2 + $0xe0] sm:$0xff] %vm223_vm1, %v1847_v3  ;;  %253 = vst.msk [vmem:[#allocation2 + $0xe8] sm:$0xff] %vm223_vm1, %v1847_v3  ;;  %1661 = vmatpush3.msra.mxu0 %v422_v8  ;;  %1791 = vmatpush3.msra.mxu1 %v422_v8  ;;  %v362_v35 = vld [vmem:[%s2076_s22 + $0x50] sm:$0xff]  ;;  %v363_v37 = vld [vmem:[%s2076_s22 + $0x58] sm:$0xff] }
  0x1d   : > { %254 = vst.msk [vmem:[#allocation2 + $0xf0] sm:$0xff] %vm223_vm1, %v1847_v3  ;;  %255 = vst.msk [vmem:[#allocation2 + $0xf8] sm:$0xff] %vm223_vm1, %v1847_v3  ;;  %1662 = vmatprep.subr.mxu0 %v421_v9  ;;  %1778 = vmatprep.subr.mxu1 %v421_v9  ;;  %v394_v36 = vld [vmem:[%s2076_s22 + $0x150] sm:$0xff]  ;;  %v395_v38 = vld [vmem:[%s2076_s22 + $0x158] sm:$0xff] }
  0x1e   : > { %256 = vst.msk [vmem:[#allocation2 + $0x100] sm:$0xff] %vm223_vm1, %v1847_v3  ;;  %257 = vst.msk [vmem:[#allocation2 + $0x108] sm:$0xff] %vm223_vm1, %v1847_v3  ;;  %1663 = vmatpush3.msra.mxu0 %v421_v9  ;;  %1792 = vmatpush3.msra.mxu1 %v421_v9  ;;  %v364_v39 = vld [vmem:[%s2076_s22 + $0x60] sm:$0xff]  ;;  %v365_v41 = vld [vmem:[%s2076_s22 + $0x68] sm:$0xff] }
  0x1f   : > { %258 = vst.msk [vmem:[#allocation2 + $0x110] sm:$0xff] %vm223_vm1, %v1847_v3  ;;  %259 = vst.msk [vmem:[#allocation2 + $0x118] sm:$0xff] %vm223_vm1, %v1847_v3  ;;  %1664 = vmatprep.subr.mxu0 %v420_v10  ;;  %1779 = vmatprep.subr.mxu1 %v420_v10  ;;  %v396_v40 = vld [vmem:[%s2076_s22 + $0x160] sm:$0xff]  ;;  %v397_v42 = vld [vmem:[%s2076_s22 + $0x168] sm:$0xff] }
  0x20   : > { %260 = vst.msk [vmem:[#allocation2 + $0x120] sm:$0xff] %vm223_vm1, %v1847_v3  ;;  %261 = vst.msk [vmem:[#allocation2 + $0x128] sm:$0xff] %vm223_vm1, %v1847_v3  ;;  %1665 = vmatpush3.msra.mxu0 %v420_v10  ;;  %1793 = vmatpush3.msra.mxu1 %v420_v10  ;;  %v366_v43 = vld [vmem:[%s2076_s22 + $0x70] sm:$0xff]  ;;  %v367_v45 = vld [vmem:[%s2076_s22 + $0x78] sm:$0xff] }
  0x21   : > { %262 = vst.msk [vmem:[#allocation2 + $0x130] sm:$0xff] %vm223_vm1, %v1847_v3  ;;  %263 = vst.msk [vmem:[#allocation2 + $0x138] sm:$0xff] %vm223_vm1, %v1847_v3  ;;  %1666 = vmatprep.subr.mxu0 %v419_v11  ;;  %1780 = vmatprep.subr.mxu1 %v419_v11  ;;  %v398_v44 = vld [vmem:[%s2076_s22 + $0x170] sm:$0xff]  ;;  %v399_v46 = vld [vmem:[%s2076_s22 + $0x178] sm:$0xff] }
  0x22   : > { %264 = vst.msk [vmem:[#allocation2 + $0x140] sm:$0xff] %vm223_vm1, %v1847_v3  ;;  %265 = vst.msk [vmem:[#allocation2 + $0x148] sm:$0xff] %vm223_vm1, %v1847_v3  ;;  %1667 = vmatpush3.msra.mxu0 %v419_v11  ;;  %1794 = vmatpush3.msra.mxu1 %v419_v11  ;;  %v368_v47 = vld [vmem:[%s2076_s22 + $0x80] sm:$0xff]  ;;  %v369_v49 = vld [vmem:[%s2076_s22 + $0x88] sm:$0xff] }
  0x23   : > { %266 = vst.msk [vmem:[#allocation2 + $0x150] sm:$0xff] %vm223_vm1, %v1847_v3  ;;  %267 = vst.msk [vmem:[#allocation2 + $0x158] sm:$0xff] %vm223_vm1, %v1847_v3  ;;  %1668 = vmatprep.subr.mxu0 %v418_v12  ;;  %1781 = vmatprep.subr.mxu1 %v418_v12  ;;  %v400_v48 = vld [vmem:[%s2076_s22 + $0x180] sm:$0xff]  ;;  %v401_v50 = vld [vmem:[%s2076_s22 + $0x188] sm:$0xff] }
  0x24   : > { %268 = vst.msk [vmem:[#allocation2 + $0x160] sm:$0xff] %vm223_vm1, %v1847_v3  ;;  %269 = vst.msk [vmem:[#allocation2 + $0x168] sm:$0xff] %vm223_vm1, %v1847_v3  ;;  %1669 = vmatpush3.msra.mxu0 %v418_v12  ;;  %1795 = vmatpush3.msra.mxu1 %v418_v12  ;;  %v370_v51 = vld [vmem:[%s2076_s22 + $0x90] sm:$0xff]  ;;  %v371_v53 = vld [vmem:[%s2076_s22 + $0x98] sm:$0xff] }
  0x25   : > { %270 = vst.msk [vmem:[#allocation2 + $0x170] sm:$0xff] %vm223_vm1, %v1847_v3  ;;  %271 = vst.msk [vmem:[#allocation2 + $0x178] sm:$0xff] %vm223_vm1, %v1847_v3  ;;  %1670 = vmatprep.subr.mxu0 %v417_v13  ;;  %1782 = vmatprep.subr.mxu1 %v417_v13  ;;  %v402_v52 = vld [vmem:[%s2076_s22 + $0x190] sm:$0xff]  ;;  %v403_v54 = vld [vmem:[%s2076_s22 + $0x198] sm:$0xff] }
  0x26   : > { %272 = vst.msk [vmem:[#allocation2 + $0x180] sm:$0xff] %vm223_vm1, %v1847_v3  ;;  %273 = vst.msk [vmem:[#allocation2 + $0x188] sm:$0xff] %vm223_vm1, %v1847_v3  ;;  %1671 = vmatpush3.msra.mxu0 %v417_v13  ;;  %1796 = vmatpush3.msra.mxu1 %v417_v13  ;;  %v372_v55 = vld [vmem:[%s2076_s22 + $0xa0] sm:$0xff]  ;;  %v373_v57 = vld [vmem:[%s2076_s22 + $0xa8] sm:$0xff] }
  0x27   : > { %274 = vst.msk [vmem:[#allocation2 + $0x190] sm:$0xff] %vm223_vm1, %v1847_v3  ;;  %275 = vst.msk [vmem:[#allocation2 + $0x198] sm:$0xff] %vm223_vm1, %v1847_v3  ;;  %1672 = vmatprep.subr.mxu0 %v416_v14  ;;  %1783 = vmatprep.subr.mxu1 %v416_v14  ;;  %v404_v56 = vld [vmem:[%s2076_s22 + $0x1a0] sm:$0xff]  ;;  %v405_v58 = vld [vmem:[%s2076_s22 + $0x1a8] sm:$0xff] }
  0x28   : > { %276 = vst.msk [vmem:[#allocation2 + $0x1a0] sm:$0xff] %vm223_vm1, %v1847_v3  ;;  %277 = vst.msk [vmem:[#allocation2 + $0x1a8] sm:$0xff] %vm223_vm1, %v1847_v3  ;;  %1673 = vmatpush3.msra.mxu0 %v416_v14  ;;  %1797 = vmatpush3.msra.mxu1 %v416_v14  ;;  %v374_v59 = vld [vmem:[%s2076_s22 + $0xb0] sm:$0xff]  ;;  %v375_v61 = vld [vmem:[%s2076_s22 + $0xb8] sm:$0xff] }
  0x29   : > { %278 = vst.msk [vmem:[#allocation2 + $0x1b0] sm:$0xff] %vm223_vm1, %v1847_v3  ;;  %279 = vst.msk [vmem:[#allocation2 + $0x1b8] sm:$0xff] %vm223_vm1, %v1847_v3  ;;  %1674 = vmatprep.mubr.msk.f32.mxu0 %vm430_vm2, %v352_v15  ;;  %1722 = vmatprep.mubr.msk.f32.mxu1 %vm430_vm2, %v384_v16  ;;  %v406_v60 = vld [vmem:[%s2076_s22 + $0x1b0] sm:$0xff]  ;;  %v407_v62 = vld [vmem:[%s2076_s22 + $0x1b8] sm:$0xff] }
  0x2a   : > { %280 = vst.msk [vmem:[#allocation2 + $0x1c0] sm:$0xff] %vm223_vm1, %v1847_v3  ;;  %281 = vst.msk [vmem:[#allocation2 + $0x1c8] sm:$0xff] %vm223_vm1, %v1847_v3  ;;  %1675 = vmatmul.mubr.msk.f32.vlgmr.msra.gmra.mxu0 %vm430_vm2, %v353_v17  ;;  %1723 = vmatmul.mubr.msk.f32.vlgmr.msra.gmra.mxu1 %vm430_vm2, %v385_v18  ;;  %v376_v63 = vld [vmem:[%s2076_s22 + $0xc0] sm:$0xff]  ;;  %v377_v1 = vld [vmem:[%s2076_s22 + $0xc8] sm:$0xff] }
  0x2b   : > { %282 = vst.msk [vmem:[#allocation2 + $0x1d0] sm:$0xff] %vm223_vm1, %v1847_v3  ;;  %283 = vst.msk [vmem:[#allocation2 + $0x1d8] sm:$0xff] %vm223_vm1, %v1847_v3  ;;  %1677 = vmatprep.mubr.msk.f32.mxu0 %vm430_vm2, %v354_v19  ;;  %1725 = vmatprep.mubr.msk.f32.mxu1 %vm430_vm2, %v386_v20  ;;  %v408_v0 = vld [vmem:[%s2076_s22 + $0x1c0] sm:$0xff]  ;;  %v409_v2 = vld [vmem:[%s2076_s22 + $0x1c8] sm:$0xff] }
  0x2c   : > { %284 = vst.msk [vmem:[#allocation2 + $0x1e0] sm:$0xff] %vm223_vm1, %v1847_v3  ;;  %285 = vst.msk [vmem:[#allocation2 + $0x1e8] sm:$0xff] %vm223_vm1, %v1847_v3  ;;  %v410_v4 = vld [vmem:[%s2076_s22 + $0x1d0] sm:$0xff]  ;;  %v379_v5 = vld [vmem:[%s2076_s22 + $0xd8] sm:$0xff] }
  0x2d   : > { %286 = vst.msk [vmem:[#allocation2 + $0x1f0] sm:$0xff] %vm223_vm1, %v1847_v3  ;;  %287 = vst.msk [vmem:[#allocation2 + $0x1f8] sm:$0xff] %vm223_vm1, %v1847_v3  ;;  %v378_v3 = vld [vmem:[%s2076_s22 + $0xd0] sm:$0xff]  ;;  %v411_v6 = vld [vmem:[%s2076_s22 + $0x1d8] sm:$0xff] }
  0x2e   : > { %1678 = vmatmul.mubr.msk.f32.gmra.mxu0 %vm430_vm2, %v355_v21  ;;  %1726 = vmatmul.mubr.msk.f32.gmra.mxu1 %vm430_vm2, %v387_v22  ;;  %v380_v7 = vld [vmem:[%s2076_s22 + $0xe0] sm:$0xff]  ;;  %v381_v9 = vld [vmem:[%s2076_s22 + $0xe8] sm:$0xff]  ;;  %v382_v11 = vld [vmem:[%s2076_s22 + $0xf0] sm:$0xff] }
  0x2f   : > { %1680 = vmatprep.mubr.msk.f32.mxu0 %vm430_vm2, %v356_v23  ;;  %1728 = vmatprep.mubr.msk.f32.mxu1 %vm430_vm2, %v388_v24  ;;  %v412_v8 = vld [vmem:[%s2076_s22 + $0x1e0] sm:$0xff]  ;;  %v413_v10 = vld [vmem:[%s2076_s22 + $0x1e8] sm:$0xff]  ;;  %v414_v12 = vld [vmem:[%s2076_s22 + $0x1f0] sm:$0xff] }
  0x30   : > { %v383_v13 = vld [vmem:[%s2076_s22 + $0xf8] sm:$0xff]  ;;  %v289_v15 = vld [vmem:[#allocation2 + $0x8] sm:$0xff]  ;;  %v288_v19 = vld [vmem:[#allocation2] sm:$0xff] }
  0x31   : > { %v415_v14 = vld [vmem:[%s2076_s22 + $0x1f8] sm:$0xff]  ;;  %v321_v16 = vld [vmem:[#allocation2 + $0x108] sm:$0xff]  ;;  %v320_v20 = vld [vmem:[#allocation2 + $0x100] sm:$0xff] }
  0x32   : > { %1681 = vmatmul.mubr.msk.f32.gmra.mxu0 %vm430_vm2, %v357_v25  ;;  %1729 = vmatmul.mubr.msk.f32.gmra.mxu1 %vm430_vm2, %v389_v26  ;;  %v291_v25 = vld [vmem:[#allocation2 + $0x18] sm:$0xff] }
  0x33   : > { %1683 = vmatprep.mubr.msk.f32.mxu0 %vm430_vm2, %v358_v27  ;;  %1731 = vmatprep.mubr.msk.f32.mxu1 %vm430_vm2, %v390_v28  ;;  %v323_v26 = vld [vmem:[#allocation2 + $0x118] sm:$0xff] }
  0x36   : > { %1684 = vmatmul.mubr.msk.f32.gmra.mxu0 %vm430_vm2, %v359_v29  ;;  %1732 = vmatmul.mubr.msk.f32.gmra.mxu1 %vm430_vm2, %v391_v30 }
  0x37   : > { %1686 = vmatprep.mubr.msk.f32.mxu0 %vm430_vm2, %v360_v31  ;;  %1734 = vmatprep.mubr.msk.f32.mxu1 %vm430_vm2, %v392_v32  ;;  %v290_v31 = vld [vmem:[#allocation2 + $0x10] sm:$0xff] }
  0x38   : > { %v322_v32 = vld [vmem:[#allocation2 + $0x110] sm:$0xff] }
  0x3a   : > { %1687 = vmatmul.mubr.msk.f32.gmra.mxu0 %vm430_vm2, %v361_v33  ;;  %1735 = vmatmul.mubr.msk.f32.gmra.mxu1 %vm430_vm2, %v393_v34 }
  0x3b   : > { %1689 = vmatprep.mubr.msk.f32.mxu0 %vm430_vm2, %v362_v35  ;;  %1737 = vmatprep.mubr.msk.f32.mxu1 %vm430_vm2, %v394_v36 }
  0x3e   : > { %1690 = vmatmul.mubr.msk.f32.gmra.mxu0 %vm430_vm2, %v363_v37  ;;  %1738 = vmatmul.mubr.msk.f32.gmra.mxu1 %vm430_vm2, %v395_v38  ;;  %v293_v37 = vld [vmem:[#allocation2 + $0x28] sm:$0xff] }
  0x3f   : > { %1692 = vmatprep.mubr.msk.f32.mxu0 %vm430_vm2, %v364_v39  ;;  %1740 = vmatprep.mubr.msk.f32.mxu1 %vm430_vm2, %v396_v40  ;;  %v325_v38 = vld [vmem:[#allocation2 + $0x128] sm:$0xff] }
  0x42   : > { %1693 = vmatmul.mubr.msk.f32.gmra.mxu0 %vm430_vm2, %v365_v41  ;;  %1741 = vmatmul.mubr.msk.f32.gmra.mxu1 %vm430_vm2, %v397_v42  ;;  %v2218_v41 = vld [vmem:[%s2488_s2] ss:$0 sm:$0xff] }
  0x43   : > { %1695 = vmatprep.mubr.msk.f32.mxu0 %vm430_vm2, %v366_v43  ;;  %1743 = vmatprep.mubr.msk.f32.mxu1 %vm430_vm2, %v398_v44  ;;  %v292_v44 = vld [vmem:[#allocation2 + $0x20] sm:$0xff] }
  0x46   : > { %1696 = vmatmul.mubr.msk.f32.gmra.mxu0 %vm430_vm2, %v367_v45  ;;  %1744 = vmatmul.mubr.msk.f32.gmra.mxu1 %vm430_vm2, %v399_v46  ;;  %v324_v45 = vld [vmem:[#allocation2 + $0x120] sm:$0xff] }
  0x47   : > { %1698 = vmatprep.mubr.msk.f32.mxu0 %vm430_vm2, %v368_v47  ;;  %1746 = vmatprep.mubr.msk.f32.mxu1 %vm430_vm2, %v400_v48 }
  0x4a   : > { %1699 = vmatmul.mubr.msk.f32.gmra.mxu0 %vm430_vm2, %v369_v49  ;;  %1747 = vmatmul.mubr.msk.f32.gmra.mxu1 %vm430_vm2, %v401_v50 }
  0x4b   : > { %1701 = vmatprep.mubr.msk.f32.mxu0 %vm430_vm2, %v370_v51  ;;  %1749 = vmatprep.mubr.msk.f32.mxu1 %vm430_vm2, %v402_v52 }
  0x4e   : > { %1702 = vmatmul.mubr.msk.f32.gmra.mxu0 %vm430_vm2, %v371_v53  ;;  %1750 = vmatmul.mubr.msk.f32.gmra.mxu1 %vm430_vm2, %v403_v54 }
  0x4f   : > { %1704 = vmatprep.mubr.msk.f32.mxu0 %vm430_vm2, %v372_v55  ;;  %1752 = vmatprep.mubr.msk.f32.mxu1 %vm430_vm2, %v404_v56  ;;  %v295_v56 = vld [vmem:[#allocation2 + $0x38] sm:$0xff] }
  0x52   : > { %1705 = vmatmul.mubr.msk.f32.gmra.mxu0 %vm430_vm2, %v373_v57  ;;  %1753 = vmatmul.mubr.msk.f32.gmra.mxu1 %vm430_vm2, %v405_v58  ;;  %v327_v57 = vld [vmem:[#allocation2 + $0x138] sm:$0xff] }
  0x53   : > { %1707 = vmatprep.mubr.msk.f32.mxu0 %vm430_vm2, %v374_v59  ;;  %1755 = vmatprep.mubr.msk.f32.mxu1 %vm430_vm2, %v406_v60 }
  0x56   : > { %1708 = vmatmul.mubr.msk.f32.gmra.mxu0 %vm430_vm2, %v375_v61  ;;  %1756 = vmatmul.mubr.msk.f32.gmra.mxu1 %vm430_vm2, %v407_v62 }
  0x57   : > { %1710 = vmatprep.mubr.msk.f32.mxu0 %vm430_vm2, %v376_v63  ;;  %1758 = vmatprep.mubr.msk.f32.mxu1 %vm430_vm2, %v408_v0 }
  0x5a   : > { %1711 = vmatmul.mubr.msk.f32.gmra.mxu0 %vm430_vm2, %v377_v1  ;;  %1759 = vmatmul.mubr.msk.f32.gmra.mxu1 %vm430_vm2, %v409_v2  ;;  %v294_v2 = vld [vmem:[#allocation2 + $0x30] sm:$0xff] }
  0x5b   : > { %1713 = vmatprep.mubr.msk.f32.mxu0 %vm430_vm2, %v378_v3  ;;  %1761 = vmatprep.mubr.msk.f32.mxu1 %vm430_vm2, %v410_v4  ;;  %v326_v3 = vld [vmem:[#allocation2 + $0x130] sm:$0xff] }
  0x5e   : > { %1714 = vmatmul.mubr.msk.f32.gmra.mxu0 %vm430_vm2, %v379_v5  ;;  %1762 = vmatmul.mubr.msk.f32.gmra.mxu1 %vm430_vm2, %v411_v6 }
  0x5f   : > { %1716 = vmatprep.mubr.msk.f32.mxu0 %vm430_vm2, %v380_v7  ;;  %1764 = vmatprep.mubr.msk.f32.mxu1 %vm430_vm2, %v412_v8 }
  0x62   : > { %1717 = vmatmul.mubr.msk.f32.gmra.mxu0 %vm430_vm2, %v381_v9  ;;  %1765 = vmatmul.mubr.msk.f32.gmra.mxu1 %vm430_vm2, %v413_v10 }
  0x63   : > { %1719 = vmatprep.mubr.msk.f32.mxu0 %vm430_vm2, %v382_v11  ;;  %1767 = vmatprep.mubr.msk.f32.mxu1 %vm430_vm2, %v414_v12 }
  0x66   : > { %1720 = vmatmul.mubr.msk.f32.gmra.mxu0 %vm430_vm2, %v383_v13  ;;  %1768 = vmatmul.mubr.msk.f32.gmra.mxu1 %vm430_vm2, %v415_v14  ;;  %v297_v14 = vld [vmem:[#allocation2 + $0x48] sm:$0xff] }
  0xea   : > { %v1676_v17 = vpop.f32.mrf.mxu0  ;;  %v1724_v18 = vpop.f32.mrf.mxu1 }
  0xeb   : > { %v1013_v21 = vadd.f32 %v1676_v17, %v289_v15  ;;  %v1045_v22 = vadd.f32 %v1724_v18, %v321_v16  ;;  %v329_v15 = vld [vmem:[#allocation2 + $0x148] sm:$0xff] }
  0xec   : > { %v693_v23 = vpop.f32.mrf.mxu0  ;;  %v853_v24 = vpop.f32.mrf.mxu1 }
  0xed   : > { %1078 = vst.msk [vmem:[#allocation2 + $0x8] sm:$0xff] %vm223_vm1, %v1013_v21  ;;  %1110 = vst.msk [vmem:[#allocation2 + $0x108] sm:$0xff] %vm223_vm1, %v1045_v22  ;;  %v1012_v27 = vadd.f32 %v693_v23, %v288_v19  ;;  %v1044_v28 = vadd.f32 %v853_v24, %v320_v20 }
  0xee   : > { %v1679_v29 = vpop.f32.mrf.mxu0  ;;  %v1727_v30 = vpop.f32.mrf.mxu1 }
  0xef   : > { %1077 = vst.msk [vmem:[#allocation2] sm:$0xff] %vm223_vm1, %v1012_v27  ;;  %1109 = vst.msk [vmem:[#allocation2 + $0x100] sm:$0xff] %vm223_vm1, %v1044_v28  ;;  %v1015_v33 = vadd.f32 %v1679_v29, %v291_v25  ;;  %v1047_v34 = vadd.f32 %v1727_v30, %v323_v26  ;;  %v296_v26 = vld [vmem:[#allocation2 + $0x40] sm:$0xff] }
  0xf0   : > { %v703_v35 = vpop.f32.mrf.mxu0  ;;  %v863_v36 = vpop.f32.mrf.mxu1  ;;  %v328_v27 = vld [vmem:[#allocation2 + $0x140] sm:$0xff] }
  0xf1   : > { %1080 = vst.msk [vmem:[#allocation2 + $0x18] sm:$0xff] %vm223_vm1, %v1015_v33  ;;  %1112 = vst.msk [vmem:[#allocation2 + $0x118] sm:$0xff] %vm223_vm1, %v1047_v34  ;;  %v1014_v39 = vadd.f32 %v703_v35, %v290_v31  ;;  %v1046_v40 = vadd.f32 %v863_v36, %v322_v32 }
  0xf2   : > { %v1682_v42 = vpop.f32.mrf.mxu0  ;;  %v1730_v43 = vpop.f32.mrf.mxu1 }
  0xf3   : > { %1079 = vst.msk [vmem:[#allocation2 + $0x10] sm:$0xff] %vm223_vm1, %v1014_v39  ;;  %1111 = vst.msk [vmem:[#allocation2 + $0x110] sm:$0xff] %vm223_vm1, %v1046_v40  ;;  %v1017_v46 = vadd.f32 %v1682_v42, %v293_v37  ;;  %v1049_v47 = vadd.f32 %v1730_v43, %v325_v38  ;;  %v299_v38 = vld [vmem:[#allocation2 + $0x58] sm:$0xff]  ;;  %v298_v40 = vld [vmem:[#allocation2 + $0x50] sm:$0xff] }
  0xf4   : > { %v1145_v48 = vld [vmem:[#allocation2 + $0x8] sm:$0xff]  ;;  %v713_v50 = vpop.f32.mrf.mxu0  ;;  %v873_v51 = vpop.f32.mrf.mxu1  ;;  %v331_v39 = vld [vmem:[#allocation2 + $0x158] sm:$0xff] }
  0xf5   : > { %v1177_v49 = vld [vmem:[#allocation2 + $0x108] sm:$0xff]  ;;  %v1216_v52 = vadd.f32 %v2218_v41, %v1145_v48  ;;  %1082 = vst.msk [vmem:[#allocation2 + $0x28] sm:$0xff] %vm223_vm1, %v1017_v46  ;;  %1114 = vst.msk [vmem:[#allocation2 + $0x128] sm:$0xff] %vm223_vm1, %v1049_v47  ;;  %v1016_v54 = vadd.f32 %v713_v50, %v292_v44  ;;  %v1048_v55 = vadd.f32 %v873_v51, %v324_v45  ;;  %v330_v48 = vld [vmem:[#allocation2 + $0x150] sm:$0xff] }
  0xf6   : > { %v1248_v53 = vadd.f32 %v2218_v41, %v1177_v49  ;;  %v1144_v58 = vld [vmem:[#allocation2] sm:$0xff]  ;;  %v1685_v60 = vpop.f32.mrf.mxu0  ;;  %v1733_v61 = vpop.f32.mrf.mxu1 }
  0xf7   : > { %v1176_v59 = vld [vmem:[#allocation2 + $0x100] sm:$0xff]  ;;  %v1280_v62 = vmax.f32 %v1216_v52, 0.0  ;;  %v1215_v0 = vadd.f32 %v2218_v41, %v1144_v58  ;;  %1081 = vst.msk [vmem:[#allocation2 + $0x20] sm:$0xff] %vm223_vm1, %v1016_v54  ;;  %1113 = vst.msk [vmem:[#allocation2 + $0x120] sm:$0xff] %vm223_vm1, %v1048_v55  ;;  %v1019_v6 = vadd.f32 %v1685_v60, %v295_v56  ;;  %v1051_v7 = vadd.f32 %v1733_v61, %v327_v57  ;;  %v301_v57 = vld [vmem:[#allocation2 + $0x68] sm:$0xff] }
  0xf8   : > { %v1312_v63 = vmax.f32 %v1248_v53, 0.0  ;;  %v1247_v1 = vadd.f32 %v2218_v41, %v1176_v59  ;;  %v1147_v4 = vld [vmem:[#allocation2 + $0x18] sm:$0xff]  ;;  %v723_v8 = vpop.f32.mrf.mxu0  ;;  %v883_v9 = vpop.f32.mrf.mxu1  ;;  %v333_v58 = vld [vmem:[#allocation2 + $0x168] sm:$0xff] }
  0xf9   : > { %v1179_v5 = vld [vmem:[#allocation2 + $0x118] sm:$0xff]  ;;  %1344 = vst.msk [vmem:[%s2231_s30 + $0x8] sm:$0xff] %vm223_vm1, %v1280_v62  ;;  %v1279_v10 = vmax.f32 %v1215_v0, 0.0  ;;  %v1218_v12 = vadd.f32 %v2218_v41, %v1147_v4  ;;  %1084 = vst.msk [vmem:[#allocation2 + $0x38] sm:$0xff] %vm223_vm1, %v1019_v6  ;;  %v1018_v18 = vadd.f32 %v723_v8, %v294_v2  ;;  %v1050_v19 = vadd.f32 %v883_v9, %v326_v3  ;;  %v332_v6 = vld [vmem:[#allocation2 + $0x160] sm:$0xff] }
  0xfa   : > { %1376 = vst.msk [vmem:[%s2231_s30 + $0x108] sm:$0xff] %vm223_vm1, %v1312_v63  ;;  %v1311_v11 = vmax.f32 %v1247_v1, 0.0  ;;  %v1250_v13 = vadd.f32 %v2218_v41, %v1179_v5  ;;  %v1146_v16 = vld [vmem:[#allocation2 + $0x10] sm:$0xff]  ;;  %1116 = vst.msk [vmem:[#allocation2 + $0x138] sm:$0xff] %vm223_vm1, %v1051_v7  ;;  %v1688_v20 = vpop.f32.mrf.mxu0  ;;  %v1736_v21 = vpop.f32.mrf.mxu1  ;;  %v300_v5 = vld [vmem:[#allocation2 + $0x60] sm:$0xff] }
  0xfb   : > { %v1178_v17 = vld [vmem:[#allocation2 + $0x110] sm:$0xff]  ;;  %1343 = vst.msk [vmem:[%s2231_s30] sm:$0xff] %vm223_vm1, %v1279_v10  ;;  %v1282_v22 = vmax.f32 %v1218_v12, 0.0  ;;  %v1217_v24 = vadd.f32 %v2218_v41, %v1146_v16  ;;  %1083 = vst.msk [vmem:[#allocation2 + $0x30] sm:$0xff] %vm223_vm1, %v1018_v18  ;;  %v1021_v30 = vadd.f32 %v1688_v20, %v297_v14  ;;  %v1053_v31 = vadd.f32 %v1736_v21, %v329_v15  ;;  %v335_v18 = vld [vmem:[#allocation2 + $0x178] sm:$0xff] }
  0xfc   : > { %1375 = vst.msk [vmem:[%s2231_s30 + $0x100] sm:$0xff] %vm223_vm1, %v1311_v11  ;;  %v1314_v23 = vmax.f32 %v1250_v13, 0.0  ;;  %v1249_v25 = vadd.f32 %v2218_v41, %v1178_v17  ;;  %v1149_v28 = vld [vmem:[#allocation2 + $0x28] sm:$0xff]  ;;  %1115 = vst.msk [vmem:[#allocation2 + $0x130] sm:$0xff] %vm223_vm1, %v1050_v19  ;;  %v733_v32 = vpop.f32.mrf.mxu0  ;;  %v893_v33 = vpop.f32.mrf.mxu1  ;;  %v303_v17 = vld [vmem:[#allocation2 + $0x78] sm:$0xff] }
  0xfd   : > { %v1181_v29 = vld [vmem:[#allocation2 + $0x128] sm:$0xff]  ;;  %1346 = vst.msk [vmem:[%s2231_s30 + $0x18] sm:$0xff] %vm223_vm1, %v1282_v22  ;;  %v1281_v34 = vmax.f32 %v1217_v24, 0.0  ;;  %v1220_v36 = vadd.f32 %v2218_v41, %v1149_v28  ;;  %1086 = vst.msk [vmem:[#allocation2 + $0x48] sm:$0xff] %vm223_vm1, %v1021_v30  ;;  %v1020_v44 = vadd.f32 %v733_v32, %v296_v26  ;;  %v1052_v45 = vadd.f32 %v893_v33, %v328_v27  ;;  %v334_v30 = vld [vmem:[#allocation2 + $0x170] sm:$0xff] }
  0xfe   : > { %1378 = vst.msk [vmem:[%s2231_s30 + $0x118] sm:$0xff] %vm223_vm1, %v1314_v23  ;;  %v1313_v35 = vmax.f32 %v1249_v25, 0.0  ;;  %v1252_v37 = vadd.f32 %v2218_v41, %v1181_v29  ;;  %v1148_v42 = vld [vmem:[#allocation2 + $0x20] sm:$0xff]  ;;  %1118 = vst.msk [vmem:[#allocation2 + $0x148] sm:$0xff] %vm223_vm1, %v1053_v31  ;;  %v1691_v46 = vpop.f32.mrf.mxu0  ;;  %v1739_v47 = vpop.f32.mrf.mxu1  ;;  %v302_v29 = vld [vmem:[#allocation2 + $0x70] sm:$0xff] }
  0xff   : > { %v1180_v43 = vld [vmem:[#allocation2 + $0x120] sm:$0xff]  ;;  %1345 = vst.msk [vmem:[%s2231_s30 + $0x10] sm:$0xff] %vm223_vm1, %v1281_v34  ;;  %v1284_v49 = vmax.f32 %v1220_v36, 0.0  ;;  %v1219_v51 = vadd.f32 %v2218_v41, %v1148_v42  ;;  %1085 = vst.msk [vmem:[#allocation2 + $0x40] sm:$0xff] %vm223_vm1, %v1020_v44  ;;  %v1023_v53 = vadd.f32 %v1691_v46, %v299_v38  ;;  %v1055_v54 = vadd.f32 %v1739_v47, %v331_v39  ;;  %v305_v42 = vld [vmem:[#allocation2 + $0x88] sm:$0xff] }
 0x100   : > { %1377 = vst.msk [vmem:[%s2231_s30 + $0x110] sm:$0xff] %vm223_vm1, %v1313_v35  ;;  %v1316_v50 = vmax.f32 %v1252_v37, 0.0  ;;  %v1251_v52 = vadd.f32 %v2218_v41, %v1180_v43  ;;  %1117 = vst.msk [vmem:[#allocation2 + $0x140] sm:$0xff] %vm223_vm1, %v1052_v45  ;;  %v743_v55 = vpop.f32.mrf.mxu0  ;;  %v903_v56 = vpop.f32.mrf.mxu1  ;;  %v1151_v61 = vld [vmem:[#allocation2 + $0x38] sm:$0xff]  ;;  %v337_v43 = vld [vmem:[#allocation2 + $0x188] sm:$0xff] }
 0x101   : > { %1348 = vst.msk [vmem:[%s2231_s30 + $0x28] sm:$0xff] %vm223_vm1, %v1284_v49  ;;  %v1283_v59 = vmax.f32 %v1219_v51, 0.0  ;;  %v1183_v62 = vld [vmem:[#allocation2 + $0x138] sm:$0xff]  ;;  %v1022_v63 = vadd.f32 %v743_v55, %v298_v40  ;;  %v1054_v0 = vadd.f32 %v903_v56, %v330_v48  ;;  %v1222_v1 = vadd.f32 %v2218_v41, %v1151_v61  ;;  %1088 = vst.msk [vmem:[#allocation2 + $0x58] sm:$0xff] %vm223_vm1, %v1023_v53  ;;  %v336_v61 = vld [vmem:[#allocation2 + $0x180] sm:$0xff] }
 0x102   : > { %1380 = vst.msk [vmem:[%s2231_s30 + $0x128] sm:$0xff] %vm223_vm1, %v1316_v50  ;;  %v1315_v60 = vmax.f32 %v1251_v52, 0.0  ;;  %v1254_v2 = vadd.f32 %v2218_v41, %v1183_v62  ;;  %1120 = vst.msk [vmem:[#allocation2 + $0x158] sm:$0xff] %vm223_vm1, %v1055_v54  ;;  %v1694_v3 = vpop.f32.mrf.mxu0  ;;  %v1742_v4 = vpop.f32.mrf.mxu1  ;;  %v1150_v7 = vld [vmem:[#allocation2 + $0x30] sm:$0xff] }
 0x103   : > { %1347 = vst.msk [vmem:[%s2231_s30 + $0x20] sm:$0xff] %vm223_vm1, %v1283_v59  ;;  %v1182_v8 = vld [vmem:[#allocation2 + $0x130] sm:$0xff]  ;;  %1087 = vst.msk [vmem:[#allocation2 + $0x50] sm:$0xff] %vm223_vm1, %v1022_v63  ;;  %v1025_v9 = vadd.f32 %v1694_v3, %v301_v57  ;;  %v1057_v10 = vadd.f32 %v1742_v4, %v333_v58  ;;  %v1286_v11 = vmax.f32 %v1222_v1, 0.0  ;;  %v1221_v13 = vadd.f32 %v2218_v41, %v1150_v7 }
 0x104   : > { %1379 = vst.msk [vmem:[%s2231_s30 + $0x120] sm:$0xff] %vm223_vm1, %v1315_v60  ;;  %1119 = vst.msk [vmem:[#allocation2 + $0x150] sm:$0xff] %vm223_vm1, %v1054_v0  ;;  %v1318_v12 = vmax.f32 %v1254_v2, 0.0  ;;  %v1253_v14 = vadd.f32 %v2218_v41, %v1182_v8  ;;  %v753_v15 = vpop.f32.mrf.mxu0  ;;  %v913_v16 = vpop.f32.mrf.mxu1  ;;  %v1153_v19 = vld [vmem:[#allocation2 + $0x48] sm:$0xff]  ;;  %v304_v60 = vld [vmem:[#allocation2 + $0x80] sm:$0xff] }
 0x105   : > { %v1185_v20 = vld [vmem:[#allocation2 + $0x148] sm:$0xff]  ;;  %1090 = vst.msk [vmem:[#allocation2 + $0x68] sm:$0xff] %vm223_vm1, %v1025_v9  ;;  %1122 = vst.msk [vmem:[#allocation2 + $0x168] sm:$0xff] %vm223_vm1, %v1057_v10  ;;  %v1024_v21 = vadd.f32 %v753_v15, %v300_v5  ;;  %v1056_v22 = vadd.f32 %v913_v16, %v332_v6  ;;  %v1285_v23 = vmax.f32 %v1221_v13, 0.0  ;;  %v1224_v25 = vadd.f32 %v2218_v41, %v1153_v19  ;;  %v307_v8 = vld [vmem:[#allocation2 + $0x98] sm:$0xff] }
 0x106   : > { %1350 = vst.msk [vmem:[%s2231_s30 + $0x38] sm:$0xff] %vm223_vm1, %v1286_v11  ;;  %1382 = vst.msk [vmem:[%s2231_s30 + $0x138] sm:$0xff] %vm223_vm1, %v1318_v12  ;;  %v1317_v24 = vmax.f32 %v1253_v14, 0.0  ;;  %v1256_v26 = vadd.f32 %v2218_v41, %v1185_v20  ;;  %v1697_v27 = vpop.f32.mrf.mxu0  ;;  %v1745_v28 = vpop.f32.mrf.mxu1  ;;  %v1152_v31 = vld [vmem:[#allocation2 + $0x40] sm:$0xff]  ;;  %v339_v9 = vld [vmem:[#allocation2 + $0x198] sm:$0xff] }
 0x107   : > { %v1184_v32 = vld [vmem:[#allocation2 + $0x140] sm:$0xff]  ;;  %1089 = vst.msk [vmem:[#allocation2 + $0x60] sm:$0xff] %vm223_vm1, %v1024_v21  ;;  %1121 = vst.msk [vmem:[#allocation2 + $0x160] sm:$0xff] %vm223_vm1, %v1056_v22  ;;  %v1027_v33 = vadd.f32 %v1697_v27, %v303_v17  ;;  %v1059_v34 = vadd.f32 %v1745_v28, %v335_v18  ;;  %v1288_v35 = vmax.f32 %v1224_v25, 0.0  ;;  %v1223_v37 = vadd.f32 %v2218_v41, %v1152_v31  ;;  %v306_v20 = vld [vmem:[#allocation2 + $0x90] sm:$0xff] }
 0x108   : > { %1349 = vst.msk [vmem:[%s2231_s30 + $0x30] sm:$0xff] %vm223_vm1, %v1285_v23  ;;  %1381 = vst.msk [vmem:[%s2231_s30 + $0x130] sm:$0xff] %vm223_vm1, %v1317_v24  ;;  %v1320_v36 = vmax.f32 %v1256_v26, 0.0  ;;  %v1255_v38 = vadd.f32 %v2218_v41, %v1184_v32  ;;  %v763_v39 = vpop.f32.mrf.mxu0  ;;  %v923_v40 = vpop.f32.mrf.mxu1  ;;  %v1155_v44 = vld [vmem:[#allocation2 + $0x58] sm:$0xff]  ;;  %v338_v21 = vld [vmem:[#allocation2 + $0x190] sm:$0xff] }
 0x109   : > { %v1187_v45 = vld [vmem:[#allocation2 + $0x158] sm:$0xff]  ;;  %1092 = vst.msk [vmem:[#allocation2 + $0x78] sm:$0xff] %vm223_vm1, %v1027_v33  ;;  %1124 = vst.msk [vmem:[#allocation2 + $0x178] sm:$0xff] %vm223_vm1, %v1059_v34  ;;  %v1026_v46 = vadd.f32 %v763_v39, %v302_v29  ;;  %v1058_v47 = vadd.f32 %v923_v40, %v334_v30  ;;  %v1287_v48 = vmax.f32 %v1223_v37, 0.0  ;;  %v1226_v50 = vadd.f32 %v2218_v41, %v1155_v44  ;;  %v309_v32 = vld [vmem:[#allocation2 + $0xa8] sm:$0xff] }
 0x10a   : > { %1352 = vst.msk [vmem:[%s2231_s30 + $0x48] sm:$0xff] %vm223_vm1, %v1288_v35  ;;  %1384 = vst.msk [vmem:[%s2231_s30 + $0x148] sm:$0xff] %vm223_vm1, %v1320_v36  ;;  %v1319_v49 = vmax.f32 %v1255_v38, 0.0  ;;  %v1258_v51 = vadd.f32 %v2218_v41, %v1187_v45  ;;  %v1154_v52 = vld [vmem:[#allocation2 + $0x50] sm:$0xff]  ;;  %v1700_v54 = vpop.f32.mrf.mxu0  ;;  %v1748_v55 = vpop.f32.mrf.mxu1  ;;  %v341_v33 = vld [vmem:[#allocation2 + $0x1a8] sm:$0xff] }
 0x10b   : > { %v1186_v53 = vld [vmem:[#allocation2 + $0x150] sm:$0xff]  ;;  %v1225_v56 = vadd.f32 %v2218_v41, %v1154_v52  ;;  %1091 = vst.msk [vmem:[#allocation2 + $0x70] sm:$0xff] %vm223_vm1, %v1026_v46  ;;  %1123 = vst.msk [vmem:[#allocation2 + $0x170] sm:$0xff] %vm223_vm1, %v1058_v47  ;;  %v1029_v58 = vadd.f32 %v1700_v54, %v305_v42  ;;  %v1061_v59 = vadd.f32 %v1748_v55, %v337_v43  ;;  %v1290_v62 = vmax.f32 %v1226_v50, 0.0  ;;  %v308_v45 = vld [vmem:[#allocation2 + $0xa0] sm:$0xff] }
 0x10c   : > { %v1257_v57 = vadd.f32 %v2218_v41, %v1186_v53  ;;  %1351 = vst.msk [vmem:[%s2231_s30 + $0x40] sm:$0xff] %vm223_vm1, %v1287_v48  ;;  %1383 = vst.msk [vmem:[%s2231_s30 + $0x140] sm:$0xff] %vm223_vm1, %v1319_v49  ;;  %v1322_v63 = vmax.f32 %v1258_v51, 0.0  ;;  %v1157_v0 = vld [vmem:[#allocation2 + $0x68] sm:$0xff]  ;;  %v773_v2 = vpop.f32.mrf.mxu0  ;;  %v933_v3 = vpop.f32.mrf.mxu1  ;;  %v340_v46 = vld [vmem:[#allocation2 + $0x1a0] sm:$0xff] }
 0x10d   : > { %v1189_v1 = vld [vmem:[#allocation2 + $0x168] sm:$0xff]  ;;  %v1289_v4 = vmax.f32 %v1225_v56, 0.0  ;;  %v1228_v6 = vadd.f32 %v2218_v41, %v1157_v0  ;;  %1094 = vst.msk [vmem:[#allocation2 + $0x88] sm:$0xff] %vm223_vm1, %v1029_v58  ;;  %1126 = vst.msk [vmem:[#allocation2 + $0x188] sm:$0xff] %vm223_vm1, %v1061_v59  ;;  %v1028_v12 = vadd.f32 %v773_v2, %v304_v60  ;;  %v1060_v13 = vadd.f32 %v933_v3, %v336_v61  ;;  %v311_v47 = vld [vmem:[#allocation2 + $0xb8] sm:$0xff] }
 0x10e   : > { %v1321_v5 = vmax.f32 %v1257_v57, 0.0  ;;  %v1260_v7 = vadd.f32 %v2218_v41, %v1189_v1  ;;  %1354 = vst.msk [vmem:[%s2231_s30 + $0x58] sm:$0xff] %vm223_vm1, %v1290_v62  ;;  %1386 = vst.msk [vmem:[%s2231_s30 + $0x158] sm:$0xff] %vm223_vm1, %v1322_v63  ;;  %v1156_v10 = vld [vmem:[#allocation2 + $0x60] sm:$0xff]  ;;  %v1703_v14 = vpop.f32.mrf.mxu0  ;;  %v1751_v15 = vpop.f32.mrf.mxu1  ;;  %v343_v54 = vld [vmem:[#allocation2 + $0x1b8] sm:$0xff] }
 0x10f   : > { %v1188_v11 = vld [vmem:[#allocation2 + $0x160] sm:$0xff]  ;;  %1353 = vst.msk [vmem:[%s2231_s30 + $0x50] sm:$0xff] %vm223_vm1, %v1289_v4  ;;  %v1292_v16 = vmax.f32 %v1228_v6, 0.0  ;;  %v1227_v18 = vadd.f32 %v2218_v41, %v1156_v10  ;;  %1093 = vst.msk [vmem:[#allocation2 + $0x80] sm:$0xff] %vm223_vm1, %v1028_v12  ;;  %v1031_v24 = vadd.f32 %v1703_v14, %v307_v8  ;;  %v1063_v25 = vadd.f32 %v1751_v15, %v339_v9  ;;  %v310_v63 = vld [vmem:[#allocation2 + $0xb0] sm:$0xff] }
 0x110   : > { %1385 = vst.msk [vmem:[%s2231_s30 + $0x150] sm:$0xff] %vm223_vm1, %v1321_v5  ;;  %v1324_v17 = vmax.f32 %v1260_v7, 0.0  ;;  %v1259_v19 = vadd.f32 %v2218_v41, %v1188_v11  ;;  %v1159_v22 = vld [vmem:[#allocation2 + $0x78] sm:$0xff]  ;;  %1125 = vst.msk [vmem:[#allocation2 + $0x180] sm:$0xff] %vm223_vm1, %v1060_v13  ;;  %v783_v26 = vpop.f32.mrf.mxu0  ;;  %v943_v27 = vpop.f32.mrf.mxu1  ;;  %v342_v0 = vld [vmem:[#allocation2 + $0x1b0] sm:$0xff] }
 0x111   : > { %v1191_v23 = vld [vmem:[#allocation2 + $0x178] sm:$0xff]  ;;  %1356 = vst.msk [vmem:[%s2231_s30 + $0x68] sm:$0xff] %vm223_vm1, %v1292_v16  ;;  %v1291_v28 = vmax.f32 %v1227_v18, 0.0  ;;  %v1230_v30 = vadd.f32 %v2218_v41, %v1159_v22  ;;  %1096 = vst.msk [vmem:[#allocation2 + $0x98] sm:$0xff] %vm223_vm1, %v1031_v24  ;;  %v1030_v36 = vadd.f32 %v783_v26, %v306_v20  ;;  %v1062_v37 = vadd.f32 %v943_v27, %v338_v21  ;;  %v313_v11 = vld [vmem:[#allocation2 + $0xc8] sm:$0xff] }
 0x112   : > { %1388 = vst.msk [vmem:[%s2231_s30 + $0x168] sm:$0xff] %vm223_vm1, %v1324_v17  ;;  %v1323_v29 = vmax.f32 %v1259_v19, 0.0  ;;  %v1262_v31 = vadd.f32 %v2218_v41, %v1191_v23  ;;  %v1158_v34 = vld [vmem:[#allocation2 + $0x70] sm:$0xff]  ;;  %1128 = vst.msk [vmem:[#allocation2 + $0x198] sm:$0xff] %vm223_vm1, %v1063_v25  ;;  %v1706_v38 = vpop.f32.mrf.mxu0  ;;  %v1754_v39 = vpop.f32.mrf.mxu1  ;;  %v345_v12 = vld [vmem:[#allocation2 + $0x1c8] sm:$0xff] }
 0x113   : > { %v1190_v35 = vld [vmem:[#allocation2 + $0x170] sm:$0xff]  ;;  %1355 = vst.msk [vmem:[%s2231_s30 + $0x60] sm:$0xff] %vm223_vm1, %v1291_v28  ;;  %v1294_v40 = vmax.f32 %v1230_v30, 0.0  ;;  %v1229_v43 = vadd.f32 %v2218_v41, %v1158_v34  ;;  %1095 = vst.msk [vmem:[#allocation2 + $0x90] sm:$0xff] %vm223_vm1, %v1030_v36  ;;  %v1033_v50 = vadd.f32 %v1706_v38, %v309_v32  ;;  %v1065_v51 = vadd.f32 %v1754_v39, %v341_v33  ;;  %v312_v23 = vld [vmem:[#allocation2 + $0xc0] sm:$0xff] }
 0x114   : > { %1387 = vst.msk [vmem:[%s2231_s30 + $0x160] sm:$0xff] %vm223_vm1, %v1323_v29  ;;  %v1326_v42 = vmax.f32 %v1262_v31, 0.0  ;;  %v1261_v44 = vadd.f32 %v2218_v41, %v1190_v35  ;;  %v1161_v48 = vld [vmem:[#allocation2 + $0x88] sm:$0xff]  ;;  %1127 = vst.msk [vmem:[#allocation2 + $0x190] sm:$0xff] %vm223_vm1, %v1062_v37  ;;  %v793_v52 = vpop.f32.mrf.mxu0  ;;  %v953_v53 = vpop.f32.mrf.mxu1  ;;  %v344_v24 = vld [vmem:[#allocation2 + $0x1c0] sm:$0xff] }
 0x115   : > { %v1193_v49 = vld [vmem:[#allocation2 + $0x188] sm:$0xff]  ;;  %1358 = vst.msk [vmem:[%s2231_s30 + $0x78] sm:$0xff] %vm223_vm1, %v1294_v40  ;;  %v1293_v55 = vmax.f32 %v1229_v43, 0.0  ;;  %v1232_v57 = vadd.f32 %v2218_v41, %v1161_v48  ;;  %1098 = vst.msk [vmem:[#allocation2 + $0xa8] sm:$0xff] %vm223_vm1, %v1033_v50  ;;  %v1032_v59 = vadd.f32 %v793_v52, %v308_v45  ;;  %v1064_v60 = vadd.f32 %v953_v53, %v340_v46  ;;  %v315_v35 = vld [vmem:[#allocation2 + $0xd8] sm:$0xff] }
 0x116   : > { %1390 = vst.msk [vmem:[%s2231_s30 + $0x178] sm:$0xff] %vm223_vm1, %v1326_v42  ;;  %v1325_v56 = vmax.f32 %v1261_v44, 0.0  ;;  %v1264_v58 = vadd.f32 %v2218_v41, %v1193_v49  ;;  %1130 = vst.msk [vmem:[#allocation2 + $0x1a8] sm:$0xff] %vm223_vm1, %v1065_v51  ;;  %v1709_v61 = vpop.f32.mrf.mxu0  ;;  %v1757_v62 = vpop.f32.mrf.mxu1  ;;  %v1160_v3 = vld [vmem:[#allocation2 + $0x80] sm:$0xff]  ;;  %v347_v36 = vld [vmem:[#allocation2 + $0x1d8] sm:$0xff] }
 0x117   : > { %1357 = vst.msk [vmem:[%s2231_s30 + $0x70] sm:$0xff] %vm223_vm1, %v1293_v55  ;;  %v1296_v1 = vmax.f32 %v1232_v57, 0.0  ;;  %v1192_v4 = vld [vmem:[#allocation2 + $0x180] sm:$0xff]  ;;  %v1035_v5 = vadd.f32 %v1709_v61, %v311_v47  ;;  %v1067_v6 = vadd.f32 %v1757_v62, %v343_v54  ;;  %v1231_v7 = vadd.f32 %v2218_v41, %v1160_v3  ;;  %1097 = vst.msk [vmem:[#allocation2 + $0xa0] sm:$0xff] %vm223_vm1, %v1032_v59  ;;  %v314_v48 = vld [vmem:[#allocation2 + $0xd0] sm:$0xff] }
 0x118   : > { %1389 = vst.msk [vmem:[%s2231_s30 + $0x170] sm:$0xff] %vm223_vm1, %v1325_v56  ;;  %v1328_v2 = vmax.f32 %v1264_v58, 0.0  ;;  %v1263_v8 = vadd.f32 %v2218_v41, %v1192_v4  ;;  %1129 = vst.msk [vmem:[#allocation2 + $0x1a0] sm:$0xff] %vm223_vm1, %v1064_v60  ;;  %v803_v9 = vpop.f32.mrf.mxu0  ;;  %v963_v10 = vpop.f32.mrf.mxu1  ;;  %v1163_v13 = vld [vmem:[#allocation2 + $0x98] sm:$0xff]  ;;  %v346_v49 = vld [vmem:[#allocation2 + $0x1d0] sm:$0xff] }
 0x119   : > { %1360 = vst.msk [vmem:[%s2231_s30 + $0x88] sm:$0xff] %vm223_vm1, %v1296_v1  ;;  %v1195_v14 = vld [vmem:[#allocation2 + $0x198] sm:$0xff]  ;;  %1100 = vst.msk [vmem:[#allocation2 + $0xb8] sm:$0xff] %vm223_vm1, %v1035_v5  ;;  %v1034_v15 = vadd.f32 %v803_v9, %v310_v63  ;;  %v1066_v16 = vadd.f32 %v963_v10, %v342_v0  ;;  %v1295_v17 = vmax.f32 %v1231_v7, 0.0  ;;  %v1234_v19 = vadd.f32 %v2218_v41, %v1163_v13  ;;  %v349_v3 = vld [vmem:[#allocation2 + $0x1e8] sm:$0xff] }
 0x11a   : > { %1392 = vst.msk [vmem:[%s2231_s30 + $0x188] sm:$0xff] %vm223_vm1, %v1328_v2  ;;  %1132 = vst.msk [vmem:[#allocation2 + $0x1b8] sm:$0xff] %vm223_vm1, %v1067_v6  ;;  %v1327_v18 = vmax.f32 %v1263_v8, 0.0  ;;  %v1266_v20 = vadd.f32 %v2218_v41, %v1195_v14  ;;  %v1712_v21 = vpop.f32.mrf.mxu0  ;;  %v1760_v22 = vpop.f32.mrf.mxu1  ;;  %v1162_v25 = vld [vmem:[#allocation2 + $0x90] sm:$0xff]  ;;  %v317_v2 = vld [vmem:[#allocation2 + $0xe8] sm:$0xff] }
 0x11b   : > { %v1194_v26 = vld [vmem:[#allocation2 + $0x190] sm:$0xff]  ;;  %1099 = vst.msk [vmem:[#allocation2 + $0xb0] sm:$0xff] %vm223_vm1, %v1034_v15  ;;  %1131 = vst.msk [vmem:[#allocation2 + $0x1b0] sm:$0xff] %vm223_vm1, %v1066_v16  ;;  %v1037_v27 = vadd.f32 %v1712_v21, %v313_v11  ;;  %v1069_v28 = vadd.f32 %v1760_v22, %v345_v12  ;;  %v1298_v29 = vmax.f32 %v1234_v19, 0.0  ;;  %v1233_v31 = vadd.f32 %v2218_v41, %v1162_v25  ;;  %v316_v14 = vld [vmem:[#allocation2 + $0xe0] sm:$0xff] }
 0x11c   : > { %1359 = vst.msk [vmem:[%s2231_s30 + $0x80] sm:$0xff] %vm223_vm1, %v1295_v17  ;;  %1391 = vst.msk [vmem:[%s2231_s30 + $0x180] sm:$0xff] %vm223_vm1, %v1327_v18  ;;  %v1330_v30 = vmax.f32 %v1266_v20, 0.0  ;;  %v1265_v32 = vadd.f32 %v2218_v41, %v1194_v26  ;;  %v813_v33 = vpop.f32.mrf.mxu0  ;;  %v973_v34 = vpop.f32.mrf.mxu1  ;;  %v1165_v37 = vld [vmem:[#allocation2 + $0xa8] sm:$0xff]  ;;  %v348_v15 = vld [vmem:[#allocation2 + $0x1e0] sm:$0xff] }
 0x11d   : > { %v1197_v38 = vld [vmem:[#allocation2 + $0x1a8] sm:$0xff]  ;;  %1102 = vst.msk [vmem:[#allocation2 + $0xc8] sm:$0xff] %vm223_vm1, %v1037_v27  ;;  %1134 = vst.msk [vmem:[#allocation2 + $0x1c8] sm:$0xff] %vm223_vm1, %v1069_v28  ;;  %v1036_v39 = vadd.f32 %v813_v33, %v312_v23  ;;  %v1068_v40 = vadd.f32 %v973_v34, %v344_v24  ;;  %v1297_v42 = vmax.f32 %v1233_v31, 0.0  ;;  %v1236_v44 = vadd.f32 %v2218_v41, %v1165_v37  ;;  %v319_v26 = vld [vmem:[#allocation2 + $0xf8] sm:$0xff] }
 0x11e   : > { %1362 = vst.msk [vmem:[%s2231_s30 + $0x98] sm:$0xff] %vm223_vm1, %v1298_v29  ;;  %1394 = vst.msk [vmem:[%s2231_s30 + $0x198] sm:$0xff] %vm223_vm1, %v1330_v30  ;;  %v1329_v43 = vmax.f32 %v1265_v32, 0.0  ;;  %v1268_v45 = vadd.f32 %v2218_v41, %v1197_v38  ;;  %v1715_v46 = vpop.f32.mrf.mxu0  ;;  %v1763_v47 = vpop.f32.mrf.mxu1  ;;  %v1164_v50 = vld [vmem:[#allocation2 + $0xa0] sm:$0xff]  ;;  %v351_v27 = vld [vmem:[#allocation2 + $0x1f8] sm:$0xff] }
 0x11f   : > { %v1196_v51 = vld [vmem:[#allocation2 + $0x1a0] sm:$0xff]  ;;  %1101 = vst.msk [vmem:[#allocation2 + $0xc0] sm:$0xff] %vm223_vm1, %v1036_v39  ;;  %1133 = vst.msk [vmem:[#allocation2 + $0x1c0] sm:$0xff] %vm223_vm1, %v1068_v40  ;;  %v1039_v52 = vadd.f32 %v1715_v46, %v315_v35  ;;  %v1071_v53 = vadd.f32 %v1763_v47, %v347_v36  ;;  %v1300_v54 = vmax.f32 %v1236_v44, 0.0  ;;  %v1235_v56 = vadd.f32 %v2218_v41, %v1164_v50  ;;  %v318_v38 = vld [vmem:[#allocation2 + $0xf0] sm:$0xff] }
 0x120   : > { %1361 = vst.msk [vmem:[%s2231_s30 + $0x90] sm:$0xff] %vm223_vm1, %v1297_v42  ;;  %1393 = vst.msk [vmem:[%s2231_s30 + $0x190] sm:$0xff] %vm223_vm1, %v1329_v43  ;;  %v1332_v55 = vmax.f32 %v1268_v45, 0.0  ;;  %v1267_v57 = vadd.f32 %v2218_v41, %v1196_v51  ;;  %v1167_v58 = vld [vmem:[#allocation2 + $0xb8] sm:$0xff]  ;;  %v823_v60 = vpop.f32.mrf.mxu0  ;;  %v983_v61 = vpop.f32.mrf.mxu1  ;;  %v350_v39 = vld [vmem:[#allocation2 + $0x1f0] sm:$0xff] }
 0x121   : > { %v1199_v59 = vld [vmem:[#allocation2 + $0x1b8] sm:$0xff]  ;;  %v1238_v62 = vadd.f32 %v2218_v41, %v1167_v58  ;;  %1104 = vst.msk [vmem:[#allocation2 + $0xd8] sm:$0xff] %vm223_vm1, %v1039_v52  ;;  %1136 = vst.msk [vmem:[#allocation2 + $0x1d8] sm:$0xff] %vm223_vm1, %v1071_v53  ;;  %v1038_v0 = vadd.f32 %v823_v60, %v314_v48  ;;  %v1070_v1 = vadd.f32 %v983_v61, %v346_v49  ;;  %v1299_v4 = vmax.f32 %v1235_v56, 0.0 }
 0x122   : > { %v1270_v63 = vadd.f32 %v2218_v41, %v1199_v59  ;;  %1364 = vst.msk [vmem:[%s2231_s30 + $0xa8] sm:$0xff] %vm223_vm1, %v1300_v54  ;;  %1396 = vst.msk [vmem:[%s2231_s30 + $0x1a8] sm:$0xff] %vm223_vm1, %v1332_v55  ;;  %v1331_v5 = vmax.f32 %v1267_v57, 0.0  ;;  %v1166_v6 = vld [vmem:[#allocation2 + $0xb0] sm:$0xff]  ;;  %v1718_v8 = vpop.f32.mrf.mxu0  ;;  %v1766_v9 = vpop.f32.mrf.mxu1 }
 0x123   : > { %v1198_v7 = vld [vmem:[#allocation2 + $0x1b0] sm:$0xff]  ;;  %v1302_v10 = vmax.f32 %v1238_v62, 0.0  ;;  %v1237_v12 = vadd.f32 %v2218_v41, %v1166_v6  ;;  %1103 = vst.msk [vmem:[#allocation2 + $0xd0] sm:$0xff] %vm223_vm1, %v1038_v0  ;;  %1135 = vst.msk [vmem:[#allocation2 + $0x1d0] sm:$0xff] %vm223_vm1, %v1070_v1  ;;  %v1041_v18 = vadd.f32 %v1718_v8, %v317_v2  ;;  %v1073_v19 = vadd.f32 %v1766_v9, %v349_v3 }
 0x124   : > { %v1334_v11 = vmax.f32 %v1270_v63, 0.0  ;;  %v1269_v13 = vadd.f32 %v2218_v41, %v1198_v7  ;;  %1363 = vst.msk [vmem:[%s2231_s30 + $0xa0] sm:$0xff] %vm223_vm1, %v1299_v4  ;;  %1395 = vst.msk [vmem:[%s2231_s30 + $0x1a0] sm:$0xff] %vm223_vm1, %v1331_v5  ;;  %v1169_v16 = vld [vmem:[#allocation2 + $0xc8] sm:$0xff]  ;;  %v833_v20 = vpop.f32.mrf.mxu0  ;;  %v993_v21 = vpop.f32.mrf.mxu1 }
 0x125   : > { %v1201_v17 = vld [vmem:[#allocation2 + $0x1c8] sm:$0xff]  ;;  %1366 = vst.msk [vmem:[%s2231_s30 + $0xb8] sm:$0xff] %vm223_vm1, %v1302_v10  ;;  %v1301_v22 = vmax.f32 %v1237_v12, 0.0  ;;  %v1240_v24 = vadd.f32 %v2218_v41, %v1169_v16  ;;  %1106 = vst.msk [vmem:[#allocation2 + $0xe8] sm:$0xff] %vm223_vm1, %v1041_v18  ;;  %v1040_v30 = vadd.f32 %v833_v20, %v316_v14  ;;  %v1072_v31 = vadd.f32 %v993_v21, %v348_v15 }
 0x126   : > { %1398 = vst.msk [vmem:[%s2231_s30 + $0x1b8] sm:$0xff] %vm223_vm1, %v1334_v11  ;;  %v1333_v23 = vmax.f32 %v1269_v13, 0.0  ;;  %v1272_v25 = vadd.f32 %v2218_v41, %v1201_v17  ;;  %v1168_v28 = vld [vmem:[#allocation2 + $0xc0] sm:$0xff]  ;;  %1138 = vst.msk [vmem:[#allocation2 + $0x1e8] sm:$0xff] %vm223_vm1, %v1073_v19  ;;  %v1721_v32 = vpop.f32.mrf.mxu0  ;;  %v1769_v33 = vpop.f32.mrf.mxu1 }
 0x127   : > { %v1200_v29 = vld [vmem:[#allocation2 + $0x1c0] sm:$0xff]  ;;  %1365 = vst.msk [vmem:[%s2231_s30 + $0xb0] sm:$0xff] %vm223_vm1, %v1301_v22  ;;  %v1304_v34 = vmax.f32 %v1240_v24, 0.0  ;;  %v1239_v36 = vadd.f32 %v2218_v41, %v1168_v28  ;;  %1105 = vst.msk [vmem:[#allocation2 + $0xe0] sm:$0xff] %vm223_vm1, %v1040_v30  ;;  %v1043_v43 = vadd.f32 %v1721_v32, %v319_v26  ;;  %v1075_v44 = vadd.f32 %v1769_v33, %v351_v27 }
 0x128   : > { %1397 = vst.msk [vmem:[%s2231_s30 + $0x1b0] sm:$0xff] %vm223_vm1, %v1333_v23  ;;  %v1336_v35 = vmax.f32 %v1272_v25, 0.0  ;;  %v1271_v37 = vadd.f32 %v2218_v41, %v1200_v29  ;;  %v1171_v40 = vld [vmem:[#allocation2 + $0xd8] sm:$0xff]  ;;  %1137 = vst.msk [vmem:[#allocation2 + $0x1e0] sm:$0xff] %vm223_vm1, %v1072_v31  ;;  %v843_v45 = vpop.f32.mrf.mxu0  ;;  %v1003_v46 = vpop.f32.mrf.mxu1 }
 0x129   : > { %v1203_v42 = vld [vmem:[#allocation2 + $0x1d8] sm:$0xff]  ;;  %1368 = vst.msk [vmem:[%s2231_s30 + $0xc8] sm:$0xff] %vm223_vm1, %v1304_v34  ;;  %v1303_v47 = vmax.f32 %v1239_v36, 0.0  ;;  %v1242_v49 = vadd.f32 %v2218_v41, %v1171_v40  ;;  %1108 = vst.msk [vmem:[#allocation2 + $0xf8] sm:$0xff] %vm223_vm1, %v1043_v43  ;;  %v1042_v53 = vadd.f32 %v843_v45, %v318_v38  ;;  %v1074_v54 = vadd.f32 %v1003_v46, %v350_v39 }
 0x12a   : > { %1400 = vst.msk [vmem:[%s2231_s30 + $0x1c8] sm:$0xff] %vm223_vm1, %v1336_v35  ;;  %v1335_v48 = vmax.f32 %v1271_v37, 0.0  ;;  %v1274_v50 = vadd.f32 %v2218_v41, %v1203_v42  ;;  %v1170_v51 = vld [vmem:[#allocation2 + $0xd0] sm:$0xff]  ;;  %1140 = vst.msk [vmem:[#allocation2 + $0x1f8] sm:$0xff] %vm223_vm1, %v1075_v44 }
 0x12b   : > { %v1202_v52 = vld [vmem:[#allocation2 + $0x1d0] sm:$0xff]  ;;  %1367 = vst.msk [vmem:[%s2231_s30 + $0xc0] sm:$0xff] %vm223_vm1, %v1303_v47  ;;  %v1306_v55 = vmax.f32 %v1242_v49, 0.0  ;;  %v1241_v57 = vadd.f32 %v2218_v41, %v1170_v51  ;;  %1107 = vst.msk [vmem:[#allocation2 + $0xf0] sm:$0xff] %vm223_vm1, %v1042_v53 }
 0x12c   : > { %1399 = vst.msk [vmem:[%s2231_s30 + $0x1c0] sm:$0xff] %vm223_vm1, %v1335_v48  ;;  %v1338_v56 = vmax.f32 %v1274_v50, 0.0  ;;  %v1273_v58 = vadd.f32 %v2218_v41, %v1202_v52  ;;  %1139 = vst.msk [vmem:[#allocation2 + $0x1f0] sm:$0xff] %vm223_vm1, %v1074_v54  ;;  %v1173_v61 = vld [vmem:[#allocation2 + $0xe8] sm:$0xff] }
 0x12d   : > { %1370 = vst.msk [vmem:[%s2231_s30 + $0xd8] sm:$0xff] %vm223_vm1, %v1306_v55  ;;  %v1305_v59 = vmax.f32 %v1241_v57, 0.0  ;;  %v1205_v62 = vld [vmem:[#allocation2 + $0x1e8] sm:$0xff]  ;;  %v1244_v63 = vadd.f32 %v2218_v41, %v1173_v61 }
 0x12e   : > { %1402 = vst.msk [vmem:[%s2231_s30 + $0x1d8] sm:$0xff] %vm223_vm1, %v1338_v56  ;;  %v1337_v60 = vmax.f32 %v1273_v58, 0.0  ;;  %v1276_v0 = vadd.f32 %v2218_v41, %v1205_v62  ;;  %v1172_v1 = vld [vmem:[#allocation2 + $0xe0] sm:$0xff] }
 0x12f   : > { %1369 = vst.msk [vmem:[%s2231_s30 + $0xd0] sm:$0xff] %vm223_vm1, %v1305_v59  ;;  %v1204_v2 = vld [vmem:[#allocation2 + $0x1e0] sm:$0xff]  ;;  %v1308_v3 = vmax.f32 %v1244_v63, 0.0  ;;  %v1243_v5 = vadd.f32 %v2218_v41, %v1172_v1 }
 0x130   : > { %1401 = vst.msk [vmem:[%s2231_s30 + $0x1d0] sm:$0xff] %vm223_vm1, %v1337_v60  ;;  %v1340_v4 = vmax.f32 %v1276_v0, 0.0  ;;  %v1275_v6 = vadd.f32 %v2218_v41, %v1204_v2  ;;  %v1175_v7 = vld [vmem:[#allocation2 + $0xf8] sm:$0xff] }
 0x131   : > { %v1207_v8 = vld [vmem:[#allocation2 + $0x1f8] sm:$0xff]  ;;  %1372 = vst.msk [vmem:[%s2231_s30 + $0xe8] sm:$0xff] %vm223_vm1, %v1308_v3  ;;  %v1307_v9 = vmax.f32 %v1243_v5, 0.0  ;;  %v1246_v11 = vadd.f32 %v2218_v41, %v1175_v7 }
 0x132   : > { %1404 = vst.msk [vmem:[%s2231_s30 + $0x1e8] sm:$0xff] %vm223_vm1, %v1340_v4  ;;  %v1339_v10 = vmax.f32 %v1275_v6, 0.0  ;;  %v1278_v12 = vadd.f32 %v2218_v41, %v1207_v8  ;;  %v1174_v13 = vld [vmem:[#allocation2 + $0xf0] sm:$0xff] }
 0x133   : > { %v1206_v14 = vld [vmem:[#allocation2 + $0x1f0] sm:$0xff]  ;;  %1371 = vst.msk [vmem:[%s2231_s30 + $0xe0] sm:$0xff] %vm223_vm1, %v1307_v9  ;;  %v1310_v15 = vmax.f32 %v1246_v11, 0.0  ;;  %v1245_v17 = vadd.f32 %v2218_v41, %v1174_v13 }
 0x134   : > { %1403 = vst.msk [vmem:[%s2231_s30 + $0x1e0] sm:$0xff] %vm223_vm1, %v1339_v10  ;;  %v1342_v16 = vmax.f32 %v1278_v12, 0.0  ;;  %v1277_v18 = vadd.f32 %v2218_v41, %v1206_v14 }
 0x135   : > { %1374 = vst.msk [vmem:[%s2231_s30 + $0xf8] sm:$0xff] %vm223_vm1, %v1310_v15  ;;  %v1309_v19 = vmax.f32 %v1245_v17, 0.0 }
 0x136   : > { %1406 = vst.msk [vmem:[%s2231_s30 + $0x1f8] sm:$0xff] %vm223_vm1, %v1342_v16  ;;  %v1341_v20 = vmax.f32 %v1277_v18, 0.0 }
 0x137   : > { %1373 = vst.msk [vmem:[%s2231_s30 + $0xf0] sm:$0xff] %vm223_vm1, %v1309_v19 }
 0x138   : > { %1405 = vst.msk [vmem:[%s2231_s30 + $0x1f0] sm:$0xff] %vm223_vm1, %v1341_v20 }
 0x139 PF: > { %s13_s14 = sadd.s32 1, %s1845_s14   ;;  %s2490_s12 = smov %s1841_s13 }
 0x13a   : > { %p10_p5 = scmp.ge.s32.totalorder %s13_s14, 4   ;;  %s2491_s13 = smov %s2493_s15 }
 0x13c   :  { %12 = sbr.rel (!%p10_p5) target bundleno = 2 (0x2), region = 73 }

// kernel: resblk3d_pallas.3
= control target key start
LH: loop header
LB: loop body
LE: loop exit
PB: predicated region body
PF: predicated region fallthrough
CT: control target
= control target key end

     0   :  { %s1786_s12 = smov 0   ;;  %s1788_s13 = smov 0   ;;  %s2562_s0 = inlined_call_operand.vmem [shape: f32[1024,220], index: 0, kind: input, shape index: {}]   ;;  %s2563_s1 = inlined_call_operand.vmem [shape: f32[220,8], index: 1, kind: input, shape index: {}]   ;;  %s2564_s2 = inlined_call_operand.vmem [shape: f32[1,8], index: 2, kind: input, shape index: {}]   ;;  %s2565_s3 = inlined_call_operand.vmem [shape: f32[1024,8], index: 3, kind: output, shape index: {}]  }
   0x1   :  { %s1790_s14 = smov 0  }
   0x2 LB: > { %s25_s15 = sadd.s32 1, %s1759_s13  ;;  %p1584_p0 = scmp.ge.s32.totalorder %s1763_s14, 1  ;;  %s1763_s14 = sphi %s1790_s14, %s13_s14   ;;  %s1759_s13 = sphi %s1788_s13, %s2567_s13   ;;  %s1755_s12 = sphi %s1786_s12, %s2566_s12  }
   0x3   : > { %p27_p1 = scmp.ge.s32.totalorder %s25_s15, 2  ;;  %p169_p2 = scmp.lt.s32.totalorder %s1763_s14, 3 }
   0x5   : > { %s2569_s15 = smov (%p27_p1, %s25_s15), 0  ;;  %p170_p3 = pnand %p1584_p0, %p169_p2 }
   0x6   : > { %s1585_s6 = sshll.u32 (!%p170_p3), %s1755_s12, 6 }
   0x7   : > { %173 = sbr.rel (%p170_p3) target bundleno = 403 (0x193), region = 32  ;;  %p205_p4 = scmp.lt.s32.totalorder (!%p170_p3), %s1585_s6, 127 }
   0xc   : > { %v503_v0 = vld [vmem:[%s2563_s1 + $0x78] sm:$0xff]  ;;  %v1765_v1 = vmov 0.0   ;;  %v502_v2 = vld [vmem:[%s2563_s1 + $0x70] sm:$0xff]  ;;  %v501_v3 = vld [vmem:[%s2563_s1 + $0x68] sm:$0xff]  ;;  %vm709_vm0 = vcmask 1043456   ;;  %s2571_s6 = smov (!%p205_p4, %s1585_s6), 127 }
   0xd   : > { %713 = vmatprep.subr.mxu0 %v1765_v1  ;;  %1659 = vmatprep.subr.mxu1 %v1765_v1  ;;  %v500_v4 = vld [vmem:[%s2563_s1 + $0x60] sm:$0xff]  ;;  %v499_v5 = vld [vmem:[%s2563_s1 + $0x58] sm:$0xff]  ;;  %v498_v6 = vld [vmem:[%s2563_s1 + $0x50] sm:$0xff]  ;;  %s1658_s20 = sshll.u32 %s2571_s6, 4  ;;  %vm516_vm1 = vcmask 752640   ;;  %vm231_vm2 = vcmask 64512  }
   0xe   : > { %714 = vmatpush1.msra.mxu0 %v503_v0  ;;  %1687 = vmatpush1.msra.mxu1 %v503_v0  ;;  %v497_v7 = vld [vmem:[%s2563_s1 + $0x48] sm:$0xff]  ;;  %v496_v8 = vld [vmem:[%s2563_s1 + $0x40] sm:$0xff]  ;;  %v495_v9 = vld [vmem:[%s2563_s1 + $0x38] sm:$0xff]  ;;  %s1946_s27 = scalar_lea.vmem %s2562_s0, %s1658_s20  ;;  %232 = vst.msk [vmem:[#allocation2] sm:$0xff] %vm231_vm2, %v1765_v1  ;;  %s1589_s5 = sshll.u32 %s2571_s6, 3 }
   0xf   : > { %715 = vmatprep.subr.mxu0 %v1765_v1  ;;  %1660 = vmatprep.subr.mxu1 %v1765_v1  ;;  %v494_v10 = vld [vmem:[%s2563_s1 + $0x30] sm:$0xff]  ;;  %v493_v11 = vld [vmem:[%s2563_s1 + $0x28] sm:$0xff]  ;;  %v492_v12 = vld [vmem:[%s2563_s1 + $0x20] sm:$0xff]  ;;  %233 = vst.msk [vmem:[#allocation2 + $0x8] sm:$0xff] %vm231_vm2, %v1765_v1  ;;  %s2308_s6 = scalar_lea.vmem %s2565_s3, %s1589_s5 }
  0x10   : > { %716 = vmatpush1.msra.mxu0 %v502_v2  ;;  %1688 = vmatpush1.msra.mxu1 %v502_v2  ;;  %v491_v13 = vld [vmem:[%s2563_s1 + $0x18] sm:$0xff]  ;;  %v490_v14 = vld [vmem:[%s2563_s1 + $0x10] sm:$0xff]  ;;  %v489_v15 = vld [vmem:[%s2563_s1 + $0x8] sm:$0xff]  ;;  %234 = vst.msk [vmem:[#allocation2 + $0x10] sm:$0xff] %vm231_vm2, %v1765_v1 }
  0x11   : > { %717 = vmatprep.subr.mxu0 %v1765_v1  ;;  %1661 = vmatprep.subr.mxu1 %v1765_v1  ;;  %v488_v16 = vld [vmem:[%s2563_s1] sm:$0xff]  ;;  %v515_v17 = vld [vmem:[%s2563_s1 + $0xd8] sm:$0xf]  ;;  %v514_v18 = vld [vmem:[%s2563_s1 + $0xd0] sm:$0xff]  ;;  %235 = vst.msk [vmem:[#allocation2 + $0x18] sm:$0xff] %vm231_vm2, %v1765_v1 }
  0x12   : > { %718 = vmatpush1.msra.mxu0 %v501_v3  ;;  %1689 = vmatpush1.msra.mxu1 %v501_v3  ;;  %v513_v19 = vld [vmem:[%s2563_s1 + $0xc8] sm:$0xff]  ;;  %v512_v20 = vld [vmem:[%s2563_s1 + $0xc0] sm:$0xff]  ;;  %v511_v21 = vld [vmem:[%s2563_s1 + $0xb8] sm:$0xff]  ;;  %236 = vst.msk [vmem:[#allocation2 + $0x20] sm:$0xff] %vm231_vm2, %v1765_v1 }
  0x13   : > { %719 = vmatprep.subr.mxu0 %v1765_v1  ;;  %1662 = vmatprep.subr.mxu1 %v1765_v1  ;;  %v510_v22 = vld [vmem:[%s2563_s1 + $0xb0] sm:$0xff]  ;;  %v509_v23 = vld [vmem:[%s2563_s1 + $0xa8] sm:$0xff]  ;;  %v508_v24 = vld [vmem:[%s2563_s1 + $0xa0] sm:$0xff]  ;;  %237 = vst.msk [vmem:[#allocation2 + $0x28] sm:$0xff] %vm231_vm2, %v1765_v1 }
  0x14   : > { %720 = vmatpush1.msra.mxu0 %v500_v4  ;;  %1690 = vmatpush1.msra.mxu1 %v500_v4  ;;  %v507_v25 = vld [vmem:[%s2563_s1 + $0x98] sm:$0xff]  ;;  %v506_v26 = vld [vmem:[%s2563_s1 + $0x90] sm:$0xff]  ;;  %v505_v27 = vld [vmem:[%s2563_s1 + $0x88] sm:$0xff]  ;;  %238 = vst.msk [vmem:[#allocation2 + $0x30] sm:$0xff] %vm231_vm2, %v1765_v1 }
  0x15   : > { %721 = vmatprep.subr.mxu0 %v1765_v1  ;;  %1663 = vmatprep.subr.mxu1 %v1765_v1  ;;  %v1953_v28 = vld [vmem:[%s2563_s1 + $0x80] sm:$0xff]  ;;  %v1956_v29 = vld [vmem:[%s1946_s27 + $0x8] sm:$0xff]  ;;  %239 = vst.msk [vmem:[#allocation2 + $0x38] sm:$0xff] %vm231_vm2, %v1765_v1  ;;  %240 = vst.msk [vmem:[#allocation2 + $0x40] sm:$0xff] %vm231_vm2, %v1765_v1 }
  0x16   : > { %722 = vmatpush1.msra.mxu0 %v499_v5  ;;  %1691 = vmatpush1.msra.mxu1 %v499_v5  ;;  %v1959_v30 = vld [vmem:[%s1946_s27 + $0x208] sm:$0xff]  ;;  %v1964_v31 = vld [vmem:[%s1946_s27] sm:$0xff]  ;;  %241 = vst.msk [vmem:[#allocation2 + $0x48] sm:$0xff] %vm231_vm2, %v1765_v1  ;;  %242 = vst.msk [vmem:[#allocation2 + $0x50] sm:$0xff] %vm231_vm2, %v1765_v1 }
  0x17   : > { %723 = vmatprep.subr.mxu0 %v1765_v1  ;;  %1664 = vmatprep.subr.mxu1 %v1765_v1  ;;  %v1967_v32 = vld [vmem:[%s1946_s27 + $0x200] sm:$0xff]  ;;  %243 = vst.msk [vmem:[#allocation2 + $0x58] sm:$0xff] %vm231_vm2, %v1765_v1  ;;  %244 = vst.msk [vmem:[#allocation2 + $0x60] sm:$0xff] %vm231_vm2, %v1765_v1  ;;  %v363_v33 = vld [vmem:[%s1946_s27 + $0x18] sm:$0xff] }
  0x18   : > { %724 = vmatpush1.msra.mxu0 %v498_v6  ;;  %1692 = vmatpush1.msra.mxu1 %v498_v6  ;;  %245 = vst.msk [vmem:[#allocation2 + $0x68] sm:$0xff] %vm231_vm2, %v1765_v1  ;;  %246 = vst.msk [vmem:[#allocation2 + $0x70] sm:$0xff] %vm231_vm2, %v1765_v1  ;;  %v427_v34 = vld [vmem:[%s1946_s27 + $0x218] sm:$0xff]  ;;  %v362_v35 = vld [vmem:[%s1946_s27 + $0x10] sm:$0xff] }
  0x19   : > { %725 = vmatprep.subr.mxu0 %v1765_v1  ;;  %1665 = vmatprep.subr.mxu1 %v1765_v1  ;;  %247 = vst.msk [vmem:[#allocation2 + $0x78] sm:$0xff] %vm231_vm2, %v1765_v1  ;;  %248 = vst.msk [vmem:[#allocation2 + $0x80] sm:$0xff] %vm231_vm2, %v1765_v1  ;;  %v426_v36 = vld [vmem:[%s1946_s27 + $0x210] sm:$0xff]  ;;  %v365_v37 = vld [vmem:[%s1946_s27 + $0x28] sm:$0xff] }
  0x1a   : > { %726 = vmatpush1.msra.mxu0 %v497_v7  ;;  %1693 = vmatpush1.msra.mxu1 %v497_v7  ;;  %249 = vst.msk [vmem:[#allocation2 + $0x88] sm:$0xff] %vm231_vm2, %v1765_v1  ;;  %250 = vst.msk [vmem:[#allocation2 + $0x90] sm:$0xff] %vm231_vm2, %v1765_v1  ;;  %v429_v38 = vld [vmem:[%s1946_s27 + $0x228] sm:$0xff]  ;;  %v364_v39 = vld [vmem:[%s1946_s27 + $0x20] sm:$0xff] }
  0x1b   : > { %727 = vmatprep.subr.mxu0 %v1765_v1  ;;  %1666 = vmatprep.subr.mxu1 %v1765_v1  ;;  %251 = vst.msk [vmem:[#allocation2 + $0x98] sm:$0xff] %vm231_vm2, %v1765_v1  ;;  %252 = vst.msk [vmem:[#allocation2 + $0xa0] sm:$0xff] %vm231_vm2, %v1765_v1  ;;  %v428_v40 = vld [vmem:[%s1946_s27 + $0x220] sm:$0xff]  ;;  %v367_v41 = vld [vmem:[%s1946_s27 + $0x38] sm:$0xff] }
  0x1c   : > { %728 = vmatpush1.msra.mxu0 %v496_v8  ;;  %1694 = vmatpush1.msra.mxu1 %v496_v8  ;;  %253 = vst.msk [vmem:[#allocation2 + $0xa8] sm:$0xff] %vm231_vm2, %v1765_v1  ;;  %254 = vst.msk [vmem:[#allocation2 + $0xb0] sm:$0xff] %vm231_vm2, %v1765_v1  ;;  %v431_v42 = vld [vmem:[%s1946_s27 + $0x238] sm:$0xff]  ;;  %v366_v43 = vld [vmem:[%s1946_s27 + $0x30] sm:$0xff] }
  0x1d   : > { %729 = vmatprep.subr.mxu0 %v1765_v1  ;;  %1667 = vmatprep.subr.mxu1 %v1765_v1  ;;  %255 = vst.msk [vmem:[#allocation2 + $0xb8] sm:$0xff] %vm231_vm2, %v1765_v1  ;;  %256 = vst.msk [vmem:[#allocation2 + $0xc0] sm:$0xff] %vm231_vm2, %v1765_v1  ;;  %v430_v44 = vld [vmem:[%s1946_s27 + $0x230] sm:$0xff]  ;;  %v369_v45 = vld [vmem:[%s1946_s27 + $0x48] sm:$0xff] }
  0x1e   : > { %730 = vmatpush1.msra.mxu0 %v495_v9  ;;  %1695 = vmatpush1.msra.mxu1 %v495_v9  ;;  %257 = vst.msk [vmem:[#allocation2 + $0xc8] sm:$0xff] %vm231_vm2, %v1765_v1  ;;  %258 = vst.msk [vmem:[#allocation2 + $0xd0] sm:$0xff] %vm231_vm2, %v1765_v1  ;;  %v433_v46 = vld [vmem:[%s1946_s27 + $0x248] sm:$0xff]  ;;  %v368_v47 = vld [vmem:[%s1946_s27 + $0x40] sm:$0xff] }
  0x1f   : > { %731 = vmatprep.subr.mxu0 %v1765_v1  ;;  %1668 = vmatprep.subr.mxu1 %v1765_v1  ;;  %259 = vst.msk [vmem:[#allocation2 + $0xd8] sm:$0xff] %vm231_vm2, %v1765_v1  ;;  %260 = vst.msk [vmem:[#allocation2 + $0xe0] sm:$0xff] %vm231_vm2, %v1765_v1  ;;  %v432_v48 = vld [vmem:[%s1946_s27 + $0x240] sm:$0xff]  ;;  %v371_v49 = vld [vmem:[%s1946_s27 + $0x58] sm:$0xff] }
  0x20   : > { %732 = vmatpush1.msra.mxu0 %v494_v10  ;;  %1696 = vmatpush1.msra.mxu1 %v494_v10  ;;  %261 = vst.msk [vmem:[#allocation2 + $0xe8] sm:$0xff] %vm231_vm2, %v1765_v1  ;;  %262 = vst.msk [vmem:[#allocation2 + $0xf0] sm:$0xff] %vm231_vm2, %v1765_v1  ;;  %v435_v50 = vld [vmem:[%s1946_s27 + $0x258] sm:$0xff]  ;;  %v370_v51 = vld [vmem:[%s1946_s27 + $0x50] sm:$0xff] }
  0x21   : > { %733 = vmatprep.subr.mxu0 %v1765_v1  ;;  %1669 = vmatprep.subr.mxu1 %v1765_v1  ;;  %263 = vst.msk [vmem:[#allocation2 + $0xf8] sm:$0xff] %vm231_vm2, %v1765_v1  ;;  %264 = vst.msk [vmem:[#allocation2 + $0x100] sm:$0xff] %vm231_vm2, %v1765_v1  ;;  %v434_v52 = vld [vmem:[%s1946_s27 + $0x250] sm:$0xff]  ;;  %v373_v53 = vld [vmem:[%s1946_s27 + $0x68] sm:$0xff] }
  0x22   : > { %734 = vmatpush1.msra.mxu0 %v493_v11  ;;  %1697 = vmatpush1.msra.mxu1 %v493_v11  ;;  %265 = vst.msk [vmem:[#allocation2 + $0x108] sm:$0xff] %vm231_vm2, %v1765_v1  ;;  %266 = vst.msk [vmem:[#allocation2 + $0x110] sm:$0xff] %vm231_vm2, %v1765_v1  ;;  %v437_v54 = vld [vmem:[%s1946_s27 + $0x268] sm:$0xff]  ;;  %v372_v55 = vld [vmem:[%s1946_s27 + $0x60] sm:$0xff] }
  0x23   : > { %735 = vmatprep.subr.mxu0 %v1765_v1  ;;  %1670 = vmatprep.subr.mxu1 %v1765_v1  ;;  %267 = vst.msk [vmem:[#allocation2 + $0x118] sm:$0xff] %vm231_vm2, %v1765_v1  ;;  %268 = vst.msk [vmem:[#allocation2 + $0x120] sm:$0xff] %vm231_vm2, %v1765_v1  ;;  %v436_v56 = vld [vmem:[%s1946_s27 + $0x260] sm:$0xff]  ;;  %v375_v57 = vld [vmem:[%s1946_s27 + $0x78] sm:$0xff] }
  0x24   : > { %736 = vmatpush1.msra.mxu0 %v492_v12  ;;  %1698 = vmatpush1.msra.mxu1 %v492_v12  ;;  %269 = vst.msk [vmem:[#allocation2 + $0x128] sm:$0xff] %vm231_vm2, %v1765_v1  ;;  %270 = vst.msk [vmem:[#allocation2 + $0x130] sm:$0xff] %vm231_vm2, %v1765_v1  ;;  %v439_v58 = vld [vmem:[%s1946_s27 + $0x278] sm:$0xff]  ;;  %v374_v59 = vld [vmem:[%s1946_s27 + $0x70] sm:$0xff] }
  0x25   : > { %737 = vmatprep.subr.mxu0 %v1765_v1  ;;  %1671 = vmatprep.subr.mxu1 %v1765_v1  ;;  %271 = vst.msk [vmem:[#allocation2 + $0x138] sm:$0xff] %vm231_vm2, %v1765_v1  ;;  %272 = vst.msk [vmem:[#allocation2 + $0x140] sm:$0xff] %vm231_vm2, %v1765_v1  ;;  %v438_v60 = vld [vmem:[%s1946_s27 + $0x270] sm:$0xff]  ;;  %v377_v61 = vld [vmem:[%s1946_s27 + $0x88] sm:$0xff] }
  0x26   : > { %738 = vmatpush1.msra.mxu0 %v491_v13  ;;  %1699 = vmatpush1.msra.mxu1 %v491_v13  ;;  %273 = vst.msk [vmem:[#allocation2 + $0x148] sm:$0xff] %vm231_vm2, %v1765_v1  ;;  %274 = vst.msk [vmem:[#allocation2 + $0x150] sm:$0xff] %vm231_vm2, %v1765_v1  ;;  %v441_v62 = vld [vmem:[%s1946_s27 + $0x288] sm:$0xff]  ;;  %v376_v63 = vld [vmem:[%s1946_s27 + $0x80] sm:$0xff] }
  0x27   : > { %739 = vmatprep.subr.mxu0 %v1765_v1  ;;  %1672 = vmatprep.subr.mxu1 %v1765_v1  ;;  %275 = vst.msk [vmem:[#allocation2 + $0x158] sm:$0xff] %vm231_vm2, %v1765_v1  ;;  %276 = vst.msk [vmem:[#allocation2 + $0x160] sm:$0xff] %vm231_vm2, %v1765_v1  ;;  %v440_v0 = vld [vmem:[%s1946_s27 + $0x280] sm:$0xff]  ;;  %v443_v2 = vld [vmem:[%s1946_s27 + $0x298] sm:$0xff] }
  0x28   : > { %740 = vmatpush1.msra.mxu0 %v490_v14  ;;  %1700 = vmatpush1.msra.mxu1 %v490_v14  ;;  %277 = vst.msk [vmem:[#allocation2 + $0x168] sm:$0xff] %vm231_vm2, %v1765_v1  ;;  %278 = vst.msk [vmem:[#allocation2 + $0x170] sm:$0xff] %vm231_vm2, %v1765_v1  ;;  %v378_v3 = vld [vmem:[%s1946_s27 + $0x90] sm:$0xff]  ;;  %v381_v5 = vld [vmem:[%s1946_s27 + $0xa8] sm:$0xff] }
  0x29   : > { %741 = vmatprep.subr.mxu0 %v1765_v1  ;;  %1673 = vmatprep.subr.mxu1 %v1765_v1  ;;  %279 = vst.msk [vmem:[#allocation2 + $0x178] sm:$0xff] %vm231_vm2, %v1765_v1  ;;  %280 = vst.msk [vmem:[#allocation2 + $0x180] sm:$0xff] %vm231_vm2, %v1765_v1  ;;  %v442_v4 = vld [vmem:[%s1946_s27 + $0x290] sm:$0xff]  ;;  %v445_v6 = vld [vmem:[%s1946_s27 + $0x2a8] sm:$0xff] }
  0x2a   : > { %742 = vmatpush1.msra.mxu0 %v489_v15  ;;  %1701 = vmatpush1.msra.mxu1 %v489_v15  ;;  %281 = vst.msk [vmem:[#allocation2 + $0x188] sm:$0xff] %vm231_vm2, %v1765_v1  ;;  %282 = vst.msk [vmem:[#allocation2 + $0x190] sm:$0xff] %vm231_vm2, %v1765_v1  ;;  %v380_v7 = vld [vmem:[%s1946_s27 + $0xa0] sm:$0xff]  ;;  %v383_v9 = vld [vmem:[%s1946_s27 + $0xb8] sm:$0xff] }
  0x2b   : > { %743 = vmatprep.subr.mxu0 %v1765_v1  ;;  %1674 = vmatprep.subr.mxu1 %v1765_v1  ;;  %283 = vst.msk [vmem:[#allocation2 + $0x198] sm:$0xff] %vm231_vm2, %v1765_v1  ;;  %284 = vst.msk [vmem:[#allocation2 + $0x1a0] sm:$0xff] %vm231_vm2, %v1765_v1  ;;  %v444_v8 = vld [vmem:[%s1946_s27 + $0x2a0] sm:$0xff]  ;;  %v447_v10 = vld [vmem:[%s1946_s27 + $0x2b8] sm:$0xff] }
  0x2c   : > { %744 = vmatpush1.msra.mxu0 %v488_v16  ;;  %1702 = vmatpush1.msra.mxu1 %v488_v16  ;;  %285 = vst.msk [vmem:[#allocation2 + $0x1a8] sm:$0xff] %vm231_vm2, %v1765_v1  ;;  %286 = vst.msk [vmem:[#allocation2 + $0x1b0] sm:$0xff] %vm231_vm2, %v1765_v1  ;;  %v382_v11 = vld [vmem:[%s1946_s27 + $0xb0] sm:$0xff]  ;;  %v385_v13 = vld [vmem:[%s1946_s27 + $0xc8] sm:$0xff] }
  0x2d   : > { %753 = vmatprep.subr.mxu0 %v1765_v1  ;;  %1675 = vmatprep.subr.mxu1 %v1765_v1  ;;  %287 = vst.msk [vmem:[#allocation2 + $0x1b8] sm:$0xff] %vm231_vm2, %v1765_v1  ;;  %288 = vst.msk [vmem:[#allocation2 + $0x1c0] sm:$0xff] %vm231_vm2, %v1765_v1  ;;  %v446_v12 = vld [vmem:[%s1946_s27 + $0x2b0] sm:$0xff]  ;;  %v449_v14 = vld [vmem:[%s1946_s27 + $0x2c8] sm:$0xff] }
  0x2e   : > { %1590 = vmatpush2.msk.msra.mxu0 %vm709_vm0, %v515_v17  ;;  %1703 = vmatpush2.msk.msra.mxu1 %vm709_vm0, %v515_v17  ;;  %289 = vst.msk [vmem:[#allocation2 + $0x1c8] sm:$0xff] %vm231_vm2, %v1765_v1  ;;  %290 = vst.msk [vmem:[#allocation2 + $0x1d0] sm:$0xff] %vm231_vm2, %v1765_v1  ;;  %v384_v15 = vld [vmem:[%s1946_s27 + $0xc0] sm:$0xff]  ;;  %v387_v17 = vld [vmem:[%s1946_s27 + $0xd8] sm:$0xff] }
  0x2f   : > { %755 = vmatprep.subr.mxu0 %v1765_v1  ;;  %1676 = vmatprep.subr.mxu1 %v1765_v1  ;;  %291 = vst.msk [vmem:[#allocation2 + $0x1d8] sm:$0xff] %vm231_vm2, %v1765_v1  ;;  %292 = vst.msk [vmem:[#allocation2 + $0x1e0] sm:$0xff] %vm231_vm2, %v1765_v1  ;;  %v448_v16 = vld [vmem:[%s1946_s27 + $0x2c0] sm:$0xff] }
  0x30   : > { %756 = vmatpush2.msra.mxu0 %v514_v18  ;;  %1704 = vmatpush2.msra.mxu1 %v514_v18  ;;  %293 = vst.msk [vmem:[#allocation2 + $0x1e8] sm:$0xff] %vm231_vm2, %v1765_v1  ;;  %294 = vst.msk [vmem:[#allocation2 + $0x1f0] sm:$0xff] %vm231_vm2, %v1765_v1  ;;  %v451_v18 = vld [vmem:[%s1946_s27 + $0x2d8] sm:$0xff] }
  0x31   : > { %757 = vmatprep.subr.mxu0 %v1765_v1  ;;  %1677 = vmatprep.subr.mxu1 %v1765_v1  ;;  %295 = vst.msk [vmem:[#allocation2 + $0x1f8] sm:$0xff] %vm231_vm2, %v1765_v1 }
  0x32   : > { %758 = vmatpush2.msra.mxu0 %v513_v19  ;;  %1705 = vmatpush2.msra.mxu1 %v513_v19  ;;  %v386_v19 = vld [vmem:[%s1946_s27 + $0xd0] sm:$0xff] }
  0x33   : > { %759 = vmatprep.subr.mxu0 %v1765_v1  ;;  %1678 = vmatprep.subr.mxu1 %v1765_v1 }
  0x34   : > { %760 = vmatpush2.msra.mxu0 %v512_v20  ;;  %1706 = vmatpush2.msra.mxu1 %v512_v20  ;;  %v450_v20 = vld [vmem:[%s1946_s27 + $0x2d0] sm:$0xff] }
  0x35   : > { %761 = vmatprep.subr.mxu0 %v1765_v1  ;;  %1679 = vmatprep.subr.mxu1 %v1765_v1 }
  0x36   : > { %762 = vmatpush2.msra.mxu0 %v511_v21  ;;  %1707 = vmatpush2.msra.mxu1 %v511_v21  ;;  %v389_v21 = vld [vmem:[%s1946_s27 + $0xe8] sm:$0xff] }
  0x37   : > { %763 = vmatprep.subr.mxu0 %v1765_v1  ;;  %1680 = vmatprep.subr.mxu1 %v1765_v1 }
  0x38   : > { %764 = vmatpush2.msra.mxu0 %v510_v22  ;;  %1708 = vmatpush2.msra.mxu1 %v510_v22  ;;  %v453_v22 = vld [vmem:[%s1946_s27 + $0x2e8] sm:$0xff] }
  0x39   : > { %765 = vmatprep.subr.mxu0 %v1765_v1  ;;  %1681 = vmatprep.subr.mxu1 %v1765_v1 }
  0x3a   : > { %766 = vmatpush2.msra.mxu0 %v509_v23  ;;  %1709 = vmatpush2.msra.mxu1 %v509_v23  ;;  %v388_v23 = vld [vmem:[%s1946_s27 + $0xe0] sm:$0xff] }
  0x3b   : > { %767 = vmatprep.subr.mxu0 %v1765_v1  ;;  %1682 = vmatprep.subr.mxu1 %v1765_v1 }
  0x3c   : > { %768 = vmatpush2.msra.mxu0 %v508_v24  ;;  %1710 = vmatpush2.msra.mxu1 %v508_v24  ;;  %v452_v24 = vld [vmem:[%s1946_s27 + $0x2e0] sm:$0xff] }
  0x3d   : > { %769 = vmatprep.subr.mxu0 %v1765_v1  ;;  %1683 = vmatprep.subr.mxu1 %v1765_v1 }
  0x3e   : > { %770 = vmatpush2.msra.mxu0 %v507_v25  ;;  %1711 = vmatpush2.msra.mxu1 %v507_v25  ;;  %v391_v25 = vld [vmem:[%s1946_s27 + $0xf8] sm:$0xff] }
  0x3f   : > { %771 = vmatprep.subr.mxu0 %v1765_v1  ;;  %1684 = vmatprep.subr.mxu1 %v1765_v1 }
  0x40   : > { %772 = vmatpush2.msra.mxu0 %v506_v26  ;;  %1712 = vmatpush2.msra.mxu1 %v506_v26  ;;  %v455_v26 = vld [vmem:[%s1946_s27 + $0x2f8] sm:$0xff] }
  0x41   : > { %773 = vmatprep.subr.mxu0 %v1765_v1  ;;  %1685 = vmatprep.subr.mxu1 %v1765_v1 }
  0x42   : > { %774 = vmatpush2.msra.mxu0 %v505_v27  ;;  %1713 = vmatpush2.msra.mxu1 %v505_v27  ;;  %v390_v27 = vld [vmem:[%s1946_s27 + $0xf0] sm:$0xff] }
  0x43   : > { %775 = vmatprep.subr.mxu0 %v1765_v1  ;;  %1686 = vmatprep.subr.mxu1 %v1765_v1  ;;  %v379_v1 = vld [vmem:[%s1946_s27 + $0x98] sm:$0xff] }
  0x44   : > { %776 = vmatpush2.msra.mxu0 %v1953_v28  ;;  %1714 = vmatpush2.msra.mxu1 %v1953_v28  ;;  %v454_v28 = vld [vmem:[%s1946_s27 + $0x2f0] sm:$0xff] }
  0x45   : > { %1591 = vmatprep.mubr.msk.f32.mxu0 %vm516_vm1, %v1956_v29  ;;  %1623 = vmatprep.mubr.msk.f32.mxu1 %vm516_vm1, %v1959_v30  ;;  %v393_v29 = vld [vmem:[%s1946_s27 + $0x108] sm:$0xff] }
  0x46   : > { %778 = vmatmul.mubr.f32.vlgmr.msra.gmra.mxu0 %v1964_v31  ;;  %938 = vmatmul.mubr.f32.vlgmr.msra.gmra.mxu1 %v1967_v32  ;;  %v457_v30 = vld [vmem:[%s1946_s27 + $0x308] sm:$0xff]  ;;  %v392_v31 = vld [vmem:[%s1946_s27 + $0x100] sm:$0xff] }
  0x47   : > { %1592 = vmatprep.mubr.msk.f32.mxu0 %vm516_vm1, %v363_v33  ;;  %1624 = vmatprep.mubr.msk.f32.mxu1 %vm516_vm1, %v427_v34  ;;  %v456_v32 = vld [vmem:[%s1946_s27 + $0x300] sm:$0xff]  ;;  %v395_v33 = vld [vmem:[%s1946_s27 + $0x118] sm:$0xff] }
  0x48   : > { %v459_v34 = vld [vmem:[%s1946_s27 + $0x318] sm:$0xff] }
  0x4a   : > { %783 = vmatmul.mubr.f32.gmra.mxu0 %v362_v35  ;;  %943 = vmatmul.mubr.f32.gmra.mxu1 %v426_v36  ;;  %v394_v35 = vld [vmem:[%s1946_s27 + $0x110] sm:$0xff] }
  0x4b   : > { %1593 = vmatprep.mubr.msk.f32.mxu0 %vm516_vm1, %v365_v37  ;;  %1625 = vmatprep.mubr.msk.f32.mxu1 %vm516_vm1, %v429_v38  ;;  %v458_v36 = vld [vmem:[%s1946_s27 + $0x310] sm:$0xff]  ;;  %v397_v37 = vld [vmem:[%s1946_s27 + $0x128] sm:$0xff] }
  0x4c   : > { %v461_v38 = vld [vmem:[%s1946_s27 + $0x328] sm:$0xff] }
  0x4e   : > { %788 = vmatmul.mubr.f32.gmra.mxu0 %v364_v39  ;;  %948 = vmatmul.mubr.f32.gmra.mxu1 %v428_v40  ;;  %v396_v39 = vld [vmem:[%s1946_s27 + $0x120] sm:$0xff] }
  0x4f   : > { %1594 = vmatprep.mubr.msk.f32.mxu0 %vm516_vm1, %v367_v41  ;;  %1626 = vmatprep.mubr.msk.f32.mxu1 %vm516_vm1, %v431_v42  ;;  %v460_v40 = vld [vmem:[%s1946_s27 + $0x320] sm:$0xff]  ;;  %v399_v41 = vld [vmem:[%s1946_s27 + $0x138] sm:$0xff] }
  0x50   : > { %v463_v42 = vld [vmem:[%s1946_s27 + $0x338] sm:$0xff] }
  0x52   : > { %793 = vmatmul.mubr.f32.gmra.mxu0 %v366_v43  ;;  %953 = vmatmul.mubr.f32.gmra.mxu1 %v430_v44  ;;  %v398_v43 = vld [vmem:[%s1946_s27 + $0x130] sm:$0xff] }
  0x53   : > { %1595 = vmatprep.mubr.msk.f32.mxu0 %vm516_vm1, %v369_v45  ;;  %1627 = vmatprep.mubr.msk.f32.mxu1 %vm516_vm1, %v433_v46  ;;  %v462_v44 = vld [vmem:[%s1946_s27 + $0x330] sm:$0xff]  ;;  %v401_v45 = vld [vmem:[%s1946_s27 + $0x148] sm:$0xff] }
  0x54   : > { %v465_v46 = vld [vmem:[%s1946_s27 + $0x348] sm:$0xff] }
  0x56   : > { %798 = vmatmul.mubr.f32.gmra.mxu0 %v368_v47  ;;  %958 = vmatmul.mubr.f32.gmra.mxu1 %v432_v48  ;;  %v400_v47 = vld [vmem:[%s1946_s27 + $0x140] sm:$0xff] }
  0x57   : > { %1596 = vmatprep.mubr.msk.f32.mxu0 %vm516_vm1, %v371_v49  ;;  %1628 = vmatprep.mubr.msk.f32.mxu1 %vm516_vm1, %v435_v50  ;;  %v464_v48 = vld [vmem:[%s1946_s27 + $0x340] sm:$0xff]  ;;  %v403_v49 = vld [vmem:[%s1946_s27 + $0x158] sm:$0xff] }
  0x58   : > { %v467_v50 = vld [vmem:[%s1946_s27 + $0x358] sm:$0xff] }
  0x5a   : > { %803 = vmatmul.mubr.f32.gmra.mxu0 %v370_v51  ;;  %963 = vmatmul.mubr.f32.gmra.mxu1 %v434_v52  ;;  %v402_v51 = vld [vmem:[%s1946_s27 + $0x150] sm:$0xff] }
  0x5b   : > { %1597 = vmatprep.mubr.msk.f32.mxu0 %vm516_vm1, %v373_v53  ;;  %1629 = vmatprep.mubr.msk.f32.mxu1 %vm516_vm1, %v437_v54  ;;  %v466_v52 = vld [vmem:[%s1946_s27 + $0x350] sm:$0xff]  ;;  %v405_v53 = vld [vmem:[%s1946_s27 + $0x168] sm:$0xff] }
  0x5c   : > { %v469_v54 = vld [vmem:[%s1946_s27 + $0x368] sm:$0xff] }
  0x5e   : > { %808 = vmatmul.mubr.f32.gmra.mxu0 %v372_v55  ;;  %968 = vmatmul.mubr.f32.gmra.mxu1 %v436_v56  ;;  %v404_v55 = vld [vmem:[%s1946_s27 + $0x160] sm:$0xff] }
  0x5f   : > { %1598 = vmatprep.mubr.msk.f32.mxu0 %vm516_vm1, %v375_v57  ;;  %1630 = vmatprep.mubr.msk.f32.mxu1 %vm516_vm1, %v439_v58  ;;  %v468_v56 = vld [vmem:[%s1946_s27 + $0x360] sm:$0xff]  ;;  %v407_v57 = vld [vmem:[%s1946_s27 + $0x178] sm:$0xff] }
  0x60   : > { %v471_v58 = vld [vmem:[%s1946_s27 + $0x378] sm:$0xff] }
  0x62   : > { %813 = vmatmul.mubr.f32.gmra.mxu0 %v374_v59  ;;  %973 = vmatmul.mubr.f32.gmra.mxu1 %v438_v60  ;;  %v406_v59 = vld [vmem:[%s1946_s27 + $0x170] sm:$0xff] }
  0x63   : > { %1599 = vmatprep.mubr.msk.f32.mxu0 %vm516_vm1, %v377_v61  ;;  %1631 = vmatprep.mubr.msk.f32.mxu1 %vm516_vm1, %v441_v62  ;;  %v470_v60 = vld [vmem:[%s1946_s27 + $0x370] sm:$0xff]  ;;  %v409_v61 = vld [vmem:[%s1946_s27 + $0x188] sm:$0xff] }
  0x64   : > { %v473_v62 = vld [vmem:[%s1946_s27 + $0x388] sm:$0xff] }
  0x66   : > { %818 = vmatmul.mubr.f32.gmra.mxu0 %v376_v63  ;;  %978 = vmatmul.mubr.f32.gmra.mxu1 %v440_v0  ;;  %v408_v63 = vld [vmem:[%s1946_s27 + $0x180] sm:$0xff] }
  0x67   : > { %1600 = vmatprep.mubr.msk.f32.mxu0 %vm516_vm1, %v379_v1  ;;  %1632 = vmatprep.mubr.msk.f32.mxu1 %vm516_vm1, %v443_v2  ;;  %v472_v0 = vld [vmem:[%s1946_s27 + $0x380] sm:$0xff]  ;;  %v411_v1 = vld [vmem:[%s1946_s27 + $0x198] sm:$0xff] }
  0x68   : > { %v475_v2 = vld [vmem:[%s1946_s27 + $0x398] sm:$0xff] }
  0x6a   : > { %823 = vmatmul.mubr.f32.gmra.mxu0 %v378_v3  ;;  %983 = vmatmul.mubr.f32.gmra.mxu1 %v442_v4  ;;  %v410_v3 = vld [vmem:[%s1946_s27 + $0x190] sm:$0xff] }
  0x6b   : > { %1601 = vmatprep.mubr.msk.f32.mxu0 %vm516_vm1, %v381_v5  ;;  %1633 = vmatprep.mubr.msk.f32.mxu1 %vm516_vm1, %v445_v6  ;;  %v474_v4 = vld [vmem:[%s1946_s27 + $0x390] sm:$0xff]  ;;  %v413_v5 = vld [vmem:[%s1946_s27 + $0x1a8] sm:$0xff] }
  0x6c   : > { %v477_v6 = vld [vmem:[%s1946_s27 + $0x3a8] sm:$0xff] }
  0x6e   : > { %828 = vmatmul.mubr.f32.gmra.mxu0 %v380_v7  ;;  %988 = vmatmul.mubr.f32.gmra.mxu1 %v444_v8  ;;  %v412_v7 = vld [vmem:[%s1946_s27 + $0x1a0] sm:$0xff] }
  0x6f   : > { %1602 = vmatprep.mubr.msk.f32.mxu0 %vm516_vm1, %v383_v9  ;;  %1634 = vmatprep.mubr.msk.f32.mxu1 %vm516_vm1, %v447_v10  ;;  %v476_v8 = vld [vmem:[%s1946_s27 + $0x3a0] sm:$0xff]  ;;  %v415_v9 = vld [vmem:[%s1946_s27 + $0x1b8] sm:$0xff] }
  0x70   : > { %v479_v10 = vld [vmem:[%s1946_s27 + $0x3b8] sm:$0xff] }
  0x72   : > { %833 = vmatmul.mubr.f32.gmra.mxu0 %v382_v11  ;;  %993 = vmatmul.mubr.f32.gmra.mxu1 %v446_v12  ;;  %v414_v11 = vld [vmem:[%s1946_s27 + $0x1b0] sm:$0xff] }
  0x73   : > { %1603 = vmatprep.mubr.msk.f32.mxu0 %vm516_vm1, %v385_v13  ;;  %1635 = vmatprep.mubr.msk.f32.mxu1 %vm516_vm1, %v449_v14  ;;  %v478_v12 = vld [vmem:[%s1946_s27 + $0x3b0] sm:$0xff]  ;;  %v417_v13 = vld [vmem:[%s1946_s27 + $0x1c8] sm:$0xff] }
  0x74   : > { %v481_v14 = vld [vmem:[%s1946_s27 + $0x3c8] sm:$0xff] }
  0x76   : > { %838 = vmatmul.mubr.f32.gmra.mxu0 %v384_v15  ;;  %998 = vmatmul.mubr.f32.gmra.mxu1 %v448_v16  ;;  %v416_v15 = vld [vmem:[%s1946_s27 + $0x1c0] sm:$0xff] }
  0x77   : > { %1604 = vmatprep.mubr.msk.f32.mxu0 %vm516_vm1, %v387_v17  ;;  %1636 = vmatprep.mubr.msk.f32.mxu1 %vm516_vm1, %v451_v18  ;;  %v480_v16 = vld [vmem:[%s1946_s27 + $0x3c0] sm:$0xff]  ;;  %v419_v17 = vld [vmem:[%s1946_s27 + $0x1d8] sm:$0xff] }
  0x78   : > { %v483_v18 = vld [vmem:[%s1946_s27 + $0x3d8] sm:$0xff] }
  0x7a   : > { %843 = vmatmul.mubr.f32.gmra.mxu0 %v386_v19  ;;  %1003 = vmatmul.mubr.f32.gmra.mxu1 %v450_v20  ;;  %v418_v19 = vld [vmem:[%s1946_s27 + $0x1d0] sm:$0xff] }
  0x7b   : > { %1605 = vmatprep.mubr.msk.f32.mxu0 %vm516_vm1, %v389_v21  ;;  %1637 = vmatprep.mubr.msk.f32.mxu1 %vm516_vm1, %v453_v22  ;;  %v482_v20 = vld [vmem:[%s1946_s27 + $0x3d0] sm:$0xff]  ;;  %v421_v21 = vld [vmem:[%s1946_s27 + $0x1e8] sm:$0xff] }
  0x7c   : > { %v485_v22 = vld [vmem:[%s1946_s27 + $0x3e8] sm:$0xff] }
  0x7e   : > { %848 = vmatmul.mubr.f32.gmra.mxu0 %v388_v23  ;;  %1008 = vmatmul.mubr.f32.gmra.mxu1 %v452_v24  ;;  %v420_v23 = vld [vmem:[%s1946_s27 + $0x1e0] sm:$0xff] }
  0x7f   : > { %1606 = vmatprep.mubr.msk.f32.mxu0 %vm516_vm1, %v391_v25  ;;  %1638 = vmatprep.mubr.msk.f32.mxu1 %vm516_vm1, %v455_v26  ;;  %v484_v24 = vld [vmem:[%s1946_s27 + $0x3e0] sm:$0xff]  ;;  %v423_v25 = vld [vmem:[%s1946_s27 + $0x1f8] sm:$0xff] }
  0x80   : > { %v487_v26 = vld [vmem:[%s1946_s27 + $0x3f8] sm:$0xff] }
  0x82   : > { %853 = vmatmul.mubr.f32.gmra.mxu0 %v390_v27  ;;  %1013 = vmatmul.mubr.f32.gmra.mxu1 %v454_v28  ;;  %v422_v27 = vld [vmem:[%s1946_s27 + $0x1f0] sm:$0xff] }
  0x83   : > { %1607 = vmatprep.mubr.msk.f32.mxu0 %vm516_vm1, %v393_v29  ;;  %1639 = vmatprep.mubr.msk.f32.mxu1 %vm516_vm1, %v457_v30  ;;  %v486_v28 = vld [vmem:[%s1946_s27 + $0x3f0] sm:$0xff]  ;;  %v296_v29 = vld [vmem:[#allocation2] sm:$0xff] }
  0x84   : > { %v328_v30 = vld [vmem:[#allocation2 + $0x100] sm:$0xff] }
  0x86   : > { %858 = vmatmul.mubr.f32.gmra.mxu0 %v392_v31  ;;  %1018 = vmatmul.mubr.f32.gmra.mxu1 %v456_v32 }
  0x87   : > { %1608 = vmatprep.mubr.msk.f32.mxu0 %vm516_vm1, %v395_v33  ;;  %1640 = vmatprep.mubr.msk.f32.mxu1 %vm516_vm1, %v459_v34 }
  0x8a   : > { %863 = vmatmul.mubr.f32.gmra.mxu0 %v394_v35  ;;  %1023 = vmatmul.mubr.f32.gmra.mxu1 %v458_v36 }
  0x8b   : > { %1609 = vmatprep.mubr.msk.f32.mxu0 %vm516_vm1, %v397_v37  ;;  %1641 = vmatprep.mubr.msk.f32.mxu1 %vm516_vm1, %v461_v38  ;;  %v297_v37 = vld [vmem:[#allocation2 + $0x8] sm:$0xff] }
  0x8c   : > { %v329_v38 = vld [vmem:[#allocation2 + $0x108] sm:$0xff] }
  0x8e   : > { %868 = vmatmul.mubr.f32.gmra.mxu0 %v396_v39  ;;  %1028 = vmatmul.mubr.f32.gmra.mxu1 %v460_v40 }
  0x8f   : > { %1610 = vmatprep.mubr.msk.f32.mxu0 %vm516_vm1, %v399_v41  ;;  %1642 = vmatprep.mubr.msk.f32.mxu1 %vm516_vm1, %v463_v42 }
  0x92   : > { %873 = vmatmul.mubr.f32.gmra.mxu0 %v398_v43  ;;  %1033 = vmatmul.mubr.f32.gmra.mxu1 %v462_v44 }
  0x93   : > { %1611 = vmatprep.mubr.msk.f32.mxu0 %vm516_vm1, %v401_v45  ;;  %1643 = vmatprep.mubr.msk.f32.mxu1 %vm516_vm1, %v465_v46  ;;  %v298_v45 = vld [vmem:[#allocation2 + $0x10] sm:$0xff] }
  0x94   : > { %v330_v46 = vld [vmem:[#allocation2 + $0x110] sm:$0xff] }
  0x96   : > { %878 = vmatmul.mubr.f32.gmra.mxu0 %v400_v47  ;;  %1038 = vmatmul.mubr.f32.gmra.mxu1 %v464_v48  ;;  %v2298_v47 = vld [vmem:[%s2564_s2] ss:$0 sm:$0xff] }
  0x97   : > { %1612 = vmatprep.mubr.msk.f32.mxu0 %vm516_vm1, %v403_v49  ;;  %1644 = vmatprep.mubr.msk.f32.mxu1 %vm516_vm1, %v467_v50 }
  0x9a   : > { %883 = vmatmul.mubr.f32.gmra.mxu0 %v402_v51  ;;  %1043 = vmatmul.mubr.f32.gmra.mxu1 %v466_v52  ;;  %v299_v52 = vld [vmem:[#allocation2 + $0x18] sm:$0xff] }
  0x9b   : > { %1613 = vmatprep.mubr.msk.f32.mxu0 %vm516_vm1, %v405_v53  ;;  %1645 = vmatprep.mubr.msk.f32.mxu1 %vm516_vm1, %v469_v54 }
  0x9e   : > { %888 = vmatmul.mubr.f32.gmra.mxu0 %v404_v55  ;;  %1048 = vmatmul.mubr.f32.gmra.mxu1 %v468_v56 }
  0x9f   : > { %1614 = vmatprep.mubr.msk.f32.mxu0 %vm516_vm1, %v407_v57  ;;  %1646 = vmatprep.mubr.msk.f32.mxu1 %vm516_vm1, %v471_v58  ;;  %v331_v57 = vld [vmem:[#allocation2 + $0x118] sm:$0xff] }
  0xa2   : > { %893 = vmatmul.mubr.f32.gmra.mxu0 %v406_v59  ;;  %1053 = vmatmul.mubr.f32.gmra.mxu1 %v470_v60 }
  0xa3   : > { %1615 = vmatprep.mubr.msk.f32.mxu0 %vm516_vm1, %v409_v61  ;;  %1647 = vmatprep.mubr.msk.f32.mxu1 %vm516_vm1, %v473_v62 }
  0xa6   : > { %898 = vmatmul.mubr.f32.gmra.mxu0 %v408_v63  ;;  %1058 = vmatmul.mubr.f32.gmra.mxu1 %v472_v0 }
  0xa7   : > { %1616 = vmatprep.mubr.msk.f32.mxu0 %vm516_vm1, %v411_v1  ;;  %1648 = vmatprep.mubr.msk.f32.mxu1 %vm516_vm1, %v475_v2  ;;  %v300_v2 = vld [vmem:[#allocation2 + $0x20] sm:$0xff] }
  0xaa   : > { %903 = vmatmul.mubr.f32.gmra.mxu0 %v410_v3  ;;  %1063 = vmatmul.mubr.f32.gmra.mxu1 %v474_v4 }
  0xab   : > { %1617 = vmatprep.mubr.msk.f32.mxu0 %vm516_vm1, %v413_v5  ;;  %1649 = vmatprep.mubr.msk.f32.mxu1 %vm516_vm1, %v477_v6 }
  0xae   : > { %908 = vmatmul.mubr.f32.gmra.mxu0 %v412_v7  ;;  %1068 = vmatmul.mubr.f32.gmra.mxu1 %v476_v8  ;;  %v332_v7 = vld [vmem:[#allocation2 + $0x120] sm:$0xff] }
  0xaf   : > { %1618 = vmatprep.mubr.msk.f32.mxu0 %vm516_vm1, %v415_v9  ;;  %1650 = vmatprep.mubr.msk.f32.mxu1 %vm516_vm1, %v479_v10 }
  0xb2   : > { %913 = vmatmul.mubr.f32.gmra.mxu0 %v414_v11  ;;  %1073 = vmatmul.mubr.f32.gmra.mxu1 %v478_v12 }
  0xb3   : > { %1619 = vmatprep.mubr.msk.f32.mxu0 %vm516_vm1, %v417_v13  ;;  %1651 = vmatprep.mubr.msk.f32.mxu1 %vm516_vm1, %v481_v14 }
  0xb6   : > { %918 = vmatmul.mubr.f32.gmra.mxu0 %v416_v15  ;;  %1078 = vmatmul.mubr.f32.gmra.mxu1 %v480_v16  ;;  %v301_v16 = vld [vmem:[#allocation2 + $0x28] sm:$0xff] }
  0xb7   : > { %1620 = vmatprep.mubr.msk.f32.mxu0 %vm516_vm1, %v419_v17  ;;  %1652 = vmatprep.mubr.msk.f32.mxu1 %vm516_vm1, %v483_v18 }
  0xba   : > { %923 = vmatmul.mubr.f32.gmra.mxu0 %v418_v19  ;;  %1083 = vmatmul.mubr.f32.gmra.mxu1 %v482_v20 }
  0xbb   : > { %1621 = vmatprep.mubr.msk.f32.mxu0 %vm516_vm1, %v421_v21  ;;  %1653 = vmatprep.mubr.msk.f32.mxu1 %vm516_vm1, %v485_v22  ;;  %v333_v21 = vld [vmem:[#allocation2 + $0x128] sm:$0xff] }
  0xbe   : > { %928 = vmatmul.mubr.f32.gmra.mxu0 %v420_v23  ;;  %1088 = vmatmul.mubr.f32.gmra.mxu1 %v484_v24 }
  0xbf   : > { %1622 = vmatprep.mubr.msk.f32.mxu0 %vm516_vm1, %v423_v25  ;;  %1654 = vmatprep.mubr.msk.f32.mxu1 %vm516_vm1, %v487_v26 }
  0xc2   : > { %933 = vmatmul.mubr.f32.gmra.mxu0 %v422_v27  ;;  %1093 = vmatmul.mubr.f32.gmra.mxu1 %v486_v28 }
 0x106   : > { %v779_v31 = vpop.f32.mrf.mxu0  ;;  %v939_v32 = vpop.f32.mrf.mxu1 }
 0x107   : > { %v1098_v33 = vadd.f32 %v779_v31, %v296_v29  ;;  %v1130_v34 = vadd.f32 %v939_v32, %v328_v30  ;;  %v302_v30 = vld [vmem:[#allocation2 + $0x30] sm:$0xff] }
 0x108   : > { %v781_v35 = vpop.f32.mrf.mxu0  ;;  %v941_v36 = vpop.f32.mrf.mxu1 }
 0x109   : > { %1163 = vst.msk [vmem:[#allocation2] sm:$0xff] %vm231_vm2, %v1098_v33  ;;  %1195 = vst.msk [vmem:[#allocation2 + $0x100] sm:$0xff] %vm231_vm2, %v1130_v34  ;;  %v334_v35 = vld [vmem:[#allocation2 + $0x130] sm:$0xff] }
 0x10a   : > { %v784_v39 = vpop.f32.mrf.mxu0  ;;  %v944_v40 = vpop.f32.mrf.mxu1 }
 0x10b   : > { %v1099_v41 = vadd.f32 %v784_v39, %v297_v37  ;;  %v1131_v42 = vadd.f32 %v944_v40, %v329_v38 }
 0x10c   : > { %v786_v43 = vpop.f32.mrf.mxu0  ;;  %v946_v44 = vpop.f32.mrf.mxu1 }
 0x10d   : > { %1164 = vst.msk [vmem:[#allocation2 + $0x8] sm:$0xff] %vm231_vm2, %v1099_v41  ;;  %1196 = vst.msk [vmem:[#allocation2 + $0x108] sm:$0xff] %vm231_vm2, %v1131_v42  ;;  %v303_v44 = vld [vmem:[#allocation2 + $0x38] sm:$0xff] }
 0x10e   : > { %v789_v48 = vpop.f32.mrf.mxu0  ;;  %v949_v49 = vpop.f32.mrf.mxu1 }
 0x10f   : > { %v1100_v50 = vadd.f32 %v789_v48, %v298_v45  ;;  %v1132_v51 = vadd.f32 %v949_v49, %v330_v46 }
 0x110   : > { %v1230_v53 = vld [vmem:[#allocation2] sm:$0xff]  ;;  %v791_v55 = vpop.f32.mrf.mxu0  ;;  %v951_v56 = vpop.f32.mrf.mxu1 }
 0x111   : > { %v1262_v54 = vld [vmem:[#allocation2 + $0x100] sm:$0xff]  ;;  %v1301_v58 = vadd.f32 %v2298_v47, %v1230_v53  ;;  %1165 = vst.msk [vmem:[#allocation2 + $0x10] sm:$0xff] %vm231_vm2, %v1100_v50  ;;  %1197 = vst.msk [vmem:[#allocation2 + $0x110] sm:$0xff] %vm231_vm2, %v1132_v51  ;;  %v335_v50 = vld [vmem:[#allocation2 + $0x138] sm:$0xff] }
 0x112   : > { %v1333_v59 = vadd.f32 %v2298_v47, %v1262_v54  ;;  %v794_v60 = vpop.f32.mrf.mxu0  ;;  %v954_v61 = vpop.f32.mrf.mxu1 }
 0x113   : > { %v1365_v62 = vmax.f32 %v1301_v58, 0.0  ;;  %v1101_v0 = vadd.f32 %v794_v60, %v299_v52  ;;  %v1133_v1 = vadd.f32 %v954_v61, %v331_v57 }
 0x114   : > { %v1397_v63 = vmax.f32 %v1333_v59, 0.0  ;;  %v1231_v3 = vld [vmem:[#allocation2 + $0x8] sm:$0xff]  ;;  %v796_v5 = vpop.f32.mrf.mxu0  ;;  %v956_v6 = vpop.f32.mrf.mxu1  ;;  %v304_v59 = vld [vmem:[#allocation2 + $0x40] sm:$0xff] }
 0x115   : > { %v1263_v4 = vld [vmem:[#allocation2 + $0x108] sm:$0xff]  ;;  %1429 = vst.msk [vmem:[%s2308_s6] sm:$0xff] %vm231_vm2, %v1365_v62  ;;  %v1302_v8 = vadd.f32 %v2298_v47, %v1231_v3  ;;  %1166 = vst.msk [vmem:[#allocation2 + $0x18] sm:$0xff] %vm231_vm2, %v1101_v0  ;;  %v336_v0 = vld [vmem:[#allocation2 + $0x140] sm:$0xff] }
 0x116   : > { %1461 = vst.msk [vmem:[%s2308_s6 + $0x100] sm:$0xff] %vm231_vm2, %v1397_v63  ;;  %v1334_v9 = vadd.f32 %v2298_v47, %v1263_v4  ;;  %1198 = vst.msk [vmem:[#allocation2 + $0x118] sm:$0xff] %vm231_vm2, %v1133_v1  ;;  %v799_v10 = vpop.f32.mrf.mxu0  ;;  %v959_v11 = vpop.f32.mrf.mxu1 }
 0x117   : > { %v1366_v12 = vmax.f32 %v1302_v8, 0.0  ;;  %v1102_v14 = vadd.f32 %v799_v10, %v300_v2  ;;  %v1134_v15 = vadd.f32 %v959_v11, %v332_v7 }
 0x118   : > { %v1398_v13 = vmax.f32 %v1334_v9, 0.0  ;;  %v1232_v17 = vld [vmem:[#allocation2 + $0x10] sm:$0xff]  ;;  %v801_v19 = vpop.f32.mrf.mxu0  ;;  %v961_v20 = vpop.f32.mrf.mxu1  ;;  %v305_v9 = vld [vmem:[#allocation2 + $0x48] sm:$0xff] }
 0x119   : > { %v1264_v18 = vld [vmem:[#allocation2 + $0x110] sm:$0xff]  ;;  %1430 = vst.msk [vmem:[%s2308_s6 + $0x8] sm:$0xff] %vm231_vm2, %v1366_v12  ;;  %v1303_v22 = vadd.f32 %v2298_v47, %v1232_v17  ;;  %1167 = vst.msk [vmem:[#allocation2 + $0x20] sm:$0xff] %vm231_vm2, %v1102_v14  ;;  %v337_v14 = vld [vmem:[#allocation2 + $0x148] sm:$0xff] }
 0x11a   : > { %1462 = vst.msk [vmem:[%s2308_s6 + $0x108] sm:$0xff] %vm231_vm2, %v1398_v13  ;;  %v1335_v23 = vadd.f32 %v2298_v47, %v1264_v18  ;;  %1199 = vst.msk [vmem:[#allocation2 + $0x120] sm:$0xff] %vm231_vm2, %v1134_v15  ;;  %v804_v24 = vpop.f32.mrf.mxu0  ;;  %v964_v25 = vpop.f32.mrf.mxu1 }
 0x11b   : > { %v1367_v26 = vmax.f32 %v1303_v22, 0.0  ;;  %v1103_v28 = vadd.f32 %v804_v24, %v301_v16  ;;  %v1135_v29 = vadd.f32 %v964_v25, %v333_v21 }
 0x11c   : > { %v1399_v27 = vmax.f32 %v1335_v23, 0.0  ;;  %v1233_v31 = vld [vmem:[#allocation2 + $0x18] sm:$0xff]  ;;  %v806_v33 = vpop.f32.mrf.mxu0  ;;  %v966_v34 = vpop.f32.mrf.mxu1  ;;  %v306_v23 = vld [vmem:[#allocation2 + $0x50] sm:$0xff] }
 0x11d   : > { %v1265_v32 = vld [vmem:[#allocation2 + $0x118] sm:$0xff]  ;;  %1431 = vst.msk [vmem:[%s2308_s6 + $0x10] sm:$0xff] %vm231_vm2, %v1367_v26  ;;  %v1304_v36 = vadd.f32 %v2298_v47, %v1233_v31  ;;  %1168 = vst.msk [vmem:[#allocation2 + $0x28] sm:$0xff] %vm231_vm2, %v1103_v28  ;;  %v338_v28 = vld [vmem:[#allocation2 + $0x150] sm:$0xff] }
 0x11e   : > { %1463 = vst.msk [vmem:[%s2308_s6 + $0x110] sm:$0xff] %vm231_vm2, %v1399_v27  ;;  %v1336_v37 = vadd.f32 %v2298_v47, %v1265_v32  ;;  %1200 = vst.msk [vmem:[#allocation2 + $0x128] sm:$0xff] %vm231_vm2, %v1135_v29  ;;  %v809_v38 = vpop.f32.mrf.mxu0  ;;  %v969_v39 = vpop.f32.mrf.mxu1 }
 0x11f   : > { %v1368_v40 = vmax.f32 %v1304_v36, 0.0  ;;  %v1104_v42 = vadd.f32 %v809_v38, %v302_v30  ;;  %v1136_v43 = vadd.f32 %v969_v39, %v334_v35 }
 0x120   : > { %v1400_v41 = vmax.f32 %v1336_v37, 0.0  ;;  %v1234_v45 = vld [vmem:[#allocation2 + $0x20] sm:$0xff]  ;;  %v811_v48 = vpop.f32.mrf.mxu0  ;;  %v971_v49 = vpop.f32.mrf.mxu1  ;;  %v307_v37 = vld [vmem:[#allocation2 + $0x58] sm:$0xff] }
 0x121   : > { %v1266_v46 = vld [vmem:[#allocation2 + $0x120] sm:$0xff]  ;;  %1432 = vst.msk [vmem:[%s2308_s6 + $0x18] sm:$0xff] %vm231_vm2, %v1368_v40  ;;  %v1305_v51 = vadd.f32 %v2298_v47, %v1234_v45  ;;  %1169 = vst.msk [vmem:[#allocation2 + $0x30] sm:$0xff] %vm231_vm2, %v1104_v42  ;;  %v339_v42 = vld [vmem:[#allocation2 + $0x158] sm:$0xff] }
 0x122   : > { %1464 = vst.msk [vmem:[%s2308_s6 + $0x118] sm:$0xff] %vm231_vm2, %v1400_v41  ;;  %v1337_v52 = vadd.f32 %v2298_v47, %v1266_v46  ;;  %1201 = vst.msk [vmem:[#allocation2 + $0x130] sm:$0xff] %vm231_vm2, %v1136_v43  ;;  %v814_v53 = vpop.f32.mrf.mxu0  ;;  %v974_v54 = vpop.f32.mrf.mxu1 }
 0x123   : > { %v1369_v55 = vmax.f32 %v1305_v51, 0.0  ;;  %v1105_v57 = vadd.f32 %v814_v53, %v303_v44  ;;  %v1137_v58 = vadd.f32 %v974_v54, %v335_v50 }
 0x124   : > { %v1401_v56 = vmax.f32 %v1337_v52, 0.0  ;;  %v1235_v60 = vld [vmem:[#allocation2 + $0x28] sm:$0xff]  ;;  %v816_v62 = vpop.f32.mrf.mxu0  ;;  %v976_v63 = vpop.f32.mrf.mxu1  ;;  %v308_v52 = vld [vmem:[#allocation2 + $0x60] sm:$0xff] }
 0x125   : > { %v1267_v61 = vld [vmem:[#allocation2 + $0x128] sm:$0xff]  ;;  %1433 = vst.msk [vmem:[%s2308_s6 + $0x20] sm:$0xff] %vm231_vm2, %v1369_v55  ;;  %v1306_v1 = vadd.f32 %v2298_v47, %v1235_v60  ;;  %1170 = vst.msk [vmem:[#allocation2 + $0x38] sm:$0xff] %vm231_vm2, %v1105_v57  ;;  %v340_v57 = vld [vmem:[#allocation2 + $0x160] sm:$0xff] }
 0x126   : > { %1465 = vst.msk [vmem:[%s2308_s6 + $0x120] sm:$0xff] %vm231_vm2, %v1401_v56  ;;  %v1338_v2 = vadd.f32 %v2298_v47, %v1267_v61  ;;  %1202 = vst.msk [vmem:[#allocation2 + $0x138] sm:$0xff] %vm231_vm2, %v1137_v58  ;;  %v819_v3 = vpop.f32.mrf.mxu0  ;;  %v979_v4 = vpop.f32.mrf.mxu1 }
 0x127   : > { %v1370_v5 = vmax.f32 %v1306_v1, 0.0  ;;  %v1106_v7 = vadd.f32 %v819_v3, %v304_v59  ;;  %v1138_v8 = vadd.f32 %v979_v4, %v336_v0 }
 0x128   : > { %v1402_v6 = vmax.f32 %v1338_v2, 0.0  ;;  %v1236_v10 = vld [vmem:[#allocation2 + $0x30] sm:$0xff]  ;;  %v821_v12 = vpop.f32.mrf.mxu0  ;;  %v981_v13 = vpop.f32.mrf.mxu1  ;;  %v309_v2 = vld [vmem:[#allocation2 + $0x68] sm:$0xff] }
 0x129   : > { %v1268_v11 = vld [vmem:[#allocation2 + $0x130] sm:$0xff]  ;;  %1434 = vst.msk [vmem:[%s2308_s6 + $0x28] sm:$0xff] %vm231_vm2, %v1370_v5  ;;  %v1307_v15 = vadd.f32 %v2298_v47, %v1236_v10  ;;  %1171 = vst.msk [vmem:[#allocation2 + $0x40] sm:$0xff] %vm231_vm2, %v1106_v7  ;;  %v341_v7 = vld [vmem:[#allocation2 + $0x168] sm:$0xff] }
 0x12a   : > { %1466 = vst.msk [vmem:[%s2308_s6 + $0x128] sm:$0xff] %vm231_vm2, %v1402_v6  ;;  %v1339_v16 = vadd.f32 %v2298_v47, %v1268_v11  ;;  %1203 = vst.msk [vmem:[#allocation2 + $0x140] sm:$0xff] %vm231_vm2, %v1138_v8  ;;  %v824_v17 = vpop.f32.mrf.mxu0  ;;  %v984_v18 = vpop.f32.mrf.mxu1 }
 0x12b   : > { %v1371_v19 = vmax.f32 %v1307_v15, 0.0  ;;  %v1107_v21 = vadd.f32 %v824_v17, %v305_v9  ;;  %v1139_v22 = vadd.f32 %v984_v18, %v337_v14 }
 0x12c   : > { %v1403_v20 = vmax.f32 %v1339_v16, 0.0  ;;  %v1237_v24 = vld [vmem:[#allocation2 + $0x38] sm:$0xff]  ;;  %v826_v26 = vpop.f32.mrf.mxu0  ;;  %v986_v27 = vpop.f32.mrf.mxu1  ;;  %v310_v16 = vld [vmem:[#allocation2 + $0x70] sm:$0xff] }
 0x12d   : > { %v1269_v25 = vld [vmem:[#allocation2 + $0x138] sm:$0xff]  ;;  %1435 = vst.msk [vmem:[%s2308_s6 + $0x30] sm:$0xff] %vm231_vm2, %v1371_v19  ;;  %v1308_v29 = vadd.f32 %v2298_v47, %v1237_v24  ;;  %1172 = vst.msk [vmem:[#allocation2 + $0x48] sm:$0xff] %vm231_vm2, %v1107_v21  ;;  %v342_v21 = vld [vmem:[#allocation2 + $0x170] sm:$0xff] }
 0x12e   : > { %1467 = vst.msk [vmem:[%s2308_s6 + $0x130] sm:$0xff] %vm231_vm2, %v1403_v20  ;;  %v1340_v30 = vadd.f32 %v2298_v47, %v1269_v25  ;;  %1204 = vst.msk [vmem:[#allocation2 + $0x148] sm:$0xff] %vm231_vm2, %v1139_v22  ;;  %v829_v31 = vpop.f32.mrf.mxu0  ;;  %v989_v32 = vpop.f32.mrf.mxu1 }
 0x12f   : > { %v1372_v33 = vmax.f32 %v1308_v29, 0.0  ;;  %v1108_v35 = vadd.f32 %v829_v31, %v306_v23  ;;  %v1140_v36 = vadd.f32 %v989_v32, %v338_v28 }
 0x130   : > { %v1404_v34 = vmax.f32 %v1340_v30, 0.0  ;;  %v1238_v38 = vld [vmem:[#allocation2 + $0x40] sm:$0xff]  ;;  %v831_v40 = vpop.f32.mrf.mxu0  ;;  %v991_v41 = vpop.f32.mrf.mxu1  ;;  %v311_v30 = vld [vmem:[#allocation2 + $0x78] sm:$0xff] }
 0x131   : > { %v1270_v39 = vld [vmem:[#allocation2 + $0x140] sm:$0xff]  ;;  %1436 = vst.msk [vmem:[%s2308_s6 + $0x38] sm:$0xff] %vm231_vm2, %v1372_v33  ;;  %v1309_v43 = vadd.f32 %v2298_v47, %v1238_v38  ;;  %1173 = vst.msk [vmem:[#allocation2 + $0x50] sm:$0xff] %vm231_vm2, %v1108_v35  ;;  %v343_v35 = vld [vmem:[#allocation2 + $0x178] sm:$0xff] }
 0x132   : > { %1468 = vst.msk [vmem:[%s2308_s6 + $0x138] sm:$0xff] %vm231_vm2, %v1404_v34  ;;  %v1341_v44 = vadd.f32 %v2298_v47, %v1270_v39  ;;  %1205 = vst.msk [vmem:[#allocation2 + $0x150] sm:$0xff] %vm231_vm2, %v1140_v36  ;;  %v834_v45 = vpop.f32.mrf.mxu0  ;;  %v994_v46 = vpop.f32.mrf.mxu1 }
 0x133   : > { %v1373_v48 = vmax.f32 %v1309_v43, 0.0  ;;  %v1109_v50 = vadd.f32 %v834_v45, %v307_v37  ;;  %v1141_v51 = vadd.f32 %v994_v46, %v339_v42 }
 0x134   : > { %v1405_v49 = vmax.f32 %v1341_v44, 0.0  ;;  %v1239_v53 = vld [vmem:[#allocation2 + $0x48] sm:$0xff]  ;;  %v836_v55 = vpop.f32.mrf.mxu0  ;;  %v996_v56 = vpop.f32.mrf.mxu1  ;;  %v312_v44 = vld [vmem:[#allocation2 + $0x80] sm:$0xff] }
 0x135   : > { %v1271_v54 = vld [vmem:[#allocation2 + $0x148] sm:$0xff]  ;;  %1437 = vst.msk [vmem:[%s2308_s6 + $0x40] sm:$0xff] %vm231_vm2, %v1373_v48  ;;  %v1310_v58 = vadd.f32 %v2298_v47, %v1239_v53  ;;  %1174 = vst.msk [vmem:[#allocation2 + $0x58] sm:$0xff] %vm231_vm2, %v1109_v50  ;;  %v344_v50 = vld [vmem:[#allocation2 + $0x180] sm:$0xff] }
 0x136   : > { %1469 = vst.msk [vmem:[%s2308_s6 + $0x140] sm:$0xff] %vm231_vm2, %v1405_v49  ;;  %v1342_v59 = vadd.f32 %v2298_v47, %v1271_v54  ;;  %1206 = vst.msk [vmem:[#allocation2 + $0x158] sm:$0xff] %vm231_vm2, %v1141_v51  ;;  %v839_v60 = vpop.f32.mrf.mxu0  ;;  %v999_v61 = vpop.f32.mrf.mxu1 }
 0x137   : > { %v1374_v62 = vmax.f32 %v1310_v58, 0.0  ;;  %v1110_v0 = vadd.f32 %v839_v60, %v308_v52  ;;  %v1142_v1 = vadd.f32 %v999_v61, %v340_v57 }
 0x138   : > { %v1406_v63 = vmax.f32 %v1342_v59, 0.0  ;;  %v1240_v3 = vld [vmem:[#allocation2 + $0x50] sm:$0xff]  ;;  %v841_v5 = vpop.f32.mrf.mxu0  ;;  %v1001_v6 = vpop.f32.mrf.mxu1  ;;  %v313_v59 = vld [vmem:[#allocation2 + $0x88] sm:$0xff] }
 0x139   : > { %v1272_v4 = vld [vmem:[#allocation2 + $0x150] sm:$0xff]  ;;  %1438 = vst.msk [vmem:[%s2308_s6 + $0x48] sm:$0xff] %vm231_vm2, %v1374_v62  ;;  %v1311_v8 = vadd.f32 %v2298_v47, %v1240_v3  ;;  %1175 = vst.msk [vmem:[#allocation2 + $0x60] sm:$0xff] %vm231_vm2, %v1110_v0  ;;  %v345_v0 = vld [vmem:[#allocation2 + $0x188] sm:$0xff] }
 0x13a   : > { %1470 = vst.msk [vmem:[%s2308_s6 + $0x148] sm:$0xff] %vm231_vm2, %v1406_v63  ;;  %v1343_v9 = vadd.f32 %v2298_v47, %v1272_v4  ;;  %1207 = vst.msk [vmem:[#allocation2 + $0x160] sm:$0xff] %vm231_vm2, %v1142_v1  ;;  %v844_v10 = vpop.f32.mrf.mxu0  ;;  %v1004_v11 = vpop.f32.mrf.mxu1 }
 0x13b   : > { %v1375_v12 = vmax.f32 %v1311_v8, 0.0  ;;  %v1111_v14 = vadd.f32 %v844_v10, %v309_v2  ;;  %v1143_v15 = vadd.f32 %v1004_v11, %v341_v7 }
 0x13c   : > { %v1407_v13 = vmax.f32 %v1343_v9, 0.0  ;;  %v1241_v17 = vld [vmem:[#allocation2 + $0x58] sm:$0xff]  ;;  %v846_v19 = vpop.f32.mrf.mxu0  ;;  %v1006_v20 = vpop.f32.mrf.mxu1  ;;  %v314_v9 = vld [vmem:[#allocation2 + $0x90] sm:$0xff] }
 0x13d   : > { %v1273_v18 = vld [vmem:[#allocation2 + $0x158] sm:$0xff]  ;;  %1439 = vst.msk [vmem:[%s2308_s6 + $0x50] sm:$0xff] %vm231_vm2, %v1375_v12  ;;  %v1312_v22 = vadd.f32 %v2298_v47, %v1241_v17  ;;  %1176 = vst.msk [vmem:[#allocation2 + $0x68] sm:$0xff] %vm231_vm2, %v1111_v14  ;;  %v346_v14 = vld [vmem:[#allocation2 + $0x190] sm:$0xff] }
 0x13e   : > { %1471 = vst.msk [vmem:[%s2308_s6 + $0x150] sm:$0xff] %vm231_vm2, %v1407_v13  ;;  %v1344_v23 = vadd.f32 %v2298_v47, %v1273_v18  ;;  %1208 = vst.msk [vmem:[#allocation2 + $0x168] sm:$0xff] %vm231_vm2, %v1143_v15  ;;  %v849_v24 = vpop.f32.mrf.mxu0  ;;  %v1009_v25 = vpop.f32.mrf.mxu1 }
 0x13f   : > { %v1376_v26 = vmax.f32 %v1312_v22, 0.0  ;;  %v1112_v28 = vadd.f32 %v849_v24, %v310_v16  ;;  %v1144_v29 = vadd.f32 %v1009_v25, %v342_v21 }
 0x140   : > { %v1408_v27 = vmax.f32 %v1344_v23, 0.0  ;;  %v1242_v31 = vld [vmem:[#allocation2 + $0x60] sm:$0xff]  ;;  %v851_v33 = vpop.f32.mrf.mxu0  ;;  %v1011_v34 = vpop.f32.mrf.mxu1  ;;  %v315_v23 = vld [vmem:[#allocation2 + $0x98] sm:$0xff] }
 0x141   : > { %v1274_v32 = vld [vmem:[#allocation2 + $0x160] sm:$0xff]  ;;  %1440 = vst.msk [vmem:[%s2308_s6 + $0x58] sm:$0xff] %vm231_vm2, %v1376_v26  ;;  %v1313_v36 = vadd.f32 %v2298_v47, %v1242_v31  ;;  %1177 = vst.msk [vmem:[#allocation2 + $0x70] sm:$0xff] %vm231_vm2, %v1112_v28  ;;  %v347_v28 = vld [vmem:[#allocation2 + $0x198] sm:$0xff] }
 0x142   : > { %1472 = vst.msk [vmem:[%s2308_s6 + $0x158] sm:$0xff] %vm231_vm2, %v1408_v27  ;;  %v1345_v37 = vadd.f32 %v2298_v47, %v1274_v32  ;;  %1209 = vst.msk [vmem:[#allocation2 + $0x170] sm:$0xff] %vm231_vm2, %v1144_v29  ;;  %v854_v38 = vpop.f32.mrf.mxu0  ;;  %v1014_v39 = vpop.f32.mrf.mxu1 }
 0x143   : > { %v1377_v40 = vmax.f32 %v1313_v36, 0.0  ;;  %v1113_v42 = vadd.f32 %v854_v38, %v311_v30  ;;  %v1145_v43 = vadd.f32 %v1014_v39, %v343_v35 }
 0x144   : > { %v1409_v41 = vmax.f32 %v1345_v37, 0.0  ;;  %v1243_v45 = vld [vmem:[#allocation2 + $0x68] sm:$0xff]  ;;  %v856_v48 = vpop.f32.mrf.mxu0  ;;  %v1016_v49 = vpop.f32.mrf.mxu1  ;;  %v316_v37 = vld [vmem:[#allocation2 + $0xa0] sm:$0xff] }
 0x145   : > { %v1275_v46 = vld [vmem:[#allocation2 + $0x168] sm:$0xff]  ;;  %1441 = vst.msk [vmem:[%s2308_s6 + $0x60] sm:$0xff] %vm231_vm2, %v1377_v40  ;;  %v1314_v51 = vadd.f32 %v2298_v47, %v1243_v45  ;;  %1178 = vst.msk [vmem:[#allocation2 + $0x78] sm:$0xff] %vm231_vm2, %v1113_v42  ;;  %v348_v42 = vld [vmem:[#allocation2 + $0x1a0] sm:$0xff] }
 0x146   : > { %1473 = vst.msk [vmem:[%s2308_s6 + $0x160] sm:$0xff] %vm231_vm2, %v1409_v41  ;;  %v1346_v52 = vadd.f32 %v2298_v47, %v1275_v46  ;;  %1210 = vst.msk [vmem:[#allocation2 + $0x178] sm:$0xff] %vm231_vm2, %v1145_v43  ;;  %v859_v53 = vpop.f32.mrf.mxu0  ;;  %v1019_v54 = vpop.f32.mrf.mxu1 }
 0x147   : > { %v1378_v55 = vmax.f32 %v1314_v51, 0.0  ;;  %v1114_v57 = vadd.f32 %v859_v53, %v312_v44  ;;  %v1146_v58 = vadd.f32 %v1019_v54, %v344_v50 }
 0x148   : > { %v1410_v56 = vmax.f32 %v1346_v52, 0.0  ;;  %v1244_v60 = vld [vmem:[#allocation2 + $0x70] sm:$0xff]  ;;  %v861_v62 = vpop.f32.mrf.mxu0  ;;  %v1021_v63 = vpop.f32.mrf.mxu1  ;;  %v317_v52 = vld [vmem:[#allocation2 + $0xa8] sm:$0xff] }
 0x149   : > { %v1276_v61 = vld [vmem:[#allocation2 + $0x170] sm:$0xff]  ;;  %1442 = vst.msk [vmem:[%s2308_s6 + $0x68] sm:$0xff] %vm231_vm2, %v1378_v55  ;;  %v1315_v1 = vadd.f32 %v2298_v47, %v1244_v60  ;;  %1179 = vst.msk [vmem:[#allocation2 + $0x80] sm:$0xff] %vm231_vm2, %v1114_v57  ;;  %v349_v57 = vld [vmem:[#allocation2 + $0x1a8] sm:$0xff] }
 0x14a   : > { %1474 = vst.msk [vmem:[%s2308_s6 + $0x168] sm:$0xff] %vm231_vm2, %v1410_v56  ;;  %v1347_v2 = vadd.f32 %v2298_v47, %v1276_v61  ;;  %1211 = vst.msk [vmem:[#allocation2 + $0x180] sm:$0xff] %vm231_vm2, %v1146_v58  ;;  %v864_v3 = vpop.f32.mrf.mxu0  ;;  %v1024_v4 = vpop.f32.mrf.mxu1 }
 0x14b   : > { %v1379_v5 = vmax.f32 %v1315_v1, 0.0  ;;  %v1115_v7 = vadd.f32 %v864_v3, %v313_v59  ;;  %v1147_v8 = vadd.f32 %v1024_v4, %v345_v0 }
 0x14c   : > { %v1411_v6 = vmax.f32 %v1347_v2, 0.0  ;;  %v1245_v10 = vld [vmem:[#allocation2 + $0x78] sm:$0xff]  ;;  %v866_v12 = vpop.f32.mrf.mxu0  ;;  %v1026_v13 = vpop.f32.mrf.mxu1  ;;  %v318_v2 = vld [vmem:[#allocation2 + $0xb0] sm:$0xff] }
 0x14d   : > { %v1277_v11 = vld [vmem:[#allocation2 + $0x178] sm:$0xff]  ;;  %1443 = vst.msk [vmem:[%s2308_s6 + $0x70] sm:$0xff] %vm231_vm2, %v1379_v5  ;;  %v1316_v15 = vadd.f32 %v2298_v47, %v1245_v10  ;;  %1180 = vst.msk [vmem:[#allocation2 + $0x88] sm:$0xff] %vm231_vm2, %v1115_v7  ;;  %v350_v7 = vld [vmem:[#allocation2 + $0x1b0] sm:$0xff] }
 0x14e   : > { %1475 = vst.msk [vmem:[%s2308_s6 + $0x170] sm:$0xff] %vm231_vm2, %v1411_v6  ;;  %v1348_v16 = vadd.f32 %v2298_v47, %v1277_v11  ;;  %1212 = vst.msk [vmem:[#allocation2 + $0x188] sm:$0xff] %vm231_vm2, %v1147_v8  ;;  %v869_v17 = vpop.f32.mrf.mxu0  ;;  %v1029_v18 = vpop.f32.mrf.mxu1 }
 0x14f   : > { %v1380_v19 = vmax.f32 %v1316_v15, 0.0  ;;  %v1116_v21 = vadd.f32 %v869_v17, %v314_v9  ;;  %v1148_v22 = vadd.f32 %v1029_v18, %v346_v14 }
 0x150   : > { %v1412_v20 = vmax.f32 %v1348_v16, 0.0  ;;  %v1246_v24 = vld [vmem:[#allocation2 + $0x80] sm:$0xff]  ;;  %v871_v26 = vpop.f32.mrf.mxu0  ;;  %v1031_v27 = vpop.f32.mrf.mxu1  ;;  %v319_v16 = vld [vmem:[#allocation2 + $0xb8] sm:$0xff] }
 0x151   : > { %v1278_v25 = vld [vmem:[#allocation2 + $0x180] sm:$0xff]  ;;  %1444 = vst.msk [vmem:[%s2308_s6 + $0x78] sm:$0xff] %vm231_vm2, %v1380_v19  ;;  %v1317_v29 = vadd.f32 %v2298_v47, %v1246_v24  ;;  %1181 = vst.msk [vmem:[#allocation2 + $0x90] sm:$0xff] %vm231_vm2, %v1116_v21  ;;  %v351_v21 = vld [vmem:[#allocation2 + $0x1b8] sm:$0xff] }
 0x152   : > { %1476 = vst.msk [vmem:[%s2308_s6 + $0x178] sm:$0xff] %vm231_vm2, %v1412_v20  ;;  %v1349_v30 = vadd.f32 %v2298_v47, %v1278_v25  ;;  %1213 = vst.msk [vmem:[#allocation2 + $0x190] sm:$0xff] %vm231_vm2, %v1148_v22  ;;  %v874_v31 = vpop.f32.mrf.mxu0  ;;  %v1034_v32 = vpop.f32.mrf.mxu1 }
 0x153   : > { %v1381_v33 = vmax.f32 %v1317_v29, 0.0  ;;  %v1117_v35 = vadd.f32 %v874_v31, %v315_v23  ;;  %v1149_v36 = vadd.f32 %v1034_v32, %v347_v28 }
 0x154   : > { %v1413_v34 = vmax.f32 %v1349_v30, 0.0  ;;  %v1247_v38 = vld [vmem:[#allocation2 + $0x88] sm:$0xff]  ;;  %v876_v40 = vpop.f32.mrf.mxu0  ;;  %v1036_v41 = vpop.f32.mrf.mxu1  ;;  %v320_v30 = vld [vmem:[#allocation2 + $0xc0] sm:$0xff] }
 0x155   : > { %v1279_v39 = vld [vmem:[#allocation2 + $0x188] sm:$0xff]  ;;  %1445 = vst.msk [vmem:[%s2308_s6 + $0x80] sm:$0xff] %vm231_vm2, %v1381_v33  ;;  %v1318_v43 = vadd.f32 %v2298_v47, %v1247_v38  ;;  %1182 = vst.msk [vmem:[#allocation2 + $0x98] sm:$0xff] %vm231_vm2, %v1117_v35  ;;  %v352_v35 = vld [vmem:[#allocation2 + $0x1c0] sm:$0xff] }
 0x156   : > { %1477 = vst.msk [vmem:[%s2308_s6 + $0x180] sm:$0xff] %vm231_vm2, %v1413_v34  ;;  %v1350_v44 = vadd.f32 %v2298_v47, %v1279_v39  ;;  %1214 = vst.msk [vmem:[#allocation2 + $0x198] sm:$0xff] %vm231_vm2, %v1149_v36  ;;  %v879_v45 = vpop.f32.mrf.mxu0  ;;  %v1039_v46 = vpop.f32.mrf.mxu1 }
 0x157   : > { %v1382_v48 = vmax.f32 %v1318_v43, 0.0  ;;  %v1118_v50 = vadd.f32 %v879_v45, %v316_v37  ;;  %v1150_v51 = vadd.f32 %v1039_v46, %v348_v42 }
 0x158   : > { %v1414_v49 = vmax.f32 %v1350_v44, 0.0  ;;  %v1248_v53 = vld [vmem:[#allocation2 + $0x90] sm:$0xff]  ;;  %v881_v55 = vpop.f32.mrf.mxu0  ;;  %v1041_v56 = vpop.f32.mrf.mxu1  ;;  %v321_v44 = vld [vmem:[#allocation2 + $0xc8] sm:$0xff] }
 0x159   : > { %v1280_v54 = vld [vmem:[#allocation2 + $0x190] sm:$0xff]  ;;  %1446 = vst.msk [vmem:[%s2308_s6 + $0x88] sm:$0xff] %vm231_vm2, %v1382_v48  ;;  %v1319_v58 = vadd.f32 %v2298_v47, %v1248_v53  ;;  %1183 = vst.msk [vmem:[#allocation2 + $0xa0] sm:$0xff] %vm231_vm2, %v1118_v50  ;;  %v353_v50 = vld [vmem:[#allocation2 + $0x1c8] sm:$0xff] }
 0x15a   : > { %1478 = vst.msk [vmem:[%s2308_s6 + $0x188] sm:$0xff] %vm231_vm2, %v1414_v49  ;;  %v1351_v59 = vadd.f32 %v2298_v47, %v1280_v54  ;;  %1215 = vst.msk [vmem:[#allocation2 + $0x1a0] sm:$0xff] %vm231_vm2, %v1150_v51  ;;  %v884_v60 = vpop.f32.mrf.mxu0  ;;  %v1044_v61 = vpop.f32.mrf.mxu1 }
 0x15b   : > { %v1383_v62 = vmax.f32 %v1319_v58, 0.0  ;;  %v1119_v0 = vadd.f32 %v884_v60, %v317_v52  ;;  %v1151_v1 = vadd.f32 %v1044_v61, %v349_v57 }
 0x15c   : > { %v1415_v63 = vmax.f32 %v1351_v59, 0.0  ;;  %v1249_v3 = vld [vmem:[#allocation2 + $0x98] sm:$0xff]  ;;  %v886_v5 = vpop.f32.mrf.mxu0  ;;  %v1046_v6 = vpop.f32.mrf.mxu1  ;;  %v322_v59 = vld [vmem:[#allocation2 + $0xd0] sm:$0xff] }
 0x15d   : > { %v1281_v4 = vld [vmem:[#allocation2 + $0x198] sm:$0xff]  ;;  %1447 = vst.msk [vmem:[%s2308_s6 + $0x90] sm:$0xff] %vm231_vm2, %v1383_v62  ;;  %v1320_v8 = vadd.f32 %v2298_v47, %v1249_v3  ;;  %1184 = vst.msk [vmem:[#allocation2 + $0xa8] sm:$0xff] %vm231_vm2, %v1119_v0  ;;  %v354_v0 = vld [vmem:[#allocation2 + $0x1d0] sm:$0xff] }
 0x15e   : > { %1479 = vst.msk [vmem:[%s2308_s6 + $0x190] sm:$0xff] %vm231_vm2, %v1415_v63  ;;  %v1352_v9 = vadd.f32 %v2298_v47, %v1281_v4  ;;  %1216 = vst.msk [vmem:[#allocation2 + $0x1a8] sm:$0xff] %vm231_vm2, %v1151_v1  ;;  %v889_v10 = vpop.f32.mrf.mxu0  ;;  %v1049_v11 = vpop.f32.mrf.mxu1 }
 0x15f   : > { %v1384_v12 = vmax.f32 %v1320_v8, 0.0  ;;  %v1120_v14 = vadd.f32 %v889_v10, %v318_v2  ;;  %v1152_v15 = vadd.f32 %v1049_v11, %v350_v7 }
 0x160   : > { %v1416_v13 = vmax.f32 %v1352_v9, 0.0  ;;  %v1250_v17 = vld [vmem:[#allocation2 + $0xa0] sm:$0xff]  ;;  %v891_v19 = vpop.f32.mrf.mxu0  ;;  %v1051_v20 = vpop.f32.mrf.mxu1  ;;  %v323_v9 = vld [vmem:[#allocation2 + $0xd8] sm:$0xff] }
 0x161   : > { %v1282_v18 = vld [vmem:[#allocation2 + $0x1a0] sm:$0xff]  ;;  %1448 = vst.msk [vmem:[%s2308_s6 + $0x98] sm:$0xff] %vm231_vm2, %v1384_v12  ;;  %v1321_v22 = vadd.f32 %v2298_v47, %v1250_v17  ;;  %1185 = vst.msk [vmem:[#allocation2 + $0xb0] sm:$0xff] %vm231_vm2, %v1120_v14  ;;  %v355_v14 = vld [vmem:[#allocation2 + $0x1d8] sm:$0xff] }
 0x162   : > { %1480 = vst.msk [vmem:[%s2308_s6 + $0x198] sm:$0xff] %vm231_vm2, %v1416_v13  ;;  %v1353_v23 = vadd.f32 %v2298_v47, %v1282_v18  ;;  %1217 = vst.msk [vmem:[#allocation2 + $0x1b0] sm:$0xff] %vm231_vm2, %v1152_v15  ;;  %v894_v24 = vpop.f32.mrf.mxu0  ;;  %v1054_v25 = vpop.f32.mrf.mxu1 }
 0x163   : > { %v1385_v26 = vmax.f32 %v1321_v22, 0.0  ;;  %v1121_v28 = vadd.f32 %v894_v24, %v319_v16  ;;  %v1153_v29 = vadd.f32 %v1054_v25, %v351_v21 }
 0x164   : > { %v1417_v27 = vmax.f32 %v1353_v23, 0.0  ;;  %v1251_v31 = vld [vmem:[#allocation2 + $0xa8] sm:$0xff]  ;;  %v896_v33 = vpop.f32.mrf.mxu0  ;;  %v1056_v34 = vpop.f32.mrf.mxu1  ;;  %v324_v23 = vld [vmem:[#allocation2 + $0xe0] sm:$0xff] }
 0x165   : > { %v1283_v32 = vld [vmem:[#allocation2 + $0x1a8] sm:$0xff]  ;;  %1449 = vst.msk [vmem:[%s2308_s6 + $0xa0] sm:$0xff] %vm231_vm2, %v1385_v26  ;;  %v1322_v36 = vadd.f32 %v2298_v47, %v1251_v31  ;;  %1186 = vst.msk [vmem:[#allocation2 + $0xb8] sm:$0xff] %vm231_vm2, %v1121_v28  ;;  %v356_v28 = vld [vmem:[#allocation2 + $0x1e0] sm:$0xff] }
 0x166   : > { %1481 = vst.msk [vmem:[%s2308_s6 + $0x1a0] sm:$0xff] %vm231_vm2, %v1417_v27  ;;  %v1354_v37 = vadd.f32 %v2298_v47, %v1283_v32  ;;  %1218 = vst.msk [vmem:[#allocation2 + $0x1b8] sm:$0xff] %vm231_vm2, %v1153_v29  ;;  %v899_v38 = vpop.f32.mrf.mxu0  ;;  %v1059_v39 = vpop.f32.mrf.mxu1 }
 0x167   : > { %v1386_v40 = vmax.f32 %v1322_v36, 0.0  ;;  %v1122_v42 = vadd.f32 %v899_v38, %v320_v30  ;;  %v1154_v43 = vadd.f32 %v1059_v39, %v352_v35 }
 0x168   : > { %v1418_v41 = vmax.f32 %v1354_v37, 0.0  ;;  %v1252_v45 = vld [vmem:[#allocation2 + $0xb0] sm:$0xff]  ;;  %v901_v48 = vpop.f32.mrf.mxu0  ;;  %v1061_v49 = vpop.f32.mrf.mxu1  ;;  %v325_v37 = vld [vmem:[#allocation2 + $0xe8] sm:$0xff] }
 0x169   : > { %v1284_v46 = vld [vmem:[#allocation2 + $0x1b0] sm:$0xff]  ;;  %1450 = vst.msk [vmem:[%s2308_s6 + $0xa8] sm:$0xff] %vm231_vm2, %v1386_v40  ;;  %v1323_v51 = vadd.f32 %v2298_v47, %v1252_v45  ;;  %1187 = vst.msk [vmem:[#allocation2 + $0xc0] sm:$0xff] %vm231_vm2, %v1122_v42  ;;  %v357_v42 = vld [vmem:[#allocation2 + $0x1e8] sm:$0xff] }
 0x16a   : > { %1482 = vst.msk [vmem:[%s2308_s6 + $0x1a8] sm:$0xff] %vm231_vm2, %v1418_v41  ;;  %v1355_v52 = vadd.f32 %v2298_v47, %v1284_v46  ;;  %1219 = vst.msk [vmem:[#allocation2 + $0x1c0] sm:$0xff] %vm231_vm2, %v1154_v43  ;;  %v904_v53 = vpop.f32.mrf.mxu0  ;;  %v1064_v54 = vpop.f32.mrf.mxu1 }
 0x16b   : > { %v1387_v55 = vmax.f32 %v1323_v51, 0.0  ;;  %v1123_v57 = vadd.f32 %v904_v53, %v321_v44  ;;  %v1155_v58 = vadd.f32 %v1064_v54, %v353_v50 }
 0x16c   : > { %v1419_v56 = vmax.f32 %v1355_v52, 0.0  ;;  %v1253_v60 = vld [vmem:[#allocation2 + $0xb8] sm:$0xff]  ;;  %v906_v62 = vpop.f32.mrf.mxu0  ;;  %v1066_v63 = vpop.f32.mrf.mxu1  ;;  %v326_v52 = vld [vmem:[#allocation2 + $0xf0] sm:$0xff] }
 0x16d   : > { %v1285_v61 = vld [vmem:[#allocation2 + $0x1b8] sm:$0xff]  ;;  %1451 = vst.msk [vmem:[%s2308_s6 + $0xb0] sm:$0xff] %vm231_vm2, %v1387_v55  ;;  %v1324_v1 = vadd.f32 %v2298_v47, %v1253_v60  ;;  %1188 = vst.msk [vmem:[#allocation2 + $0xc8] sm:$0xff] %vm231_vm2, %v1123_v57  ;;  %v358_v57 = vld [vmem:[#allocation2 + $0x1f0] sm:$0xff] }
 0x16e   : > { %1483 = vst.msk [vmem:[%s2308_s6 + $0x1b0] sm:$0xff] %vm231_vm2, %v1419_v56  ;;  %v1356_v2 = vadd.f32 %v2298_v47, %v1285_v61  ;;  %1220 = vst.msk [vmem:[#allocation2 + $0x1c8] sm:$0xff] %vm231_vm2, %v1155_v58  ;;  %v909_v3 = vpop.f32.mrf.mxu0  ;;  %v1069_v4 = vpop.f32.mrf.mxu1 }
 0x16f   : > { %v1388_v5 = vmax.f32 %v1324_v1, 0.0  ;;  %v1124_v7 = vadd.f32 %v909_v3, %v322_v59  ;;  %v1156_v8 = vadd.f32 %v1069_v4, %v354_v0 }
 0x170   : > { %v1420_v6 = vmax.f32 %v1356_v2, 0.0  ;;  %v1254_v10 = vld [vmem:[#allocation2 + $0xc0] sm:$0xff]  ;;  %v911_v12 = vpop.f32.mrf.mxu0  ;;  %v1071_v13 = vpop.f32.mrf.mxu1  ;;  %v327_v2 = vld [vmem:[#allocation2 + $0xf8] sm:$0xff] }
 0x171   : > { %v1286_v11 = vld [vmem:[#allocation2 + $0x1c0] sm:$0xff]  ;;  %1452 = vst.msk [vmem:[%s2308_s6 + $0xb8] sm:$0xff] %vm231_vm2, %v1388_v5  ;;  %v1325_v15 = vadd.f32 %v2298_v47, %v1254_v10  ;;  %1189 = vst.msk [vmem:[#allocation2 + $0xd0] sm:$0xff] %vm231_vm2, %v1124_v7  ;;  %v359_v7 = vld [vmem:[#allocation2 + $0x1f8] sm:$0xff] }
 0x172   : > { %1484 = vst.msk [vmem:[%s2308_s6 + $0x1b8] sm:$0xff] %vm231_vm2, %v1420_v6  ;;  %v1357_v16 = vadd.f32 %v2298_v47, %v1286_v11  ;;  %1221 = vst.msk [vmem:[#allocation2 + $0x1d0] sm:$0xff] %vm231_vm2, %v1156_v8  ;;  %v914_v17 = vpop.f32.mrf.mxu0  ;;  %v1074_v18 = vpop.f32.mrf.mxu1 }
 0x173   : > { %v1389_v19 = vmax.f32 %v1325_v15, 0.0  ;;  %v1125_v21 = vadd.f32 %v914_v17, %v323_v9  ;;  %v1157_v22 = vadd.f32 %v1074_v18, %v355_v14 }
 0x174   : > { %v1421_v20 = vmax.f32 %v1357_v16, 0.0  ;;  %v1255_v24 = vld [vmem:[#allocation2 + $0xc8] sm:$0xff]  ;;  %v916_v26 = vpop.f32.mrf.mxu0  ;;  %v1076_v27 = vpop.f32.mrf.mxu1 }
 0x175   : > { %v1287_v25 = vld [vmem:[#allocation2 + $0x1c8] sm:$0xff]  ;;  %1453 = vst.msk [vmem:[%s2308_s6 + $0xc0] sm:$0xff] %vm231_vm2, %v1389_v19  ;;  %v1326_v29 = vadd.f32 %v2298_v47, %v1255_v24  ;;  %1190 = vst.msk [vmem:[#allocation2 + $0xd8] sm:$0xff] %vm231_vm2, %v1125_v21 }
 0x176   : > { %1485 = vst.msk [vmem:[%s2308_s6 + $0x1c0] sm:$0xff] %vm231_vm2, %v1421_v20  ;;  %v1358_v30 = vadd.f32 %v2298_v47, %v1287_v25  ;;  %1222 = vst.msk [vmem:[#allocation2 + $0x1d8] sm:$0xff] %vm231_vm2, %v1157_v22  ;;  %v919_v31 = vpop.f32.mrf.mxu0  ;;  %v1079_v32 = vpop.f32.mrf.mxu1 }
 0x177   : > { %v1390_v33 = vmax.f32 %v1326_v29, 0.0  ;;  %v1126_v35 = vadd.f32 %v919_v31, %v324_v23  ;;  %v1158_v36 = vadd.f32 %v1079_v32, %v356_v28 }
 0x178   : > { %v1422_v34 = vmax.f32 %v1358_v30, 0.0  ;;  %v1256_v38 = vld [vmem:[#allocation2 + $0xd0] sm:$0xff]  ;;  %v921_v40 = vpop.f32.mrf.mxu0  ;;  %v1081_v41 = vpop.f32.mrf.mxu1 }
 0x179   : > { %v1288_v39 = vld [vmem:[#allocation2 + $0x1d0] sm:$0xff]  ;;  %1454 = vst.msk [vmem:[%s2308_s6 + $0xc8] sm:$0xff] %vm231_vm2, %v1390_v33  ;;  %v1327_v43 = vadd.f32 %v2298_v47, %v1256_v38  ;;  %1191 = vst.msk [vmem:[#allocation2 + $0xe0] sm:$0xff] %vm231_vm2, %v1126_v35 }
 0x17a   : > { %1486 = vst.msk [vmem:[%s2308_s6 + $0x1c8] sm:$0xff] %vm231_vm2, %v1422_v34  ;;  %v1359_v44 = vadd.f32 %v2298_v47, %v1288_v39  ;;  %1223 = vst.msk [vmem:[#allocation2 + $0x1e0] sm:$0xff] %vm231_vm2, %v1158_v36  ;;  %v924_v45 = vpop.f32.mrf.mxu0  ;;  %v1084_v46 = vpop.f32.mrf.mxu1 }
 0x17b   : > { %v1391_v48 = vmax.f32 %v1327_v43, 0.0  ;;  %v1127_v50 = vadd.f32 %v924_v45, %v325_v37  ;;  %v1159_v51 = vadd.f32 %v1084_v46, %v357_v42 }
 0x17c   : > { %v1423_v49 = vmax.f32 %v1359_v44, 0.0  ;;  %v1257_v53 = vld [vmem:[#allocation2 + $0xd8] sm:$0xff]  ;;  %v926_v55 = vpop.f32.mrf.mxu0  ;;  %v1086_v56 = vpop.f32.mrf.mxu1 }
 0x17d   : > { %v1289_v54 = vld [vmem:[#allocation2 + $0x1d8] sm:$0xff]  ;;  %1455 = vst.msk [vmem:[%s2308_s6 + $0xd0] sm:$0xff] %vm231_vm2, %v1391_v48  ;;  %v1328_v58 = vadd.f32 %v2298_v47, %v1257_v53  ;;  %1192 = vst.msk [vmem:[#allocation2 + $0xe8] sm:$0xff] %vm231_vm2, %v1127_v50 }
 0x17e   : > { %1487 = vst.msk [vmem:[%s2308_s6 + $0x1d0] sm:$0xff] %vm231_vm2, %v1423_v49  ;;  %v1360_v59 = vadd.f32 %v2298_v47, %v1289_v54  ;;  %1224 = vst.msk [vmem:[#allocation2 + $0x1e8] sm:$0xff] %vm231_vm2, %v1159_v51  ;;  %v929_v60 = vpop.f32.mrf.mxu0  ;;  %v1089_v61 = vpop.f32.mrf.mxu1  ;;  %v1740_v47 = vld [vmem:[%s2564_s2] ss:$0 sm:$0xff] }
 0x17f   : > { %v1392_v62 = vmax.f32 %v1328_v58, 0.0  ;;  %v1128_v0 = vadd.f32 %v929_v60, %v326_v52  ;;  %v1160_v1 = vadd.f32 %v1089_v61, %v358_v57 }
 0x180   : > { %v1424_v63 = vmax.f32 %v1360_v59, 0.0  ;;  %v1258_v3 = vld [vmem:[#allocation2 + $0xe0] sm:$0xff]  ;;  %v931_v5 = vpop.f32.mrf.mxu0  ;;  %v1091_v6 = vpop.f32.mrf.mxu1 }
 0x181   : > { %v1290_v4 = vld [vmem:[#allocation2 + $0x1e0] sm:$0xff]  ;;  %1456 = vst.msk [vmem:[%s2308_s6 + $0xd8] sm:$0xff] %vm231_vm2, %v1392_v62  ;;  %v1329_v8 = vadd.f32 %v1740_v47, %v1258_v3  ;;  %1193 = vst.msk [vmem:[#allocation2 + $0xf0] sm:$0xff] %vm231_vm2, %v1128_v0 }
 0x182   : > { %1488 = vst.msk [vmem:[%s2308_s6 + $0x1d8] sm:$0xff] %vm231_vm2, %v1424_v63  ;;  %v1361_v9 = vadd.f32 %v1740_v47, %v1290_v4  ;;  %1225 = vst.msk [vmem:[#allocation2 + $0x1f0] sm:$0xff] %vm231_vm2, %v1160_v1  ;;  %v934_v10 = vpop.f32.mrf.mxu0  ;;  %v1094_v11 = vpop.f32.mrf.mxu1 }
 0x183   : > { %v1393_v12 = vmax.f32 %v1329_v8, 0.0  ;;  %v1129_v14 = vadd.f32 %v934_v10, %v327_v2  ;;  %v1161_v15 = vadd.f32 %v1094_v11, %v359_v7 }
 0x184   : > { %v1425_v13 = vmax.f32 %v1361_v9, 0.0  ;;  %v1259_v16 = vld [vmem:[#allocation2 + $0xe8] sm:$0xff]  ;;  %v936_v18 = vpop.f32.mrf.mxu0  ;;  %v1096_v19 = vpop.f32.mrf.mxu1 }
 0x185   : > { %v1291_v17 = vld [vmem:[#allocation2 + $0x1e8] sm:$0xff]  ;;  %1457 = vst.msk [vmem:[%s2308_s6 + $0xe0] sm:$0xff] %vm231_vm2, %v1393_v12  ;;  %v1330_v20 = vadd.f32 %v1740_v47, %v1259_v16  ;;  %1194 = vst.msk [vmem:[#allocation2 + $0xf8] sm:$0xff] %vm231_vm2, %v1129_v14 }
 0x186   : > { %1489 = vst.msk [vmem:[%s2308_s6 + $0x1e0] sm:$0xff] %vm231_vm2, %v1425_v13  ;;  %v1362_v21 = vadd.f32 %v1740_v47, %v1291_v17  ;;  %1226 = vst.msk [vmem:[#allocation2 + $0x1f8] sm:$0xff] %vm231_vm2, %v1161_v15 }
 0x187   : > { %v1394_v22 = vmax.f32 %v1330_v20, 0.0 }
 0x188   : > { %v1426_v23 = vmax.f32 %v1362_v21, 0.0  ;;  %v1260_v24 = vld [vmem:[#allocation2 + $0xf0] sm:$0xff] }
 0x189   : > { %v1292_v25 = vld [vmem:[#allocation2 + $0x1f0] sm:$0xff]  ;;  %1458 = vst.msk [vmem:[%s2308_s6 + $0xe8] sm:$0xff] %vm231_vm2, %v1394_v22  ;;  %v1331_v26 = vadd.f32 %v1740_v47, %v1260_v24 }
 0x18a   : > { %1490 = vst.msk [vmem:[%s2308_s6 + $0x1e8] sm:$0xff] %vm231_vm2, %v1426_v23  ;;  %v1363_v27 = vadd.f32 %v1740_v47, %v1292_v25 }
 0x18b   : > { %v1395_v28 = vmax.f32 %v1331_v26, 0.0 }
 0x18c   : > { %v1427_v29 = vmax.f32 %v1363_v27, 0.0  ;;  %v1261_v30 = vld [vmem:[#allocation2 + $0xf8] sm:$0xff] }
 0x18d   : > { %v1293_v31 = vld [vmem:[#allocation2 + $0x1f8] sm:$0xff]  ;;  %1459 = vst.msk [vmem:[%s2308_s6 + $0xf0] sm:$0xff] %vm231_vm2, %v1395_v28  ;;  %v1332_v32 = vadd.f32 %v1740_v47, %v1261_v30 }
 0x18e   : > { %1491 = vst.msk [vmem:[%s2308_s6 + $0x1f0] sm:$0xff] %vm231_vm2, %v1427_v29  ;;  %v1364_v33 = vadd.f32 %v1740_v47, %v1293_v31 }
 0x18f   : > { %v1396_v34 = vmax.f32 %v1332_v32, 0.0 }
 0x190   : > { %v1428_v35 = vmax.f32 %v1364_v33, 0.0 }
 0x191   : > { %1460 = vst.msk [vmem:[%s2308_s6 + $0xf8] sm:$0xff] %vm231_vm2, %v1396_v34 }
 0x192   : > { %1492 = vst.msk [vmem:[%s2308_s6 + $0x1f8] sm:$0xff] %vm231_vm2, %v1428_v35 }
 0x193 PF: > { %s13_s14 = sadd.s32 1, %s1763_s14   ;;  %s2566_s12 = smov %s1759_s13 }
 0x194   : > { %p10_p5 = scmp.ge.s32.totalorder %s13_s14, 4   ;;  %s2567_s13 = smov %s2569_s15 }
 0x196   :  { %12 = sbr.rel (!%p10_p5) target bundleno = 2 (0x2), region = 73 }

</bundles_post_ra>
